<compile_context>
chip_gen: v5e
topology: v5e:2x2
jax: 0.10.0
libtpu: 0.0.40
codegen_flags: <defaults>
</compile_context>

<pallas_src>
import jax
import jax.numpy as jnp
from jax.experimental import pallas as pl
from jax.experimental.pallas import tpu as pltpu


ENCODER_DIMS = (1024, 512, 256, 128, 64, 20)          # logical PyTorch layer widths
NUM_LAYERS = len(ENCODER_DIMS)
OUT_DIM = 20                                          # true output width
MIN_WIDTH = 128                                       # lane-dense padding target
PADDED_DIMS = tuple(max(d, MIN_WIDTH) for d in ENCODER_DIMS)   # (1024,512,256,128,128,128)
PADDED_OUT = PADDED_DIMS[-1]                          # 128
MAX_ROW_TILE = 1024                                   # batch-row tile cap
MIN_ROW_TILE = 16                                     # multiple of 16 so half-tiles are 8-aligned


# ---------------------------------------------------------------------------
# Fused kernel: 6 x (Linear + bias + ReLU), two interleaved row half-tiles.
# refs layout: (x_ref, w0, b0, w1, b1, ..., w5, b5, o_ref)
# ---------------------------------------------------------------------------
def _encoder_fused_kernel(x_ref, *refs):
    o_ref = refs[-1]
    half = x_ref.shape[0] // 2                         # static; TM is a multiple of 16
    # Two independent half-tiles -> independent MXU work per layer that can overlap
    # the other half's VPU epilogue.
    h = [x_ref[pl.ds(0, half), :].astype(jnp.bfloat16),
         x_ref[pl.ds(half, half), :].astype(jnp.bfloat16)]
    for layer in range(NUM_LAYERS):
        w = refs[2 * layer][...]                       # (K, N) bf16, VMEM-resident
        b = refs[2 * layer + 1][...]                   # (1, N) f32
        acc = [jnp.dot(h[0], w, preferred_element_type=jnp.float32),
               jnp.dot(h[1], w, preferred_element_type=jnp.float32)]
        if layer < NUM_LAYERS - 1:
            # bf16 carry: identical numerics to casting before the next dot,
            # half the live-activation footprint.
            h = [jnp.maximum(a + b, 0.0).astype(jnp.bfloat16) for a in acc]
        else:
            # Final layer: f32 lane-dense (128-wide) unmasked stores.
            o_ref[pl.ds(0, half), :] = jnp.maximum(acc[0] + b, 0.0)
            o_ref[pl.ds(half, half), :] = jnp.maximum(acc[1] + b, 0.0)


# ---------------------------------------------------------------------------
# Params: weights as (in, out) bf16 (transpose of PyTorch storage, same math),
# biases f32; layers 5/6 zero-padded to 128 lanes (zero rows/cols -> identical math).
# PyTorch nn.Linear default init: U(-1/sqrt(fan_in), 1/sqrt(fan_in)) for w and b.
# ---------------------------------------------------------------------------
def init_encoder_params(key, input_dim):
    dims = (input_dim,) + ENCODER_DIMS
    pdims = (input_dim,) + PADDED_DIMS
    params = []
    for i in range(NUM_LAYERS):
        fan_in, fan_out = dims[i], dims[i + 1]
        pin, pout = pdims[i], pdims[i + 1]
        key, kw, kb = jax.random.split(key, 3)
        bound = 1.0 / float(fan_in) ** 0.5
        w = jax.random.uniform(kw, (fan_in, fan_out), jnp.float32, -bound, bound)
        b = jax.random.uniform(kb, (1, fan_out), jnp.float32, -bound, bound)
        w = jnp.pad(w, ((0, pin - fan_in), (0, pout - fan_out)))
        b = jnp.pad(b, ((0, 0), (0, pout - fan_out)))
        params.append((w.astype(jnp.bfloat16), b))
    return params


def _round_up(x, m):
    return (x + m - 1) // m * m


def _pick_row_tile(m):
    m_aligned = _round_up(max(m, MIN_ROW_TILE), MIN_ROW_TILE)
    if m_aligned <= MAX_ROW_TILE:
        # Large-enough batches: split into >=2 tiles so the parallel grid axis can
        # use both TensorCores on v7x.
        if m_aligned >= 2 * 128:
            return _round_up((m_aligned + 1) // 2, MIN_ROW_TILE)
        return m_aligned
    return MAX_ROW_TILE


# ---------------------------------------------------------------------------
# Wrapper: one pallas_call for the whole encoder, batch-tiled over a parallel grid.
# ---------------------------------------------------------------------------
def _encoder_forward_impl(x, params):
    M, K0 = x.shape
    TM = _pick_row_tile(M)
    Mp = _round_up(M, TM)
    if Mp != M:
        x = jnp.pad(x, ((0, Mp - M), (0, 0)))
    grid = (Mp // TM,)

    in_specs = [pl.BlockSpec((TM, K0), lambda i: (i, 0))]
    flat_params = []
    for w, b in params:
        # Grid-invariant index_map -> weights stay VMEM-resident across the batch
        # grid; Buffered(1) avoids allocating a useless second pipeline buffer.
        in_specs.append(pl.BlockSpec(w.shape, lambda i: (0, 0),
                                     pipeline_mode=pl.Buffered(1)))
        in_specs.append(pl.BlockSpec(b.shape, lambda i: (0, 0),
                                     pipeline_mode=pl.Buffered(1)))
        flat_params += [w, b]

    # Static cost / VMEM estimates (shapes only; valid under jit).
    weight_bytes = sum(int(w.size) * w.dtype.itemsize + int(b.size) * b.dtype.itemsize
                       for w, b in params)
    flops = 2 * Mp * sum(int(w.shape[0]) * int(w.shape[1]) for w, _ in params)
    bytes_accessed = Mp * K0 * 4 + Mp * PADDED_OUT * 4 + weight_bytes
    # 2x double-buffered x/out blocks + resident weights + peak f32 acc & bf16 act.
    vmem_est = (2 * TM * K0 * 4 + 2 * TM * PADDED_OUT * 4 + weight_bytes
                + TM * PADDED_DIMS[0] * (4 + 2))
    vmem_limit = int(min(64 * 1024 * 1024, max(32 * 1024 * 1024, 2 * vmem_est)))

    out = pl.pallas_call(
        _encoder_fused_kernel,
        out_shape=jax.ShapeDtypeStruct((Mp, PADDED_OUT), jnp.float32),
        grid=grid,
        in_specs=in_specs,
        out_specs=pl.BlockSpec((TM, PADDED_OUT), lambda i: (i, 0)),
        compiler_params=pltpu.CompilerParams(
            dimension_semantics=("parallel",),
            vmem_limit_bytes=vmem_limit),
        cost_estimate=pl.CostEstimate(flops=flops, transcendentals=0,
                                      bytes_accessed=bytes_accessed),
    )(x, *flat_params)
    # Padded batch rows / padded output lanes are garbage/zero; slice them off.
    return out[:M, :OUT_DIM]


encoder_forward = jax.jit(_encoder_forward_impl)


# ---------------------------------------------------------------------------
# Pure-JAX reference with identical numerics (bf16 dot inputs, f32 accumulate).
# ---------------------------------------------------------------------------
def encoder_forward_ref(x, params):
    h = x.astype(jnp.bfloat16)
    for i, (w, b) in enumerate(params):
        acc = jnp.dot(h, w, preferred_element_type=jnp.float32)
        h = jnp.maximum(acc + b, 0.0)
        if i < NUM_LAYERS - 1:
            h = h.astype(jnp.bfloat16)
    return h[:, :OUT_DIM]


if __name__ == "__main__":
    key = jax.random.PRNGKey(0)
    k_data, k_params = jax.random.split(key)

    batch = 8         # small batch
    input_dim = 32    # stand-in for train_data.shape[1] (dataset-dependent in original)
    # TODO(synk): CSV loading / MinMaxScaler preprocessing from the original script is
    # out of scope for the kernel; inputs here are synthetic values in [0, 1].

    x = jax.random.uniform(k_data, (batch, input_dim), jnp.float32)
    params = init_encoder_params(k_params, input_dim)

    out = jax.block_until_ready(encoder_forward(x, params))
    assert out.shape == (batch, OUT_DIM), out.shape

    ref = encoder_forward_ref(x, params)
    assert jnp.allclose(out, ref, atol=2e-3, rtol=2e-3), "mismatch vs pure-JAX reference"

    print("KERNEL_OK")
</pallas_src>

<mosaic_0001>
module attributes {stable_mosaic.version = 11 : i64} {
  func.func @_encoder_fused_kernel(%arg0: i32, %arg1: memref<16x32xf32, #tpu.memory_space<vmem>>, %arg2: memref<32x1024xbf16, #tpu.memory_space<vmem>>, %arg3: memref<1x1024xf32, #tpu.memory_space<vmem>>, %arg4: memref<1024x512xbf16, #tpu.memory_space<vmem>>, %arg5: memref<1x512xf32, #tpu.memory_space<vmem>>, %arg6: memref<512x256xbf16, #tpu.memory_space<vmem>>, %arg7: memref<1x256xf32, #tpu.memory_space<vmem>>, %arg8: memref<256x128xbf16, #tpu.memory_space<vmem>>, %arg9: memref<1x128xf32, #tpu.memory_space<vmem>>, %arg10: memref<128x128xbf16, #tpu.memory_space<vmem>>, %arg11: memref<1x128xf32, #tpu.memory_space<vmem>>, %arg12: memref<128x128xbf16, #tpu.memory_space<vmem>>, %arg13: memref<1x128xf32, #tpu.memory_space<vmem>>, %arg14: memref<16x128xf32, #tpu.memory_space<vmem>>) attributes {dimension_semantics = [#tpu.dimension_semantics<parallel>], iteration_bounds = array<i64: 1>, scalar_prefetch = 0 : i64, scratch_operands = 0 : i64, tpu.core_type = #tpu.core_type<tc>, window_params = [{transform_indices = @transform_0, window_bounds = array<i64: 16, 32>}, {pipeline_mode = #tpu.pipeline_mode<synchronous>, transform_indices = @transform_1, window_bounds = array<i64: 32, 1024>}, {pipeline_mode = #tpu.pipeline_mode<synchronous>, transform_indices = @transform_2, window_bounds = array<i64: 1, 1024>}, {pipeline_mode = #tpu.pipeline_mode<synchronous>, transform_indices = @transform_3, window_bounds = array<i64: 1024, 512>}, {pipeline_mode = #tpu.pipeline_mode<synchronous>, transform_indices = @transform_4, window_bounds = array<i64: 1, 512>}, {pipeline_mode = #tpu.pipeline_mode<synchronous>, transform_indices = @transform_5, window_bounds = array<i64: 512, 256>}, {pipeline_mode = #tpu.pipeline_mode<synchronous>, transform_indices = @transform_6, window_bounds = array<i64: 1, 256>}, {pipeline_mode = #tpu.pipeline_mode<synchronous>, transform_indices = @transform_7, window_bounds = array<i64: 256, 128>}, {pipeline_mode = #tpu.pipeline_mode<synchronous>, transform_indices = @transform_8, window_bounds = array<i64: 1, 128>}, {pipeline_mode = #tpu.pipeline_mode<synchronous>, transform_indices = @transform_9, window_bounds = array<i64: 128, 128>}, {pipeline_mode = #tpu.pipeline_mode<synchronous>, transform_indices = @transform_10, window_bounds = array<i64: 1, 128>}, {pipeline_mode = #tpu.pipeline_mode<synchronous>, transform_indices = @transform_11, window_bounds = array<i64: 128, 128>}, {pipeline_mode = #tpu.pipeline_mode<synchronous>, transform_indices = @transform_12, window_bounds = array<i64: 1, 128>}, {transform_indices = @transform_13, window_bounds = array<i64: 16, 128>}]} {
    %c0 = arith.constant 0 : index
    %c0_0 = arith.constant 0 : index
    %0 = vector.load %arg1[%c0, %c0_0] : memref<16x32xf32, #tpu.memory_space<vmem>>, vector<8x32xf32>
    %1 = arith.truncf %0 : vector<8x32xf32> to vector<8x32xbf16>
    %c8 = arith.constant 8 : index
    %c0_1 = arith.constant 0 : index
    %2 = vector.load %arg1[%c8, %c0_1] : memref<16x32xf32, #tpu.memory_space<vmem>>, vector<8x32xf32>
    %3 = arith.truncf %2 : vector<8x32xf32> to vector<8x32xbf16>
    %c0_2 = arith.constant 0 : index
    %c0_3 = arith.constant 0 : index
    %4 = vector.load %arg2[%c0_2, %c0_3] : memref<32x1024xbf16, #tpu.memory_space<vmem>>, vector<32x1024xbf16>
    %c0_4 = arith.constant 0 : index
    %c0_5 = arith.constant 0 : index
    %5 = vector.load %arg3[%c0_4, %c0_5] : memref<1x1024xf32, #tpu.memory_space<vmem>>, vector<1x1024xf32>
    %cst = arith.constant dense<0.000000e+00> : vector<8x1024xf32>
    %6 = tpu.matmul %1, %4, %cst {dimension_numbers = #tpu.dot_dimension_numbers<[1], [0], [0], [1], [0, 0, 1, 1], [], []>} : vector<8x32xbf16>, vector<32x1024xbf16>, vector<8x1024xf32> -> vector<8x1024xf32>
    %cst_6 = arith.constant dense<0.000000e+00> : vector<8x1024xf32>
    %7 = tpu.matmul %3, %4, %cst_6 {dimension_numbers = #tpu.dot_dimension_numbers<[1], [0], [0], [1], [0, 0, 1, 1], [], []>} : vector<8x32xbf16>, vector<32x1024xbf16>, vector<8x1024xf32> -> vector<8x1024xf32>
    %8 = vector.broadcast %5 : vector<1x1024xf32> to vector<8x1024xf32>
    %9 = arith.addf %6, %8 : vector<8x1024xf32>
    %cst_7 = arith.constant 0.000000e+00 : f32
    %10 = vector.broadcast %cst_7 : f32 to vector<8x1024xf32>
    %11 = arith.maximumf %9, %10 : vector<8x1024xf32>
    %12 = arith.truncf %11 : vector<8x1024xf32> to vector<8x1024xbf16>
    %13 = vector.broadcast %5 : vector<1x1024xf32> to vector<8x1024xf32>
    %14 = arith.addf %7, %13 : vector<8x1024xf32>
    %cst_8 = arith.constant 0.000000e+00 : f32
    %15 = vector.broadcast %cst_8 : f32 to vector<8x1024xf32>
    %16 = arith.maximumf %14, %15 : vector<8x1024xf32>
    %17 = arith.truncf %16 : vector<8x1024xf32> to vector<8x1024xbf16>
    %c0_9 = arith.constant 0 : index
    %c0_10 = arith.constant 0 : index
    %18 = vector.load %arg4[%c0_9, %c0_10] : memref<1024x512xbf16, #tpu.memory_space<vmem>>, vector<1024x512xbf16>
    %c0_11 = arith.constant 0 : index
    %c0_12 = arith.constant 0 : index
    %19 = vector.load %arg5[%c0_11, %c0_12] : memref<1x512xf32, #tpu.memory_space<vmem>>, vector<1x512xf32>
    %cst_13 = arith.constant dense<0.000000e+00> : vector<8x512xf32>
    %20 = tpu.matmul %12, %18, %cst_13 {dimension_numbers = #tpu.dot_dimension_numbers<[1], [0], [0], [1], [0, 0, 1, 1], [], []>} : vector<8x1024xbf16>, vector<1024x512xbf16>, vector<8x512xf32> -> vector<8x512xf32>
    %cst_14 = arith.constant dense<0.000000e+00> : vector<8x512xf32>
    %21 = tpu.matmul %17, %18, %cst_14 {dimension_numbers = #tpu.dot_dimension_numbers<[1], [0], [0], [1], [0, 0, 1, 1], [], []>} : vector<8x1024xbf16>, vector<1024x512xbf16>, vector<8x512xf32> -> vector<8x512xf32>
    %22 = vector.broadcast %19 : vector<1x512xf32> to vector<8x512xf32>
    %23 = arith.addf %20, %22 : vector<8x512xf32>
    %cst_15 = arith.constant 0.000000e+00 : f32
    %24 = vector.broadcast %cst_15 : f32 to vector<8x512xf32>
    %25 = arith.maximumf %23, %24 : vector<8x512xf32>
    %26 = arith.truncf %25 : vector<8x512xf32> to vector<8x512xbf16>
    %27 = vector.broadcast %19 : vector<1x512xf32> to vector<8x512xf32>
    %28 = arith.addf %21, %27 : vector<8x512xf32>
    %cst_16 = arith.constant 0.000000e+00 : f32
    %29 = vector.broadcast %cst_16 : f32 to vector<8x512xf32>
    %30 = arith.maximumf %28, %29 : vector<8x512xf32>
    %31 = arith.truncf %30 : vector<8x512xf32> to vector<8x512xbf16>
    %c0_17 = arith.constant 0 : index
    %c0_18 = arith.constant 0 : index
    %32 = vector.load %arg6[%c0_17, %c0_18] : memref<512x256xbf16, #tpu.memory_space<vmem>>, vector<512x256xbf16>
    %c0_19 = arith.constant 0 : index
    %c0_20 = arith.constant 0 : index
    %33 = vector.load %arg7[%c0_19, %c0_20] : memref<1x256xf32, #tpu.memory_space<vmem>>, vector<1x256xf32>
    %cst_21 = arith.constant dense<0.000000e+00> : vector<8x256xf32>
    %34 = tpu.matmul %26, %32, %cst_21 {dimension_numbers = #tpu.dot_dimension_numbers<[1], [0], [0], [1], [0, 0, 1, 1], [], []>} : vector<8x512xbf16>, vector<512x256xbf16>, vector<8x256xf32> -> vector<8x256xf32>
    %cst_22 = arith.constant dense<0.000000e+00> : vector<8x256xf32>
    %35 = tpu.matmul %31, %32, %cst_22 {dimension_numbers = #tpu.dot_dimension_numbers<[1], [0], [0], [1], [0, 0, 1, 1], [], []>} : vector<8x512xbf16>, vector<512x256xbf16>, vector<8x256xf32> -> vector<8x256xf32>
    %36 = vector.broadcast %33 : vector<1x256xf32> to vector<8x256xf32>
    %37 = arith.addf %34, %36 : vector<8x256xf32>
    %cst_23 = arith.constant 0.000000e+00 : f32
    %38 = vector.broadcast %cst_23 : f32 to vector<8x256xf32>
    %39 = arith.maximumf %37, %38 : vector<8x256xf32>
    %40 = arith.truncf %39 : vector<8x256xf32> to vector<8x256xbf16>
    %41 = vector.broadcast %33 : vector<1x256xf32> to vector<8x256xf32>
    %42 = arith.addf %35, %41 : vector<8x256xf32>
    %cst_24 = arith.constant 0.000000e+00 : f32
    %43 = vector.broadcast %cst_24 : f32 to vector<8x256xf32>
    %44 = arith.maximumf %42, %43 : vector<8x256xf32>
    %45 = arith.truncf %44 : vector<8x256xf32> to vector<8x256xbf16>
    %c0_25 = arith.constant 0 : index
    %c0_26 = arith.constant 0 : index
    %46 = vector.load %arg8[%c0_25, %c0_26] : memref<256x128xbf16, #tpu.memory_space<vmem>>, vector<256x128xbf16>
    %c0_27 = arith.constant 0 : index
    %c0_28 = arith.constant 0 : index
    %47 = vector.load %arg9[%c0_27, %c0_28] : memref<1x128xf32, #tpu.memory_space<vmem>>, vector<1x128xf32>
    %cst_29 = arith.constant dense<0.000000e+00> : vector<8x128xf32>
    %48 = tpu.matmul %40, %46, %cst_29 {dimension_numbers = #tpu.dot_dimension_numbers<[1], [0], [0], [1], [0, 0, 1, 1], [], []>} : vector<8x256xbf16>, vector<256x128xbf16>, vector<8x128xf32> -> vector<8x128xf32>
    %cst_30 = arith.constant dense<0.000000e+00> : vector<8x128xf32>
    %49 = tpu.matmul %45, %46, %cst_30 {dimension_numbers = #tpu.dot_dimension_numbers<[1], [0], [0], [1], [0, 0, 1, 1], [], []>} : vector<8x256xbf16>, vector<256x128xbf16>, vector<8x128xf32> -> vector<8x128xf32>
    %50 = vector.broadcast %47 : vector<1x128xf32> to vector<8x128xf32>
    %51 = arith.addf %48, %50 : vector<8x128xf32>
    %cst_31 = arith.constant 0.000000e+00 : f32
    %52 = vector.broadcast %cst_31 : f32 to vector<8x128xf32>
    %53 = arith.maximumf %51, %52 : vector<8x128xf32>
    %54 = arith.truncf %53 : vector<8x128xf32> to vector<8x128xbf16>
    %55 = vector.broadcast %47 : vector<1x128xf32> to vector<8x128xf32>
    %56 = arith.addf %49, %55 : vector<8x128xf32>
    %cst_32 = arith.constant 0.000000e+00 : f32
    %57 = vector.broadcast %cst_32 : f32 to vector<8x128xf32>
    %58 = arith.maximumf %56, %57 : vector<8x128xf32>
    %59 = arith.truncf %58 : vector<8x128xf32> to vector<8x128xbf16>
    %c0_33 = arith.constant 0 : index
    %c0_34 = arith.constant 0 : index
    %60 = vector.load %arg10[%c0_33, %c0_34] : memref<128x128xbf16, #tpu.memory_space<vmem>>, vector<128x128xbf16>
    %c0_35 = arith.constant 0 : index
    %c0_36 = arith.constant 0 : index
    %61 = vector.load %arg11[%c0_35, %c0_36] : memref<1x128xf32, #tpu.memory_space<vmem>>, vector<1x128xf32>
    %cst_37 = arith.constant dense<0.000000e+00> : vector<8x128xf32>
    %62 = tpu.matmul %54, %60, %cst_37 {dimension_numbers = #tpu.dot_dimension_numbers<[1], [0], [0], [1], [0, 0, 1, 1], [], []>} : vector<8x128xbf16>, vector<128x128xbf16>, vector<8x128xf32> -> vector<8x128xf32>
    %cst_38 = arith.constant dense<0.000000e+00> : vector<8x128xf32>
    %63 = tpu.matmul %59, %60, %cst_38 {dimension_numbers = #tpu.dot_dimension_numbers<[1], [0], [0], [1], [0, 0, 1, 1], [], []>} : vector<8x128xbf16>, vector<128x128xbf16>, vector<8x128xf32> -> vector<8x128xf32>
    %64 = vector.broadcast %61 : vector<1x128xf32> to vector<8x128xf32>
    %65 = arith.addf %62, %64 : vector<8x128xf32>
    %cst_39 = arith.constant 0.000000e+00 : f32
    %66 = vector.broadcast %cst_39 : f32 to vector<8x128xf32>
    %67 = arith.maximumf %65, %66 : vector<8x128xf32>
    %68 = arith.truncf %67 : vector<8x128xf32> to vector<8x128xbf16>
    %69 = vector.broadcast %61 : vector<1x128xf32> to vector<8x128xf32>
    %70 = arith.addf %63, %69 : vector<8x128xf32>
    %cst_40 = arith.constant 0.000000e+00 : f32
    %71 = vector.broadcast %cst_40 : f32 to vector<8x128xf32>
    %72 = arith.maximumf %70, %71 : vector<8x128xf32>
    %73 = arith.truncf %72 : vector<8x128xf32> to vector<8x128xbf16>
    %c0_41 = arith.constant 0 : index
    %c0_42 = arith.constant 0 : index
    %74 = vector.load %arg12[%c0_41, %c0_42] : memref<128x128xbf16, #tpu.memory_space<vmem>>, vector<128x128xbf16>
    %c0_43 = arith.constant 0 : index
    %c0_44 = arith.constant 0 : index
    %75 = vector.load %arg13[%c0_43, %c0_44] : memref<1x128xf32, #tpu.memory_space<vmem>>, vector<1x128xf32>
    %cst_45 = arith.constant dense<0.000000e+00> : vector<8x128xf32>
    %76 = tpu.matmul %68, %74, %cst_45 {dimension_numbers = #tpu.dot_dimension_numbers<[1], [0], [0], [1], [0, 0, 1, 1], [], []>} : vector<8x128xbf16>, vector<128x128xbf16>, vector<8x128xf32> -> vector<8x128xf32>
    %cst_46 = arith.constant dense<0.000000e+00> : vector<8x128xf32>
    %77 = tpu.matmul %73, %74, %cst_46 {dimension_numbers = #tpu.dot_dimension_numbers<[1], [0], [0], [1], [0, 0, 1, 1], [], []>} : vector<8x128xbf16>, vector<128x128xbf16>, vector<8x128xf32> -> vector<8x128xf32>
    %78 = vector.broadcast %75 : vector<1x128xf32> to vector<8x128xf32>
    %79 = arith.addf %76, %78 : vector<8x128xf32>
    %cst_47 = arith.constant 0.000000e+00 : f32
    %80 = vector.broadcast %cst_47 : f32 to vector<8x128xf32>
    %81 = arith.maximumf %79, %80 : vector<8x128xf32>
    %c0_48 = arith.constant 0 : index
    %c0_49 = arith.constant 0 : index
    %82 = vector.load %arg14[%c0_48, %c0_49] : memref<16x128xf32, #tpu.memory_space<vmem>>, vector<8x128xf32>
    tpu.vector_store %arg14[%c0_48, %c0_49], %81 {strides = array<i32>} : memref<16x128xf32, #tpu.memory_space<vmem>>, vector<8x128xf32>,
    %83 = vector.broadcast %75 : vector<1x128xf32> to vector<8x128xf32>
    %84 = arith.addf %77, %83 : vector<8x128xf32>
    %cst_50 = arith.constant 0.000000e+00 : f32
    %85 = vector.broadcast %cst_50 : f32 to vector<8x128xf32>
    %86 = arith.maximumf %84, %85 : vector<8x128xf32>
    %c8_51 = arith.constant 8 : index
    %c0_52 = arith.constant 0 : index
    %87 = vector.load %arg14[%c8_51, %c0_52] : memref<16x128xf32, #tpu.memory_space<vmem>>, vector<8x128xf32>
    tpu.vector_store %arg14[%c8_51, %c0_52], %86 {strides = array<i32>} : memref<16x128xf32, #tpu.memory_space<vmem>>, vector<8x128xf32>,
    return
  }
  func.func @transform_0(%arg0: i32) -> (i32, i32) {
    %c0_i32 = arith.constant 0 : i32
    %c0_i32_0 = arith.constant 0 : i32
    return %arg0, %c0_i32 : i32, i32
  }
  func.func @transform_1(%arg0: i32) -> (i32, i32) {
    %c0_i32 = arith.constant 0 : i32
    %c0_i32_0 = arith.constant 0 : i32
    %c0_i32_1 = arith.constant 0 : i32
    return %c0_i32, %c0_i32_0 : i32, i32
  }
  func.func @transform_2(%arg0: i32) -> (i32, i32) {
    %c0_i32 = arith.constant 0 : i32
    %c0_i32_0 = arith.constant 0 : i32
    %c0_i32_1 = arith.constant 0 : i32
    return %c0_i32, %c0_i32_0 : i32, i32
  }
  func.func @transform_3(%arg0: i32) -> (i32, i32) {
    %c0_i32 = arith.constant 0 : i32
    %c0_i32_0 = arith.constant 0 : i32
    %c0_i32_1 = arith.constant 0 : i32
    return %c0_i32, %c0_i32_0 : i32, i32
  }
  func.func @transform_4(%arg0: i32) -> (i32, i32) {
    %c0_i32 = arith.constant 0 : i32
    %c0_i32_0 = arith.constant 0 : i32
    %c0_i32_1 = arith.constant 0 : i32
    return %c0_i32, %c0_i32_0 : i32, i32
  }
  func.func @transform_5(%arg0: i32) -> (i32, i32) {
    %c0_i32 = arith.constant 0 : i32
    %c0_i32_0 = arith.constant 0 : i32
    %c0_i32_1 = arith.constant 0 : i32
    return %c0_i32, %c0_i32_0 : i32, i32
  }
  func.func @transform_6(%arg0: i32) -> (i32, i32) {
    %c0_i32 = arith.constant 0 : i32
    %c0_i32_0 = arith.constant 0 : i32
    %c0_i32_1 = arith.constant 0 : i32
    return %c0_i32, %c0_i32_0 : i32, i32
  }
  func.func @transform_7(%arg0: i32) -> (i32, i32) {
    %c0_i32 = arith.constant 0 : i32
    %c0_i32_0 = arith.constant 0 : i32
    %c0_i32_1 = arith.constant 0 : i32
    return %c0_i32, %c0_i32_0 : i32, i32
  }
  func.func @transform_8(%arg0: i32) -> (i32, i32) {
    %c0_i32 = arith.constant 0 : i32
    %c0_i32_0 = arith.constant 0 : i32
    %c0_i32_1 = arith.constant 0 : i32
    return %c0_i32, %c0_i32_0 : i32, i32
  }
  func.func @transform_9(%arg0: i32) -> (i32, i32) {
    %c0_i32 = arith.constant 0 : i32
    %c0_i32_0 = arith.constant 0 : i32
    %c0_i32_1 = arith.constant 0 : i32
    return %c0_i32, %c0_i32_0 : i32, i32
  }
  func.func @transform_10(%arg0: i32) -> (i32, i32) {
    %c0_i32 = arith.constant 0 : i32
    %c0_i32_0 = arith.constant 0 : i32
    %c0_i32_1 = arith.constant 0 : i32
    return %c0_i32, %c0_i32_0 : i32, i32
  }
  func.func @transform_11(%arg0: i32) -> (i32, i32) {
    %c0_i32 = arith.constant 0 : i32
    %c0_i32_0 = arith.constant 0 : i32
    %c0_i32_1 = arith.constant 0 : i32
    return %c0_i32, %c0_i32_0 : i32, i32
  }
  func.func @transform_12(%arg0: i32) -> (i32, i32) {
    %c0_i32 = arith.constant 0 : i32
    %c0_i32_0 = arith.constant 0 : i32
    %c0_i32_1 = arith.constant 0 : i32
    return %c0_i32, %c0_i32_0 : i32, i32
  }
  func.func @transform_13(%arg0: i32) -> (i32, i32) {
    %c0_i32 = arith.constant 0 : i32
    %c0_i32_0 = arith.constant 0 : i32
    return %arg0, %c0_i32 : i32, i32
  }
}

</mosaic_0001>

<bundles_post_ra>
// kernel: _encoder_forward_impl.1
= control target key start
LH: loop header
LB: loop body
LE: loop exit
PB: predicated region body
PF: predicated region fallthrough
CT: control target
= control target key end

     0   :  { %18 = vsyncpa [#allocation3], 0  ;;  %s7613_s0 = inlined_call_operand.vmem [shape: f32[16,32], index: 0, kind: input, shape index: {}]   ;;  %s7614_s1 = inlined_call_operand.hbm [shape: bf16[32,1024], index: 1, kind: input, shape index: {}]   ;;  %s7615_s2 = inlined_call_operand.vmem [shape: f32[1,1024], index: 2, kind: input, shape index: {}]   ;;  %s7616_s3 = inlined_call_operand.hbm [shape: bf16[1024,512], index: 3, kind: input, shape index: {}]   ;;  %s7617_s4 = inlined_call_operand.vmem [shape: f32[1,512], index: 4, kind: input, shape index: {}]   ;;  %s7618_s5 = inlined_call_operand.hbm [shape: bf16[512,256], index: 5, kind: input, shape index: {}]   ;;  %s7619_s6 = inlined_call_operand.vmem [shape: f32[1,256], index: 6, kind: input, shape index: {}]   ;;  %s7620_s7 = inlined_call_operand.hbm [shape: bf16[256,128], index: 7, kind: input, shape index: {}]   ;;  %s7621_s8 = inlined_call_operand.vmem [shape: f32[1,128], index: 8, kind: input, shape index: {}]   ;;  %s7622_s9 = inlined_call_operand.hbm [shape: bf16[128,128], index: 9, kind: input, shape index: {}]   ;;  %s7623_s10 = inlined_call_operand.vmem [shape: f32[1,128], index: 10, kind: input, shape index: {}]   ;;  %s7624_s11 = inlined_call_operand.hbm [shape: bf16[128,128], index: 11, kind: input, shape index: {}]   ;;  %s7625_s12 = inlined_call_operand.vmem [shape: f32[1,128], index: 12, kind: input, shape index: {}]   ;;  %s7626_s13 = inlined_call_operand.vmem [shape: f32[16,128], index: 13, kind: output, shape index: {}]  }
   0x1   :  { %19 = vsyncpa [#allocation5], 0 }
   0x2   :  { %20 = vsyncpa [#allocation8], 0  ;;  %s43_s27 = sshll.u32 %s7616_s3, 4  ;;  %s44_s27 = int_to_ptr.hbm [resolvable:$true] %s43_s27 }
   0x3   :  { %21 = vsyncpa [#allocation11], 0  ;;  %s5921_s28 = smov [#allocation4]   ;;  %s73_s15 = sshll.u32 %s7620_s7, 4  ;;  %s74_s15 = int_to_ptr.hbm [resolvable:$true] %s73_s15 }
   0x4   :  { %s45_s29 = sshll.u32 %s5921_s28, 4  ;;  %s5922_s16 = smov 256   ;;  %s46_s29 = int_to_ptr.vmem [resolvable:$true] %s45_s29 }
   0x5   :  { %s5923_s17 = smov 16   ;;  %s5924_s18 = smov [#allocation7]  }
   0x6   :  { %51 = dma.hbm_to_vmem [thread:$0]  %s44_s27, 32768, %s46_s29, [#allocation5], %s5922_s16, %s5922_s16, %s5923_s17  }
   0x7   :  { %s75_s19 = sshll.u32 %s5924_s18, 4  ;;  %s5925_s20 = smov 64   ;;  %s76_s19 = int_to_ptr.vmem [resolvable:$true] %s75_s19 }
   0x8   :  { %s5926_s21 = smov 4   ;;  %s28_s23 = sshll.u32 %s7614_s1, 4  ;;  %s29_s23 = int_to_ptr.hbm [resolvable:$true] %s28_s23 }
   0x9   :  { %81 = dma.hbm_to_vmem [thread:$0]  %s74_s15, 2048, %s76_s19, [#allocation8], %s5925_s20, %s5925_s20, %s5926_s21  }
   0xa   :  { %s5927_s24 = smov [#allocation2]   ;;  %s58_s27 = sshll.u32 %s7618_s5, 4  ;;  %s59_s27 = int_to_ptr.hbm [resolvable:$true] %s58_s27 }
   0xb   :  { %s30_s7 = sshll.u32 %s5927_s24, 4  ;;  %s5928_s28 = smov 512   ;;  %s31_s7 = int_to_ptr.vmem [resolvable:$true] %s30_s7 }
   0xc   :  { %s5929_s29 = smov 32   ;;  %s5930_s30 = smov [#allocation6]  }
   0xd   :  { %36 = dma.hbm_to_vmem [thread:$0]  %s29_s23, 2048, %s31_s7, [#allocation3], %s5928_s28, %s5928_s28, %s5929_s29  }
   0xe   :  { %s60_s14 = sshll.u32 %s5930_s30, 4  ;;  %s5931_s15 = smov 128   ;;  %s61_s14 = int_to_ptr.vmem [resolvable:$true] %s60_s14 }
   0xf   :  { %s5932_s16 = smov 8   ;;  %s88_s18 = sshll.u32 %s7622_s9, 4  ;;  %s89_s18 = int_to_ptr.hbm [resolvable:$true] %s88_s18 }
  0x10   :  { %66 = dma.hbm_to_vmem [thread:$0]  %s59_s27, 8192, %s61_s14, [#allocation5], %s5931_s15, %s5931_s15, %s5932_s16  }
  0x11   :  { %s5933_s19 = smov [#allocation9]   ;;  %s103_s24 = sshll.u32 %s7624_s11, 4  ;;  %s104_s24 = int_to_ptr.hbm [resolvable:$true] %s103_s24 }
  0x12   :  { %s90_s3 = sshll.u32 %s5933_s19, 4  ;;  %s5934_s23 = smov [#allocation10]   ;;  %s91_s3 = int_to_ptr.vmem [resolvable:$true] %s90_s3 }
  0x13   :  { %96 = dma.hbm_to_vmem [thread:$0]  %s89_s18, 1024, %s91_s3, [#allocation8], %s5925_s20, %s5925_s20, %s5926_s21  }
  0x14   :  { %s105_s7 = sshll.u32 %s5934_s23, 4  ;;  %s106_s7 = int_to_ptr.vmem [resolvable:$true] %s105_s7 }
  0x15   :  { %111 = dma.hbm_to_vmem [thread:$0]  %s104_s24, 1024, %s106_s7, [#allocation11], %s5925_s20, %s5925_s20, %s5926_s21  }
  0x16   :  { %5913 = dma.done.wait [#allocation3], 2048  }
  0x17   :  { %5914 = vsyncadd [#allocation3], 4294965248 }
  0x18   :  { %5915 = dma.done.wait [#allocation5], 40960  }
  0x19   :  { %5916 = vsyncadd [#allocation5], 4294926336 }
  0x1a   :  { %5917 = dma.done.wait [#allocation8], 3072  }
  0x1b   :  { %5918 = vsyncadd [#allocation8], 4294964224 }
  0x1c   :  { %5919 = dma.done.wait [#allocation11], 1024  }
  0x1d   :  { %5920 = vsyncadd [#allocation11], 4294966272  ;;  %v3930_v0 = vld [vmem:[#allocation2 + $0x40] sm:$0xf]  ;;  %v5392_v2 = vld [vmem:[#allocation2 + $0x44] sm:$0xf] }
  0x1e   :  { %v5396_v1 = vld [vmem:[#allocation2 + $0x5c] sm:$0xf0]  ;;  %v3932_v4 = vld [vmem:[#allocation2 + $0x60] sm:$0xf0]  ;;  %v3938_v5 = vld [vmem:[#allocation2 + $0x48] sm:$0xf] }
  0x1f   :  { %v6032_v3 = vor.u32 %v5396_v1, %v3930_v0  ;;  %v5397_v6 = vld [vmem:[#allocation2 + $0x64] sm:$0xf0]  ;;  %v3935_v7 = vor.u32 %v5392_v2, %v3932_v4  ;;  %v5393_v9 = vld [vmem:[#allocation2 + $0x4c] sm:$0xf]  ;;  %v3898_v11 = vld [vmem:[#allocation2] sm:$0xf] }
  0x20   :  { %v6034_v8 = vor.u32 %v5397_v6, %v3938_v5  ;;  %v3940_v10 = vld [vmem:[#allocation2 + $0x68] sm:$0xf0]  ;;  %v5388_v13 = vld [vmem:[#allocation2 + $0x1c] sm:$0xf0]  ;;  %v5384_v14 = vld [vmem:[#allocation2 + $0x4] sm:$0xf] }
  0x21   :  { %267 = vmatpush.bf16.msra.mxu0 %v6032_v3  ;;  %v3943_v12 = vor.u32 %v5393_v9, %v3940_v10  ;;  %v3900_v15 = vld [vmem:[#allocation2 + $0x20] sm:$0xf0]  ;;  %280 = vmatpush.bf16.msra.mxu1 %v3935_v7  ;;  %v3899_v16 = vor.u32 %v5388_v13, %v3898_v11  ;;  %v3906_v18 = vld [vmem:[#allocation2 + $0x8] sm:$0xf]  ;;  %v5385_v20 = vld [vmem:[#allocation2 + $0xc] sm:$0xf] }
  0x22   :  { %293 = vmatpush.bf16.msra.mxu2 %v6034_v8  ;;  %v3903_v17 = vor.u32 %v5384_v14, %v3900_v15  ;;  %v5389_v19 = vld [vmem:[#allocation2 + $0x24] sm:$0xf0]  ;;  %v3908_v22 = vld [vmem:[#allocation2 + $0x28] sm:$0xf0]  ;;  %v139_v23 = vld [vmem:[%s7613_s0] sm:$0xff]  ;;  %vm257_vm0 = vcmask 261120  }
  0x23   :  { %306 = vmatpush.bf16.msra.mxu3 %v3943_v12  ;;  %v3907_v21 = vor.u32 %v5389_v19, %v3906_v18  ;;  %v3946_v24 = vld [vmem:[#allocation2 + $0x50] sm:$0xf]  ;;  %v3911_v25 = vor.u32 %v5385_v20, %v3908_v22  ;;  %v140_v26 = vpack.c.bf16 %v139_v23, %v139_v23  ;;  %v5394_v28 = vld [vmem:[#allocation2 + $0x54] sm:$0xf]  ;;  %v3954_v32 = vld [vmem:[#allocation2 + $0x58] sm:$0xf] }
  0x24   :  { %v5398_v27 = vld [vmem:[#allocation2 + $0x6c] sm:$0xf0]  ;;  %v3948_v29 = vld [vmem:[#allocation2 + $0x70] sm:$0xf0]  ;;  %v5399_v33 = vld [vmem:[#allocation2 + $0x74] sm:$0xf0] }
  0x25   :  { %268 = vmatpush.bf16.msra.mxu0 %v3899_v16  ;;  %v3947_v30 = vor.u32 %v5398_v27, %v3946_v24  ;;  %v3951_v31 = vor.u32 %v5394_v28, %v3948_v29  ;;  %v5395_v34 = vld [vmem:[#allocation2 + $0x5c] sm:$0xf]  ;;  %281 = vmatpush.bf16.msra.mxu1 %v3903_v17  ;;  %v3955_v35 = vor.u32 %v5399_v33, %v3954_v32  ;;  %v3914_v37 = vld [vmem:[#allocation2 + $0x10] sm:$0xf]  ;;  %v5386_v41 = vld [vmem:[#allocation2 + $0x14] sm:$0xf] }
  0x26   :  { %294 = vmatpush.bf16.msra.mxu2 %v3907_v21  ;;  %v3956_v36 = vld [vmem:[#allocation2 + $0x78] sm:$0xf0]  ;;  %v5390_v38 = vld [vmem:[#allocation2 + $0x2c] sm:$0xf0]  ;;  %v3916_v42 = vld [vmem:[#allocation2 + $0x30] sm:$0xf0] }
  0x27   :  { %307 = vmatpush.bf16.msra.mxu3 %v3911_v25  ;;  %v3959_v39 = vor.u32 %v5395_v34, %v3956_v36  ;;  %v3915_v40 = vor.u32 %v5390_v38, %v3914_v37  ;;  %v3922_v43 = vld [vmem:[#allocation2 + $0x18] sm:$0xf]  ;;  %v3919_v44 = vor.u32 %v5386_v41, %v3916_v42  ;;  %v5387_v46 = vld [vmem:[#allocation2 + $0x1c] sm:$0xf]  ;;  %v141_v50 = vld [vmem:[%s7613_s0 + $0x8] sm:$0xff] }
  0x28   :  { %3960 = vmatmul.msk.bf16.vlgmr.msra.gmra.mxu0 %vm257_vm0, %v140_v26  ;;  %v5391_v45 = vld [vmem:[#allocation2 + $0x34] sm:$0xf0]  ;;  %v3924_v47 = vld [vmem:[#allocation2 + $0x38] sm:$0xf0]  ;;  %3961 = vmatmul.msk.bf16.vlgmr.msra.gmra.mxu1 %vm257_vm0, %v140_v26  ;;  %v4090_v51 = vld [vmem:[#allocation4 + $0xe0] sm:$0xf]  ;;  %v6054_v57 = vpack.c.bf16 %v141_v50, %v141_v50 }
  0x29   :  { %319 = vmatpush.bf16.msrb.mxu0 %v3947_v30  ;;  %332 = vmatpush.bf16.msrb.mxu1 %v3951_v31  ;;  %v3923_v48 = vor.u32 %v5391_v45, %v3922_v43  ;;  %v3927_v49 = vor.u32 %v5387_v46, %v3924_v47  ;;  %v5430_v52 = vld [vmem:[#allocation4 + $0xec] sm:$0xf0]  ;;  %v4218_v53 = vld [vmem:[#allocation4 + $0x1e0] sm:$0xf] }
  0x2a   :  { %3962 = vmatmul.msk.bf16.vlgmr.msra.gmra.mxu2 %vm257_vm0, %v140_v26  ;;  %3963 = vmatmul.msk.bf16.vlgmr.msra.gmra.mxu3 %vm257_vm0, %v140_v26  ;;  %v5462_v54 = vld [vmem:[#allocation4 + $0x1ec] sm:$0xf0]  ;;  %v4346_v55 = vld [vmem:[#allocation4 + $0x2e0] sm:$0xf]  ;;  %v6056_v60 = vor.u32 %v5430_v52, %v4090_v51 }
  0x2b   :  { %345 = vmatpush.bf16.msrb.mxu2 %v3955_v35  ;;  %358 = vmatpush.bf16.msrb.mxu3 %v3959_v39  ;;  %v5494_v56 = vld [vmem:[#allocation4 + $0x2ec] sm:$0xf0]  ;;  %v4474_v58 = vld [vmem:[#allocation4 + $0x3e0] sm:$0xf]  ;;  %v6058_v61 = vor.u32 %v5462_v54, %v4218_v53 }
  0x2c   :  { %v5526_v59 = vld [vmem:[#allocation4 + $0x3ec] sm:$0xf0]  ;;  %v4074_v62 = vld [vmem:[#allocation4 + $0xc0] sm:$0xf]  ;;  %v6060_v1 = vor.u32 %v5494_v56, %v4346_v55 }
  0x2d   :  { %320 = vmatpush.bf16.msrb.mxu0 %v3915_v40  ;;  %333 = vmatpush.bf16.msrb.mxu1 %v3919_v44  ;;  %v5426_v63 = vld [vmem:[#allocation4 + $0xcc] sm:$0xf0]  ;;  %v4202_v0 = vld [vmem:[#allocation4 + $0x1c0] sm:$0xf] }
  0x2e   :  { %v5458_v2 = vld [vmem:[#allocation4 + $0x1cc] sm:$0xf0]  ;;  %v4330_v4 = vld [vmem:[#allocation4 + $0x2c0] sm:$0xf] }
  0x2f   :  { %346 = vmatpush.bf16.msrb.mxu2 %v3923_v48  ;;  %359 = vmatpush.bf16.msrb.mxu3 %v3927_v49  ;;  %v5490_v5 = vld [vmem:[#allocation4 + $0x2cc] sm:$0xf0]  ;;  %v4458_v6 = vld [vmem:[#allocation4 + $0x3c0] sm:$0xf]  ;;  %v6076_v9 = vor.u32 %v5458_v2, %v4202_v0 }
  0x30   :  { %v4058_v10 = vld [vmem:[#allocation4 + $0xa0] sm:$0xf]  ;;  %v5422_v11 = vld [vmem:[#allocation4 + $0xac] sm:$0xf0]  ;;  %v6079_v13 = vor.u32 %v5490_v5, %v4330_v4 }
  0x31   :  { %390 = vmatpush.bf16.msra.mxu0 %v6032_v3  ;;  %403 = vmatpush.bf16.msra.mxu1 %v3935_v7  ;;  %v6064_v3 = vor.u32 %v5526_v59, %v4474_v58  ;;  %v5522_v7 = vld [vmem:[#allocation4 + $0x3cc] sm:$0xf0]  ;;  %v4442_v18 = vld [vmem:[#allocation4 + $0x3a0] sm:$0xf]  ;;  %v6085_v20 = vor.u32 %v5422_v11, %v4058_v10 }
  0x32   :  { %v5454_v14 = vld [vmem:[#allocation4 + $0x1ac] sm:$0xf0]  ;;  %v6082_v15 = vor.u32 %v5522_v7, %v4458_v6  ;;  %v4042_v22 = vld [vmem:[#allocation4 + $0x80] sm:$0xf] }
  0x33   :  { %416 = vmatpush.bf16.msra.mxu2 %v6034_v8  ;;  %429 = vmatpush.bf16.msra.mxu3 %v3943_v12  ;;  %v6073_v8 = vor.u32 %v5426_v63, %v4074_v62  ;;  %v4186_v12 = vld [vmem:[#allocation4 + $0x1a0] sm:$0xf]  ;;  %v5518_v19 = vld [vmem:[#allocation4 + $0x3ac] sm:$0xf0] }
  0x34   :  { %v5418_v23 = vld [vmem:[#allocation4 + $0x8c] sm:$0xf0]  ;;  %v4170_v24 = vld [vmem:[#allocation4 + $0x180] sm:$0xf]  ;;  %v6094_v27 = vor.u32 %v5518_v19, %v4442_v18 }
  0x35   :  { %391 = vmatpush.bf16.msra.mxu0 %v3899_v16  ;;  %404 = vmatpush.bf16.msra.mxu1 %v3903_v17  ;;  %v4314_v16 = vld [vmem:[#allocation4 + $0x2a0] sm:$0xf]  ;;  %v5486_v17 = vld [vmem:[#allocation4 + $0x2ac] sm:$0xf0]  ;;  %v6097_v32 = vor.u32 %v5418_v23, %v4042_v22 }
  0x36   :  { %v4298_v28 = vld [vmem:[#allocation4 + $0x280] sm:$0xf]  ;;  %v5482_v29 = vld [vmem:[#allocation4 + $0x28c] sm:$0xf0] }
  0x37   :  { %417 = vmatpush.bf16.msra.mxu2 %v3907_v21  ;;  %430 = vmatpush.bf16.msra.mxu3 %v3911_v25  ;;  %v6088_v21 = vor.u32 %v5454_v14, %v4186_v12  ;;  %v6091_v25 = vor.u32 %v5486_v17, %v4314_v16  ;;  %v4026_v34 = vld [vmem:[#allocation4 + $0x60] sm:$0xf]  ;;  %v6103_v37 = vor.u32 %v5482_v29, %v4298_v28  ;;  %v5446_v38 = vld [vmem:[#allocation4 + $0x16c] sm:$0xf0] }
  0x38   :  { %3964 = vmatmul.msk.bf16.vlgmr.msrb.gmra.mxu0 %vm257_vm0, %v140_v26  ;;  %3965 = vmatmul.msk.bf16.vlgmr.msrb.gmra.mxu1 %vm257_vm0, %v140_v26  ;;  %v4154_v36 = vld [vmem:[#allocation4 + $0x160] sm:$0xf]  ;;  %v5478_v41 = vld [vmem:[#allocation4 + $0x26c] sm:$0xf0] }
  0x39   :  { %442 = vmatpush.bf16.msrb.mxu0 %v3947_v30  ;;  %455 = vmatpush.bf16.msrb.mxu1 %v3951_v31  ;;  %v4426_v30 = vld [vmem:[#allocation4 + $0x380] sm:$0xf]  ;;  %v5514_v31 = vld [vmem:[#allocation4 + $0x38c] sm:$0xf0]  ;;  %v6112_v45 = vor.u32 %v5446_v38, %v4154_v36 }
  0x3a   :  { %3966 = vmatmul.msk.bf16.vlgmr.msrb.gmra.mxu2 %vm257_vm0, %v140_v26  ;;  %3967 = vmatmul.msk.bf16.vlgmr.msrb.gmra.mxu3 %vm257_vm0, %v140_v26  ;;  %v5450_v26 = vld [vmem:[#allocation4 + $0x18c] sm:$0xf0]  ;;  %v4410_v42 = vld [vmem:[#allocation4 + $0x360] sm:$0xf] }
  0x3b   :  { %468 = vmatpush.bf16.msrb.mxu2 %v3955_v35  ;;  %481 = vmatpush.bf16.msrb.mxu3 %v3959_v39  ;;  %v6100_v33 = vor.u32 %v5450_v26, %v4170_v24  ;;  %v5414_v35 = vld [vmem:[#allocation4 + $0x6c] sm:$0xf0]  ;;  %v6106_v39 = vor.u32 %v5514_v31, %v4426_v30  ;;  %v4010_v46 = vld [vmem:[#allocation4 + $0x40] sm:$0xf] }
  0x3c   :  { %v5510_v43 = vld [vmem:[#allocation4 + $0x36c] sm:$0xf0]  ;;  %v4266_v52 = vld [vmem:[#allocation4 + $0x240] sm:$0xf] }
  0x3d   :  { %443 = vmatpush.bf16.msrb.mxu0 %v3915_v40  ;;  %456 = vmatpush.bf16.msrb.mxu1 %v3919_v44  ;;  %v4282_v40 = vld [vmem:[#allocation4 + $0x260] sm:$0xf]  ;;  %v6109_v44 = vor.u32 %v5414_v35, %v4026_v34  ;;  %v5410_v47 = vld [vmem:[#allocation4 + $0x4c] sm:$0xf0]  ;;  %v6118_v51 = vor.u32 %v5510_v43, %v4410_v42 }
  0x3e   :  { %v5442_v50 = vld [vmem:[#allocation4 + $0x14c] sm:$0xf0]  ;;  %v4394_v54 = vld [vmem:[#allocation4 + $0x340] sm:$0xf]  ;;  %v6127_v56 = vor.u32 %v5410_v47, %v4010_v46 }
  0x3f   :  { %469 = vmatpush.bf16.msrb.mxu2 %v3923_v48  ;;  %482 = vmatpush.bf16.msrb.mxu3 %v3927_v49  ;;  %v4138_v48 = vld [vmem:[#allocation4 + $0x140] sm:$0xf]  ;;  %v6115_v49 = vor.u32 %v5478_v41, %v4282_v40  ;;  %v5474_v53 = vld [vmem:[#allocation4 + $0x24c] sm:$0xf0] }
  0x40   :  { %v5506_v55 = vld [vmem:[#allocation4 + $0x34c] sm:$0xf0]  ;;  %v6132_v58 = vor.u32 %v5442_v50, %v4138_v48  ;;  %v3994_v59 = vld [vmem:[#allocation4 + $0x20] sm:$0xf]  ;;  %v6135_v0 = vor.u32 %v5474_v53, %v4266_v52 }
  0x41   :  { %v5406_v62 = vld [vmem:[#allocation4 + $0x2c] sm:$0xf0]  ;;  %v4122_v63 = vld [vmem:[#allocation4 + $0x120] sm:$0xf]  ;;  %v6138_v4 = vor.u32 %v5506_v55, %v4394_v54 }
  0x42   :  { %v5438_v2 = vld [vmem:[#allocation4 + $0x12c] sm:$0xf0]  ;;  %v4250_v5 = vld [vmem:[#allocation4 + $0x220] sm:$0xf]  ;;  %v6141_v10 = vor.u32 %v5406_v62, %v3994_v59 }
  0x43   :  { %7866 = vst [vmem:[#allocation16_spill] sm:$0xff] %v6138_v4  ;;  %v5470_v6 = vld [vmem:[#allocation4 + $0x22c] sm:$0xf0]  ;;  %v4378_v7 = vld [vmem:[#allocation4 + $0x320] sm:$0xf]  ;;  %v6144_v14 = vor.u32 %v5438_v2, %v4122_v63 }
  0x44   :  { %v3978_v11 = vld [vmem:[#allocation4] sm:$0xf]  ;;  %v5402_v12 = vld [vmem:[#allocation4 + $0xc] sm:$0xf0]  ;;  %v6147_v19 = vor.u32 %v5470_v6, %v4250_v5 }
  0x45   :  { %v4106_v16 = vld [vmem:[#allocation4 + $0x100] sm:$0xf]  ;;  %v5434_v17 = vld [vmem:[#allocation4 + $0x10c] sm:$0xf0]  ;;  %v6153_v31 = vor.u32 %v5402_v12, %v3978_v11 }
  0x46   :  { %v4602_v18 = vld [vmem:[#allocation4 + $0x4e0] sm:$0xf]  ;;  %7867 = vst [vmem:[#allocation17_spill] sm:$0xff] %v6147_v19  ;;  %v5558_v22 = vld [vmem:[#allocation4 + $0x4ec] sm:$0xf0]  ;;  %v6156_v38 = vor.u32 %v5434_v17, %v4106_v16 }
  0x47   :  { %v4730_v23 = vld [vmem:[#allocation4 + $0x5e0] sm:$0xf]  ;;  %v5590_v24 = vld [vmem:[#allocation4 + $0x5ec] sm:$0xf0]  ;;  %7869 = vst [vmem:[#allocation19_spill] sm:$0xff] %v6153_v31  ;;  %v6158_v40 = vor.u32 %v5558_v22, %v4602_v18 }
  0x48   :  { %3968 = vmatmul.msk.bf16.vlgmr.msra.gmra.mxu0 %vm257_vm0, %v6054_v57  ;;  %3969 = vmatmul.msk.bf16.vlgmr.msra.gmra.mxu1 %vm257_vm0, %v6054_v57  ;;  %v4234_v28 = vld [vmem:[#allocation4 + $0x200] sm:$0xf]  ;;  %v5466_v29 = vld [vmem:[#allocation4 + $0x20c] sm:$0xf0]  ;;  %7870 = vst [vmem:[#allocation20_spill] sm:$0xff] %v6156_v38  ;;  %v6161_v43 = vor.u32 %v5590_v24, %v4730_v23 }
  0x49   :  { %2050 = vmatpush.bf16.msra.mxu0 %v6056_v60  ;;  %2063 = vmatpush.bf16.msra.mxu1 %v6058_v61  ;;  %v4362_v30 = vld [vmem:[#allocation4 + $0x300] sm:$0xf]  ;;  %v5498_v34 = vld [vmem:[#allocation4 + $0x30c] sm:$0xf0]  ;;  %7871 = vst [vmem:[#allocation21_spill] sm:$0xff] %v6158_v40  ;;  %v6164_v48 = vor.u32 %v5466_v29, %v4234_v28 }
  0x4a   :  { %3970 = vmatmul.msk.bf16.vlgmr.msra.gmra.mxu2 %vm257_vm0, %v6054_v57  ;;  %3971 = vmatmul.msk.bf16.vlgmr.msra.gmra.mxu3 %vm257_vm0, %v6054_v57  ;;  %v4858_v35 = vld [vmem:[#allocation4 + $0x6e0] sm:$0xf]  ;;  %v5622_v36 = vld [vmem:[#allocation4 + $0x6ec] sm:$0xf0]  ;;  %7872 = vst [vmem:[#allocation22_spill] sm:$0xff] %v6161_v43  ;;  %v6166_v53 = vor.u32 %v5498_v34, %v4362_v30 }
  0x4b   :  { %2076 = vmatpush.bf16.msra.mxu2 %v6060_v1  ;;  %2089 = vmatpush.bf16.msra.mxu3 %v6064_v3  ;;  %v4986_v41 = vld [vmem:[#allocation4 + $0x7e0] sm:$0xf]  ;;  %v5654_v42 = vld [vmem:[#allocation4 + $0x7ec] sm:$0xf0]  ;;  %7873 = vst [vmem:[#allocation23_spill] sm:$0xff] %v6164_v48  ;;  %v6168_v54 = vor.u32 %v5622_v36, %v4858_v35 }
  0x4c   :  { %v4586_v46 = vld [vmem:[#allocation4 + $0x4c0] sm:$0xf]  ;;  %v5554_v47 = vld [vmem:[#allocation4 + $0x4cc] sm:$0xf0]  ;;  %7874 = vst [vmem:[#allocation24_spill] sm:$0xff] %v6166_v53  ;;  %v6171_v55 = vor.u32 %v5654_v42, %v4986_v41 }
  0x4d   :  { %2051 = vmatpush.bf16.msra.mxu0 %v6073_v8  ;;  %2064 = vmatpush.bf16.msra.mxu1 %v6076_v9  ;;  %v4714_v50 = vld [vmem:[#allocation4 + $0x5c0] sm:$0xf]  ;;  %v5586_v52 = vld [vmem:[#allocation4 + $0x5cc] sm:$0xf0]  ;;  %7875 = vst [vmem:[#allocation25_spill] sm:$0xff] %v6168_v54  ;;  %v6175_v63 = vor.u32 %v5554_v47, %v4586_v46 }
  0x4e   :  { %7876 = vst [vmem:[#allocation26_spill] sm:$0xff] %v6171_v55  ;;  %v4842_v59 = vld [vmem:[#allocation4 + $0x6c0] sm:$0xf]  ;;  %v5618_v62 = vld [vmem:[#allocation4 + $0x6cc] sm:$0xf0]  ;;  %v6178_v6 = vor.u32 %v5586_v52, %v4714_v50 }
  0x4f   :  { %2077 = vmatpush.bf16.msra.mxu2 %v6079_v13  ;;  %2090 = vmatpush.bf16.msra.mxu3 %v6082_v15  ;;  %7877 = vst [vmem:[#allocation27_spill] sm:$0xff] %v6175_v63  ;;  %v4970_v2 = vld [vmem:[#allocation4 + $0x7c0] sm:$0xf]  ;;  %v5650_v5 = vld [vmem:[#allocation4 + $0x7cc] sm:$0xf0]  ;;  %v6183_v16 = vor.u32 %v5618_v62, %v4842_v59 }
  0x50   :  { %7878 = vst [vmem:[#allocation28_spill] sm:$0xff] %v6178_v6  ;;  %v4698_v11 = vld [vmem:[#allocation4 + $0x5a0] sm:$0xf]  ;;  %v5582_v12 = vld [vmem:[#allocation4 + $0x5ac] sm:$0xf0]  ;;  %v6186_v17 = vor.u32 %v5650_v5, %v4970_v2 }
  0x51   :  { %2052 = vmatpush.bf16.msra.mxu0 %v6085_v20  ;;  %2065 = vmatpush.bf16.msra.mxu1 %v6088_v21  ;;  %7879 = vst [vmem:[#allocation29_spill] sm:$0xff] %v6183_v16  ;;  %v4826_v18 = vld [vmem:[#allocation4 + $0x6a0] sm:$0xf]  ;;  %v5614_v22 = vld [vmem:[#allocation4 + $0x6ac] sm:$0xf0]  ;;  %v6192_v29 = vor.u32 %v5582_v12, %v4698_v11 }
  0x52   :  { %7880 = vst [vmem:[#allocation30_spill] sm:$0xff] %v6186_v17  ;;  %v4954_v24 = vld [vmem:[#allocation4 + $0x7a0] sm:$0xf]  ;;  %v5646_v28 = vld [vmem:[#allocation4 + $0x7ac] sm:$0xf0]  ;;  %v6195_v41 = vor.u32 %v5614_v22, %v4826_v18 }
  0x53   :  { %2078 = vmatpush.bf16.msra.mxu2 %v6091_v25  ;;  %2091 = vmatpush.bf16.msra.mxu3 %v6094_v27  ;;  %7882 = vst [vmem:[#allocation32_spill] sm:$0xff] %v6192_v29  ;;  %v4554_v30 = vld [vmem:[#allocation4 + $0x480] sm:$0xf]  ;;  %v5546_v34 = vld [vmem:[#allocation4 + $0x48c] sm:$0xf0]  ;;  %v6198_v42 = vor.u32 %v5646_v28, %v4954_v24 }
  0x54   :  { %v4682_v35 = vld [vmem:[#allocation4 + $0x580] sm:$0xf]  ;;  %v5578_v36 = vld [vmem:[#allocation4 + $0x58c] sm:$0xf0]  ;;  %7883 = vst [vmem:[#allocation33_spill] sm:$0xff] %v6195_v41  ;;  %v6201_v50 = vor.u32 %v5546_v34, %v4554_v30 }
  0x55   :  { %2053 = vmatpush.bf16.msra.mxu0 %v6097_v32  ;;  %2066 = vmatpush.bf16.msra.mxu1 %v6100_v33  ;;  %7884 = vst [vmem:[#allocation34_spill] sm:$0xff] %v6198_v42  ;;  %v4810_v46 = vld [vmem:[#allocation4 + $0x680] sm:$0xf]  ;;  %v5610_v47 = vld [vmem:[#allocation4 + $0x68c] sm:$0xf0]  ;;  %v6204_v62 = vor.u32 %v5578_v36, %v4682_v35 }
  0x56   :  { %7885 = vst [vmem:[#allocation35_spill] sm:$0xff] %v6201_v50  ;;  %v4938_v52 = vld [vmem:[#allocation4 + $0x780] sm:$0xf]  ;;  %v5642_v59 = vld [vmem:[#allocation4 + $0x78c] sm:$0xf0]  ;;  %v6207_v11 = vor.u32 %v5610_v47, %v4810_v46 }
  0x57   :  { %2079 = vmatpush.bf16.msra.mxu2 %v6103_v37  ;;  %2092 = vmatpush.bf16.msra.mxu3 %v6106_v39  ;;  %7886 = vst [vmem:[#allocation36_spill] sm:$0xff] %v6204_v62  ;;  %v4538_v2 = vld [vmem:[#allocation4 + $0x460] sm:$0xf]  ;;  %v5542_v5 = vld [vmem:[#allocation4 + $0x46c] sm:$0xf0]  ;;  %v6210_v12 = vor.u32 %v5642_v59, %v4938_v52 }
  0x58   :  { %3972 = vmatmul.msk.bf16.vlgmr.msrb.gmra.mxu0 %vm257_vm0, %v6054_v57  ;;  %3973 = vmatmul.msk.bf16.vlgmr.msrb.gmra.mxu1 %vm257_vm0, %v6054_v57  ;;  %7887 = vst [vmem:[#allocation37_spill] sm:$0xff] %v6207_v11  ;;  %v6213_v18 = vor.u32 %v5542_v5, %v4538_v2  ;;  %v4522_v24 = vld [vmem:[#allocation4 + $0x440] sm:$0xf]  ;;  %v5538_v28 = vld [vmem:[#allocation4 + $0x44c] sm:$0xf0] }
  0x59   :  { %2054 = vmatpush.bf16.msra.mxu0 %v6109_v44  ;;  %2067 = vmatpush.bf16.msra.mxu1 %v6112_v45  ;;  %7888 = vst [vmem:[#allocation38_spill] sm:$0xff] %v6210_v12  ;;  %v4650_v30 = vld [vmem:[#allocation4 + $0x540] sm:$0xf]  ;;  %v5570_v34 = vld [vmem:[#allocation4 + $0x54c] sm:$0xf0]  ;;  %v6221_v35 = vor.u32 %v5538_v28, %v4522_v24 }
  0x5a   :  { %3974 = vmatmul.msk.bf16.vlgmr.msrb.gmra.mxu2 %vm257_vm0, %v6054_v57  ;;  %3975 = vmatmul.msk.bf16.vlgmr.msrb.gmra.mxu3 %vm257_vm0, %v6054_v57  ;;  %v5502_v57 = vld [vmem:[#allocation4 + $0x32c] sm:$0xf0]  ;;  %7889 = vst [vmem:[#allocation39_spill] sm:$0xff] %v6213_v18  ;;  %v6224_v36 = vor.u32 %v5570_v34, %v4650_v30  ;;  %v4794_v46 = vld [vmem:[#allocation4 + $0x660] sm:$0xf] }
  0x5b   :  { %2080 = vmatpush.bf16.msra.mxu2 %v6115_v49  ;;  %2093 = vmatpush.bf16.msra.mxu3 %v6118_v51  ;;  %v6150_v26 = vor.u32 %v5502_v57, %v4378_v7  ;;  %v4570_v7 = vld [vmem:[#allocation4 + $0x4a0] sm:$0xf]  ;;  %v5550_v57 = vld [vmem:[#allocation4 + $0x4ac] sm:$0xf0]  ;;  %7891 = vst [vmem:[#allocation41_spill] sm:$0xff] %v6221_v35 }
  0x5c   :  { %v6189_v23 = vor.u32 %v5550_v57, %v4570_v7  ;;  %v4666_v7 = vld [vmem:[#allocation4 + $0x560] sm:$0xf]  ;;  %v5574_v57 = vld [vmem:[#allocation4 + $0x56c] sm:$0xf0]  ;;  %7892 = vst [vmem:[#allocation42_spill] sm:$0xff] %v6224_v36 }
  0x5d   :  { %2055 = vmatpush.bf16.msra.mxu0 %v6127_v56  ;;  %2068 = vmatpush.bf16.msra.mxu1 %v6132_v58  ;;  %7868 = vst [vmem:[#allocation18_spill] sm:$0xff] %v6150_v26  ;;  %v6216_v22 = vor.u32 %v5574_v57, %v4666_v7  ;;  %v5606_v47 = vld [vmem:[#allocation4 + $0x66c] sm:$0xf0]  ;;  %v4922_v52 = vld [vmem:[#allocation4 + $0x760] sm:$0xf] }
  0x5e   :  { %7881 = vst [vmem:[#allocation31_spill] sm:$0xff] %v6189_v23  ;;  %v6228_v59 = vor.u32 %v5606_v47, %v4794_v46  ;;  %v5638_v2 = vld [vmem:[#allocation4 + $0x76c] sm:$0xf0]  ;;  %v4506_v7 = vld [vmem:[#allocation4 + $0x420] sm:$0xf] }
  0x5f   :  { %2081 = vmatpush.bf16.msra.mxu2 %v6135_v0  ;;  %2094 = vmatpush.bf16.msra.mxu3 %v6138_v4  ;;  %7890 = vst [vmem:[#allocation40_spill] sm:$0xff] %v6216_v22  ;;  %v6230_v5 = vor.u32 %v5638_v2, %v4922_v52  ;;  %v5534_v57 = vld [vmem:[#allocation4 + $0x42c] sm:$0xf0]  ;;  %v4634_v28 = vld [vmem:[#allocation4 + $0x520] sm:$0xf] }
  0x60   :  { %7893 = vst [vmem:[#allocation43_spill] sm:$0xff] %v6228_v59  ;;  %v6233_v24 = vor.u32 %v5534_v57, %v4506_v7  ;;  %v5566_v30 = vld [vmem:[#allocation4 + $0x52c] sm:$0xf0]  ;;  %v4490_v2 = vld [vmem:[#allocation4 + $0x400] sm:$0xf] }
  0x61   :  { %2056 = vmatpush.bf16.msra.mxu0 %v6141_v10  ;;  %2069 = vmatpush.bf16.msra.mxu1 %v6144_v14  ;;  %7894 = vst [vmem:[#allocation44_spill] sm:$0xff] %v6230_v5  ;;  %v6236_v34 = vor.u32 %v5566_v30, %v4634_v28  ;;  %v5634_v47 = vld [vmem:[#allocation4 + $0x74c] sm:$0xf0]  ;;  %v4618_v57 = vld [vmem:[#allocation4 + $0x500] sm:$0xf] }
  0x62   :  { %7895 = vst [vmem:[#allocation45_spill] sm:$0xff] %v6233_v24  ;;  %v5530_v7 = vld [vmem:[#allocation4 + $0x40c] sm:$0xf0] }
  0x63   :  { %2082 = vmatpush.bf16.msra.mxu2 %v6147_v19  ;;  %2095 = vmatpush.bf16.msra.mxu3 %v6150_v26  ;;  %7896 = vst [vmem:[#allocation46_spill] sm:$0xff] %v6236_v34  ;;  %v5562_v28 = vld [vmem:[#allocation4 + $0x50c] sm:$0xf0] }
  0x64   :  { %v6248_v30 = vor.u32 %v5562_v28, %v4618_v57  ;;  %v4874_v28 = vld [vmem:[#allocation4 + $0x700] sm:$0xf] }
  0x65   :  { %2057 = vmatpush.bf16.msra.mxu0 %v6153_v31  ;;  %2070 = vmatpush.bf16.msra.mxu1 %v6156_v38 }
  0x66   :  { %7900 = vst [vmem:[#allocation50_spill] sm:$0xff] %v6248_v30 }
  0x67   :  { %2083 = vmatpush.bf16.msra.mxu2 %v6164_v48  ;;  %2096 = vmatpush.bf16.msra.mxu3 %v6166_v53 }
  0x69   :  { %2102 = vmatpush.bf16.msrb.mxu0 %v6158_v40  ;;  %2115 = vmatpush.bf16.msrb.mxu1 %v6161_v43 }
  0x6b   :  { %2128 = vmatpush.bf16.msrb.mxu2 %v6168_v54  ;;  %2141 = vmatpush.bf16.msrb.mxu3 %v6171_v55 }
  0x6d   :  { %2103 = vmatpush.bf16.msrb.mxu0 %v6175_v63  ;;  %2116 = vmatpush.bf16.msrb.mxu1 %v6178_v6  ;;  %v5436_v6 = vld [vmem:[#allocation4 + $0x124] sm:$0xf]  ;;  %v4124_v63 = vld [vmem:[#allocation4 + $0x130] sm:$0xf0] }
  0x6f   :  { %2129 = vmatpush.bf16.msrb.mxu2 %v6183_v16  ;;  %2142 = vmatpush.bf16.msrb.mxu3 %v6186_v17  ;;  %v4060_v17 = vld [vmem:[#allocation4 + $0xb0] sm:$0xf0] }
  0x71   :  { %2104 = vmatpush.bf16.msrb.mxu0 %v6189_v23  ;;  %2117 = vmatpush.bf16.msrb.mxu1 %v6192_v29  ;;  %v5452_v29 = vld [vmem:[#allocation4 + $0x1a4] sm:$0xf] }
  0x73   :  { %2130 = vmatpush.bf16.msrb.mxu2 %v6195_v41  ;;  %2143 = vmatpush.bf16.msrb.mxu3 %v6198_v42  ;;  %v5456_v41 = vld [vmem:[#allocation4 + $0x1c4] sm:$0xf] }
  0x75   :  { %2105 = vmatpush.bf16.msrb.mxu0 %v6201_v50  ;;  %2118 = vmatpush.bf16.msrb.mxu1 %v6204_v62 }
  0x77   :  { %2131 = vmatpush.bf16.msrb.mxu2 %v6207_v11  ;;  %2144 = vmatpush.bf16.msrb.mxu3 %v6210_v12  ;;  %v4906_v12 = vld [vmem:[#allocation4 + $0x740] sm:$0xf] }
  0x78   :  { %v6242_v52 = vor.u32 %v5634_v47, %v4906_v12  ;;  %v4890_v47 = vld [vmem:[#allocation4 + $0x720] sm:$0xf] }
  0x79   :  { %2106 = vmatpush.bf16.msrb.mxu0 %v6213_v18  ;;  %2119 = vmatpush.bf16.msrb.mxu1 %v6216_v22 }
  0x7a   :  { %7898 = vst [vmem:[#allocation48_spill] sm:$0xff] %v6242_v52 }
  0x7b   :  { %2132 = vmatpush.bf16.msrb.mxu2 %v6228_v59  ;;  %2145 = vmatpush.bf16.msrb.mxu3 %v6230_v5  ;;  %v6245_v5 = vor.u32 %v5530_v7, %v4490_v2  ;;  %v4746_v2 = vld [vmem:[#allocation4 + $0x600] sm:$0xf]  ;;  %v5594_v7 = vld [vmem:[#allocation4 + $0x60c] sm:$0xf0] }
  0x7c   :  { %v6258_v57 = vor.u32 %v5594_v7, %v4746_v2 }
  0x7d   :  { %2107 = vmatpush.bf16.msrb.mxu0 %v6221_v35  ;;  %2120 = vmatpush.bf16.msrb.mxu1 %v6224_v36  ;;  %v4778_v36 = vld [vmem:[#allocation4 + $0x640] sm:$0xf]  ;;  %v5602_v35 = vld [vmem:[#allocation4 + $0x64c] sm:$0xf0]  ;;  %7899 = vst [vmem:[#allocation49_spill] sm:$0xff] %v6245_v5 }
  0x7e   :  { %v6239_v46 = vor.u32 %v5602_v35, %v4778_v36  ;;  %v4762_v35 = vld [vmem:[#allocation4 + $0x620] sm:$0xf]  ;;  %v5598_v36 = vld [vmem:[#allocation4 + $0x62c] sm:$0xf0]  ;;  %7903 = vst [vmem:[#allocation53_spill] sm:$0xff] %v6258_v57 }
  0x7f   :  { %2146 = vmatpush.bf16.msrb.mxu3 %v6242_v52  ;;  %v6252_v12 = vor.u32 %v5598_v36, %v4762_v35 }
  0x80   :  { %7897 = vst [vmem:[#allocation47_spill] sm:$0xff] %v6239_v46  ;;  %2133 = vmatpush.bf16.msrb.mxu2 %v6239_v46 }
  0x81   :  { %2108 = vmatpush.bf16.msrb.mxu0 %v6233_v24  ;;  %2121 = vmatpush.bf16.msrb.mxu1 %v6236_v34  ;;  %7901 = vst [vmem:[#allocation51_spill] sm:$0xff] %v6252_v12  ;;  %v5630_v34 = vld [vmem:[#allocation4 + $0x72c] sm:$0xf0] }
  0x82   :  { %v6254_v24 = vor.u32 %v5630_v34, %v4890_v47  ;;  %v6267_v34 = vld [vmem:[%s7615_s2] sm:$0xff] }
  0x83   :  { %v7645_v35 = vperm.slane %v6267_v34, 0  ;;  %v7648_v36 = vperm.slane %v6267_v34, 1  ;;  %v7651_v46 = vperm.slane %v6267_v34, 2  ;;  %v7657_v22 = vperm.slane %v6267_v34, 3 }
  0x84   :  { %7902 = vst [vmem:[#allocation52_spill] sm:$0xff] %v6254_v24  ;;  %2134 = vmatpush.bf16.msrb.mxu2 %v6252_v12  ;;  %2147 = vmatpush.bf16.msrb.mxu3 %v6254_v24  ;;  %v4220_v24 = vld [vmem:[#allocation4 + $0x1f0] sm:$0xf0]  ;;  %v7961_v19 = vperm.slane %v6267_v34, 3 }
  0x85   :  { %2109 = vmatpush.bf16.msrb.mxu0 %v6245_v5  ;;  %2122 = vmatpush.bf16.msrb.mxu1 %v6248_v30  ;;  %v5626_v5 = vld [vmem:[#allocation4 + $0x70c] sm:$0xf0] }
  0x86   :  { %v6260_v52 = vor.u32 %v5626_v5, %v4874_v28  ;;  %v5428_v5 = vld [vmem:[#allocation4 + $0xe4] sm:$0xf]  ;;  %v4092_v28 = vld [vmem:[#allocation4 + $0xf0] sm:$0xf0] }
  0x87   :  { %v6276_v59 = vor.u32 %v5428_v5, %v4092_v28  ;;  %v4348_v5 = vld [vmem:[#allocation4 + $0x2f0] sm:$0xf0] }
  0x88   :  { %7904 = vst [vmem:[#allocation54_spill] sm:$0xff] %v6260_v52  ;;  %2135 = vmatpush.bf16.msrb.mxu2 %v6258_v57  ;;  %2148 = vmatpush.bf16.msrb.mxu3 %v6260_v52  ;;  %v5460_v52 = vld [vmem:[#allocation4 + $0x1e4] sm:$0xf] }
  0x89   :  { %7905 = vst [vmem:[#allocation55_spill] sm:$0xff] %v6276_v59  ;;  %v6281_v18 = vor.u32 %v5460_v52, %v4220_v24  ;;  %v5492_v52 = vld [vmem:[#allocation4 + $0x2e4] sm:$0xf] }
  0x8b   :  { %7906 = vst [vmem:[#allocation56_spill] sm:$0xff] %v6281_v18 }
  0xa5   :  { %v270_v47 = vpop.f32.mrf.mxu0  ;;  %v283_v7 = vpop.f32.mrf.mxu1 }
  0xa6   :  { %v271_v2 = vadd.f32 %v270_v47, %v7645_v35  ;;  %v284_v57 = vadd.f32 %v283_v7, %v7648_v36  ;;  %v5424_v47 = vld [vmem:[#allocation4 + $0xc4] sm:$0xf]  ;;  %v4076_v35 = vld [vmem:[#allocation4 + $0xd0] sm:$0xf0] }
  0xa7   :  { %v4204_v7 = vld [vmem:[#allocation4 + $0x1d0] sm:$0xf0]  ;;  %v6290_v24 = vor.u32 %v5424_v47, %v4076_v35  ;;  %v6297_v35 = vor.u32 %v5492_v52, %v4348_v5  ;;  %v5416_v5 = vld [vmem:[#allocation4 + $0x84] sm:$0xf] }
  0xa8   :  { %v365_v12 = vmax.f32 %v271_v2, 0.0  ;;  %v366_v30 = vmax.f32 %v284_v57, 0.0  ;;  %v6295_v50 = vor.u32 %v5456_v41, %v4204_v7  ;;  %v5488_v41 = vld [vmem:[#allocation4 + $0x2c4] sm:$0xf]  ;;  %v4332_v7 = vld [vmem:[#allocation4 + $0x2d0] sm:$0xf0] }
  0xa9   :  { %7907 = vst [vmem:[#allocation57_spill] sm:$0xff] %v6290_v24  ;;  %v4460_v52 = vld [vmem:[#allocation4 + $0x3d0] sm:$0xf0] }
  0xaa   :  { %v6278_v11 = vpack.c.bf16 %v365_v12, %v365_v12  ;;  %v6283_v42 = vpack.c.bf16 %v366_v30, %v366_v30  ;;  %v5524_v30 = vld [vmem:[#allocation4 + $0x3e4] sm:$0xf]  ;;  %7908 = vst [vmem:[#allocation58_spill] sm:$0xff] %v6295_v50 }
  0xab   :  { %7909 = vst [vmem:[#allocation59_spill] sm:$0xff] %v6297_v35 }
  0xac   :  { %2058 = vmatmul.bf16.vlgmr.msra.gmra.mxu0 %v6278_v11  ;;  %2071 = vmatmul.bf16.vlgmr.msra.gmra.mxu1 %v6283_v42 }
  0xad   :  { %v296_v36 = vpop.f32.mrf.mxu2  ;;  %v309_v2 = vpop.f32.mrf.mxu3  ;;  %2154 = vmatpush.bf16.msra.mxu0 %v6276_v59  ;;  %2167 = vmatpush.bf16.msra.mxu1 %v6281_v18  ;;  %v4188_v59 = vld [vmem:[#allocation4 + $0x1b0] sm:$0xf0] }
  0xae   :  { %v297_v57 = vadd.f32 %v296_v36, %v7651_v46  ;;  %v272_v12 = vpop.f32.mrf.mxu0  ;;  %v310_v28 = vadd.f32 %v309_v2, %v7657_v22  ;;  %v285_v62 = vpop.f32.mrf.mxu1  ;;  %v4476_v36 = vld [vmem:[#allocation4 + $0x3f0] sm:$0xf0]  ;;  %v5420_v46 = vld [vmem:[#allocation4 + $0xa4] sm:$0xf] }
  0xaf   :  { %v6303_v2 = vor.u32 %v5524_v30, %v4476_v36  ;;  %v6305_v62 = vor.u32 %v5420_v46, %v4060_v17  ;;  %v5520_v22 = vld [vmem:[#allocation4 + $0x3c4] sm:$0xf]  ;;  %v4172_v36 = vld [vmem:[#allocation4 + $0x190] sm:$0xf0]  ;;  %v6316_v46 = vor.u32 %v5488_v41, %v4332_v7 }
  0xb0   :  { %v367_v16 = vmax.f32 %v297_v57, 0.0  ;;  %v368_v12 = vmax.f32 %v310_v28, 0.0  ;;  %v6310_v57 = vor.u32 %v5452_v29, %v4188_v59  ;;  %v4044_v28 = vld [vmem:[#allocation4 + $0x90] sm:$0xf0]  ;;  %v5448_v30 = vld [vmem:[#allocation4 + $0x184] sm:$0xf] }
  0xb1   :  { %2155 = vmatpush.bf16.msra.mxu0 %v6290_v24  ;;  %7910 = vst [vmem:[#allocation60_spill] sm:$0xff] %v6303_v2  ;;  %2168 = vmatpush.bf16.msra.mxu1 %v6295_v50  ;;  %v6322_v47 = vor.u32 %v5416_v5, %v4044_v28  ;;  %v4316_v50 = vld [vmem:[#allocation4 + $0x2b0] sm:$0xf0]  ;;  %v7916_v24 = vperm.slane %v6267_v34, 4  ;;  %v6327_v41 = vor.u32 %v5448_v30, %v4172_v36  ;;  %v5516_v7 = vld [vmem:[#allocation4 + $0x3a4] sm:$0xf] }
  0xb2   :  { %v6300_v23 = vpack.c.bf16 %v367_v16, %v367_v16  ;;  %7911 = vst [vmem:[#allocation61_spill] sm:$0xff] %v6305_v62  ;;  %v6307_v18 = vpack.c.bf16 %v368_v12, %v368_v12  ;;  %v6320_v12 = vor.u32 %v5520_v22, %v4460_v52  ;;  %v5484_v16 = vld [vmem:[#allocation4 + $0x2a4] sm:$0xf]  ;;  %v4028_v22 = vld [vmem:[#allocation4 + $0x70] sm:$0xf0] }
  0xb3   :  { %7912 = vst [vmem:[#allocation62_spill] sm:$0xff] %v6310_v57  ;;  %v5444_v52 = vld [vmem:[#allocation4 + $0x164] sm:$0xf]  ;;  %v4156_v5 = vld [vmem:[#allocation4 + $0x170] sm:$0xf0]  ;;  %v6332_v54 = vor.u32 %v5484_v16, %v4316_v50 }
  0xb4   :  { %2084 = vmatmul.bf16.vlgmr.msra.gmra.mxu2 %v6300_v23  ;;  %2097 = vmatmul.bf16.vlgmr.msra.gmra.mxu3 %v6307_v18  ;;  %7913 = vst [vmem:[#allocation63_spill] sm:$0xff] %v6316_v46  ;;  %v6345_v50 = vor.u32 %v5444_v52, %v4156_v5  ;;  %v5512_v16 = vld [vmem:[#allocation4 + $0x384] sm:$0xf] }
  0xb5   :  { %2180 = vmatpush.bf16.msra.mxu2 %v6297_v35  ;;  %v298_v17 = vpop.f32.mrf.mxu2  ;;  %2193 = vmatpush.bf16.msra.mxu3 %v6303_v2  ;;  %v311_v29 = vpop.f32.mrf.mxu3  ;;  %7914 = vst [vmem:[#allocation64_spill] sm:$0xff] %v6320_v12  ;;  %v4444_v2 = vld [vmem:[#allocation4 + $0x3b0] sm:$0xf0] }
  0xb6   :  { %2156 = vmatpush.bf16.msra.mxu0 %v6305_v62  ;;  %v322_v59 = vpop.f32.mrf.mxu0  ;;  %7915 = vst [vmem:[#allocation65_spill] sm:$0xff] %v6322_v47  ;;  %2169 = vmatpush.bf16.msra.mxu1 %v6310_v57  ;;  %v335_v17 = vpop.f32.mrf.mxu1  ;;  %v5412_v29 = vld [vmem:[#allocation4 + $0x64] sm:$0xf]  ;;  %v7918_v62 = vperm.slane %v6267_v34, 5  ;;  %v6337_v30 = vor.u32 %v5516_v7, %v4444_v2  ;;  %v4140_v7 = vld [vmem:[#allocation4 + $0x150] sm:$0xf0] }
  0xb7   :  { %v323_v35 = vadd.f32 %v322_v59, %v7916_v24  ;;  %7917 = vst [vmem:[#allocation66_spill] sm:$0xff] %v6327_v41  ;;  %v4300_v59 = vld [vmem:[#allocation4 + $0x290] sm:$0xf0]  ;;  %v5408_v57 = vld [vmem:[#allocation4 + $0x44] sm:$0xf] }
  0xb8   :  { %v336_v55 = vadd.f32 %v335_v17, %v7918_v62  ;;  %7919 = vst [vmem:[#allocation67_spill] sm:$0xff] %v6332_v54  ;;  %v5480_v62 = vld [vmem:[#allocation4 + $0x284] sm:$0xf] }
  0xb9   :  { %v369_v28 = vmax.f32 %v323_v35, 0.0  ;;  %2181 = vmatpush.bf16.msra.mxu2 %v6316_v46  ;;  %2194 = vmatpush.bf16.msra.mxu3 %v6320_v12  ;;  %7920 = vst [vmem:[#allocation68_spill] sm:$0xff] %v6337_v30  ;;  %v6343_v35 = vor.u32 %v5412_v29, %v4028_v22  ;;  %v5440_v2 = vld [vmem:[#allocation4 + $0x144] sm:$0xf]  ;;  %v7924_v29 = vperm.slane %v6267_v34, 6 }
  0xba   :  { %v370_v24 = vmax.f32 %v336_v55, 0.0  ;;  %2157 = vmatpush.bf16.msra.mxu0 %v6322_v47  ;;  %2170 = vmatpush.bf16.msra.mxu1 %v6327_v41  ;;  %7922 = vst [vmem:[#allocation70_spill] sm:$0xff] %v6345_v50  ;;  %v4428_v55 = vld [vmem:[#allocation4 + $0x390] sm:$0xf0]  ;;  %v5508_v46 = vld [vmem:[#allocation4 + $0x364] sm:$0xf] }
  0xbb   :  { %v6340_v17 = vpack.c.bf16 %v369_v28, %v369_v28  ;;  %7921 = vst [vmem:[#allocation69_spill] sm:$0xff] %v6343_v35  ;;  %v4012_v47 = vld [vmem:[#allocation4 + $0x50] sm:$0xf0]  ;;  %v6351_v28 = vor.u32 %v5480_v62, %v4300_v59  ;;  %v6357_v5 = vor.u32 %v5512_v16, %v4428_v55  ;;  %v6365_v59 = vor.u32 %v5440_v2, %v4140_v7  ;;  %v5504_v7 = vld [vmem:[#allocation4 + $0x344] sm:$0xf] }
  0xbc   :  { %v6347_v12 = vpack.c.bf16 %v370_v24, %v370_v24  ;;  %v5476_v24 = vld [vmem:[#allocation4 + $0x264] sm:$0xf]  ;;  %v4284_v41 = vld [vmem:[#allocation4 + $0x270] sm:$0xf0]  ;;  %v6363_v62 = vor.u32 %v5408_v57, %v4012_v47 }
  0xbd   :  { %2182 = vmatpush.bf16.msra.mxu2 %v6332_v54  ;;  %v348_v36 = vpop.f32.mrf.mxu2  ;;  %2110 = vmatmul.bf16.vlgmr.msrb.gmra.mxu0 %v6340_v17  ;;  %7923 = vst [vmem:[#allocation71_spill] sm:$0xff] %v6351_v28  ;;  %v361_v52 = vpop.f32.mrf.mxu3  ;;  %v7926_v54 = vperm.slane %v6267_v34, 7  ;;  %v5472_v57 = vld [vmem:[#allocation4 + $0x244] sm:$0xf]  ;;  %v4268_v2 = vld [vmem:[#allocation4 + $0x250] sm:$0xf0] }
  0xbe   :  { %2195 = vmatpush.bf16.msra.mxu3 %v6337_v30  ;;  %v349_v22 = vadd.f32 %v348_v36, %v7924_v29  ;;  %2123 = vmatmul.bf16.vlgmr.msrb.gmra.mxu1 %v6347_v12  ;;  %7925 = vst [vmem:[#allocation72_spill] sm:$0xff] %v6357_v5  ;;  %v324_v53 = vpop.f32.mrf.mxu0  ;;  %v4412_v36 = vld [vmem:[#allocation4 + $0x370] sm:$0xf0]  ;;  %v5404_v29 = vld [vmem:[#allocation4 + $0x24] sm:$0xf]  ;;  %v337_v16 = vpop.f32.mrf.mxu1 }
  0xbf   :  { %v362_v48 = vadd.f32 %v361_v52, %v7926_v54  ;;  %2158 = vmatpush.bf16.msra.mxu0 %v6343_v35  ;;  %2171 = vmatpush.bf16.msra.mxu1 %v6345_v50  ;;  %7927 = vst [vmem:[#allocation73_spill] sm:$0xff] %v6363_v62  ;;  %v3996_v30 = vld [vmem:[#allocation4 + $0x30] sm:$0xf0]  ;;  %v6368_v53 = vor.u32 %v5476_v24, %v4284_v41  ;;  %v5400_v24 = vld [vmem:[#allocation4 + $0x4] sm:$0xf] }
  0xc0   :  { %7928 = vst [vmem:[#allocation74_spill] sm:$0xff] %v6365_v59  ;;  %v371_v55 = vmax.f32 %v349_v22, 0.0  ;;  %v6373_v47 = vor.u32 %v5508_v46, %v4412_v36  ;;  %v6381_v22 = vor.u32 %v5436_v6, %v4124_v63  ;;  %v4396_v41 = vld [vmem:[#allocation4 + $0x350] sm:$0xf0]  ;;  %v5432_v46 = vld [vmem:[#allocation4 + $0x104] sm:$0xf] }
  0xc1   :  { %v372_v26 = vmax.f32 %v362_v48, 0.0  ;;  %2183 = vmatpush.bf16.msra.mxu2 %v6351_v28  ;;  %7929 = vst [vmem:[#allocation75_spill] sm:$0xff] %v6368_v53  ;;  %v6379_v48 = vor.u32 %v5404_v29, %v3996_v30  ;;  %v3980_v16 = vld [vmem:[#allocation4 + $0x10] sm:$0xf0]  ;;  %v5588_v30 = vld [vmem:[#allocation4 + $0x5e4] sm:$0xf]  ;;  %v6389_v63 = vor.u32 %v5504_v7, %v4396_v41 }
  0xc2   :  { %v6370_v54 = vpack.c.bf16 %v371_v55, %v371_v55  ;;  %2196 = vmatpush.bf16.msra.mxu3 %v6357_v5  ;;  %7930 = vst [vmem:[#allocation76_spill] sm:$0xff] %v6373_v47  ;;  %v4108_v36 = vld [vmem:[#allocation4 + $0x110] sm:$0xf0]  ;;  %v5556_v55 = vld [vmem:[#allocation4 + $0x4e4] sm:$0xf]  ;;  %v6393_v50 = vor.u32 %v5400_v24, %v3980_v16 }
  0xc3   :  { %v6375_v52 = vpack.c.bf16 %v372_v26, %v372_v26  ;;  %2159 = vmatpush.bf16.msra.mxu0 %v6363_v62  ;;  %2172 = vmatpush.bf16.msra.mxu1 %v6365_v59  ;;  %7931 = vst [vmem:[#allocation77_spill] sm:$0xff] %v6379_v48  ;;  %v6386_v26 = vor.u32 %v5472_v57, %v4268_v2  ;;  %v4604_v59 = vld [vmem:[#allocation4 + $0x4f0] sm:$0xf0]  ;;  %v5468_v5 = vld [vmem:[#allocation4 + $0x224] sm:$0xf] }
  0xc4   :  { %7932 = vst [vmem:[#allocation78_spill] sm:$0xff] %v6381_v22  ;;  %2136 = vmatmul.bf16.vlgmr.msrb.gmra.mxu2 %v6370_v54  ;;  %v4732_v29 = vld [vmem:[#allocation4 + $0x5f0] sm:$0xf0]  ;;  %v5500_v57 = vld [vmem:[#allocation4 + $0x324] sm:$0xf]  ;;  %v6397_v2 = vor.u32 %v5556_v55, %v4604_v59 }
  0xc5   :  { %2149 = vmatmul.bf16.vlgmr.msrb.gmra.mxu3 %v6375_v52  ;;  %2184 = vmatpush.bf16.msra.mxu2 %v6368_v53  ;;  %7933 = vst [vmem:[#allocation79_spill] sm:$0xff] %v6386_v26  ;;  %v350_v62 = vpop.f32.mrf.mxu2  ;;  %v363_v6 = vpop.f32.mrf.mxu3  ;;  %v4252_v28 = vld [vmem:[#allocation4 + $0x230] sm:$0xf0]  ;;  %v6395_v53 = vor.u32 %v5432_v46, %v4108_v36  ;;  %v6399_v35 = vor.u32 %v5588_v30, %v4732_v29  ;;  %v5464_v16 = vld [vmem:[#allocation4 + $0x204] sm:$0xf] }
  0xc6   :  { %2197 = vmatpush.bf16.msra.mxu3 %v6373_v47  ;;  %7934 = vst [vmem:[#allocation80_spill] sm:$0xff] %v6389_v63  ;;  %v4380_v62 = vld [vmem:[#allocation4 + $0x330] sm:$0xf0]  ;;  %v5552_v47 = vld [vmem:[#allocation4 + $0x4c4] sm:$0xf]  ;;  %v6402_v7 = vor.u32 %v5468_v5, %v4252_v28 }
  0xc7   :  { %2160 = vmatpush.bf16.msra.mxu0 %v6379_v48  ;;  %2173 = vmatpush.bf16.msra.mxu1 %v6381_v22  ;;  %7935 = vst [vmem:[#allocation81_spill] sm:$0xff] %v6393_v50  ;;  %v4588_v41 = vld [vmem:[#allocation4 + $0x4d0] sm:$0xf0]  ;;  %v5584_v6 = vld [vmem:[#allocation4 + $0x5c4] sm:$0xf]  ;;  %v6405_v24 = vor.u32 %v5500_v57, %v4380_v62 }
  0xc8   :  { %7936 = vst [vmem:[#allocation82_spill] sm:$0xff] %v6395_v53  ;;  %v4716_v48 = vld [vmem:[#allocation4 + $0x5d0] sm:$0xf0]  ;;  %v5496_v36 = vld [vmem:[#allocation4 + $0x304] sm:$0xf]  ;;  %v6411_v28 = vor.u32 %v5552_v47, %v4588_v41 }
  0xc9   :  { %7937 = vst [vmem:[#allocation83_spill] sm:$0xff] %v6397_v2  ;;  %2185 = vmatpush.bf16.msra.mxu2 %v6386_v26  ;;  %v4236_v46 = vld [vmem:[#allocation4 + $0x210] sm:$0xf0]  ;;  %v5620_v55 = vld [vmem:[#allocation4 + $0x6e4] sm:$0xf]  ;;  %v6413_v5 = vor.u32 %v5584_v6, %v4716_v48 }
  0xca   :  { %7938 = vst [vmem:[#allocation84_spill] sm:$0xff] %v6399_v35  ;;  %2198 = vmatpush.bf16.msra.mxu3 %v6389_v63  ;;  %v4364_v59 = vld [vmem:[#allocation4 + $0x310] sm:$0xf0]  ;;  %v5652_v29 = vld [vmem:[#allocation4 + $0x7e4] sm:$0xf]  ;;  %v6416_v63 = vor.u32 %v5464_v16, %v4236_v46 }
  0xcb   :  { %7939 = vst [vmem:[#allocation85_spill] sm:$0xff] %v6402_v7  ;;  %2161 = vmatpush.bf16.msra.mxu0 %v6393_v50  ;;  %2174 = vmatpush.bf16.msra.mxu1 %v6395_v53  ;;  %v4860_v30 = vld [vmem:[#allocation4 + $0x6f0] sm:$0xf0]  ;;  %v5548_v62 = vld [vmem:[#allocation4 + $0x4a4] sm:$0xf] }
  0xcc   :  { %7940 = vst [vmem:[#allocation86_spill] sm:$0xff] %v6405_v24  ;;  %v4988_v57 = vld [vmem:[#allocation4 + $0x7f0] sm:$0xf0]  ;;  %v5580_v53 = vld [vmem:[#allocation4 + $0x5a4] sm:$0xf]  ;;  %v6422_v47 = vor.u32 %v5620_v55, %v4860_v30 }
  0xcd   :  { %7941 = vst [vmem:[#allocation87_spill] sm:$0xff] %v6411_v28  ;;  %2186 = vmatpush.bf16.msra.mxu2 %v6402_v7  ;;  %v4572_v50 = vld [vmem:[#allocation4 + $0x4b0] sm:$0xf0]  ;;  %v6425_v48 = vor.u32 %v5652_v29, %v4988_v57  ;;  %v5616_v41 = vld [vmem:[#allocation4 + $0x6c4] sm:$0xf]  ;;  %v393_v57 = vpop.f32.mrf.mxu0 }
  0xce   :  { %7942 = vst [vmem:[#allocation88_spill] sm:$0xff] %v6413_v5  ;;  %v4700_v26 = vld [vmem:[#allocation4 + $0x5b0] sm:$0xf0]  ;;  %2199 = vmatpush.bf16.msra.mxu3 %v6405_v24  ;;  %2162 = vmatmul.bf16.vlgmr.msra.gmra.mxu0 %v6278_v11  ;;  %v6429_v16 = vor.u32 %v5548_v62, %v4572_v50  ;;  %v5648_v24 = vld [vmem:[#allocation4 + $0x7c4] sm:$0xf]  ;;  %v7951_v62 = vperm.slane %v6267_v34, 0 }
  0xcf   :  { %2206 = vmatpush.bf16.msrb.mxu0 %v6397_v2  ;;  %2219 = vmatpush.bf16.msrb.mxu1 %v6399_v35  ;;  %7943 = vst [vmem:[#allocation89_spill] sm:$0xff] %v6416_v63  ;;  %v6420_v2 = vor.u32 %v5496_v36, %v4364_v59  ;;  %v4844_v6 = vld [vmem:[#allocation4 + $0x6d0] sm:$0xf0]  ;;  %v6431_v46 = vor.u32 %v5580_v53, %v4700_v26  ;;  %v5544_v36 = vld [vmem:[#allocation4 + $0x484] sm:$0xf] }
  0xd0   :  { %7945 = vst [vmem:[#allocation91_spill] sm:$0xff] %v6422_v47  ;;  %2175 = vmatmul.bf16.vlgmr.msra.gmra.mxu1 %v6283_v42  ;;  %v4972_v7 = vld [vmem:[#allocation4 + $0x7d0] sm:$0xf0]  ;;  %v5576_v55 = vld [vmem:[#allocation4 + $0x584] sm:$0xf]  ;;  %v6436_v29 = vor.u32 %v5616_v41, %v4844_v6 }
  0xd1   :  { %7944 = vst [vmem:[#allocation90_spill] sm:$0xff] %v6420_v2  ;;  %2187 = vmatpush.bf16.msra.mxu2 %v6416_v63  ;;  %v4556_v59 = vld [vmem:[#allocation4 + $0x490] sm:$0xf0]  ;;  %v6439_v50 = vor.u32 %v5648_v24, %v4972_v7  ;;  %v5612_v53 = vld [vmem:[#allocation4 + $0x6a4] sm:$0xf] }
  0xd2   :  { %7946 = vst [vmem:[#allocation92_spill] sm:$0xff] %v6425_v48  ;;  %v4684_v30 = vld [vmem:[#allocation4 + $0x590] sm:$0xf0]  ;;  %2200 = vmatpush.bf16.msra.mxu3 %v6420_v2  ;;  %v6447_v2 = vor.u32 %v5544_v36, %v4556_v59  ;;  %v5644_v41 = vld [vmem:[#allocation4 + $0x7a4] sm:$0xf]  ;;  %v419_v59 = vpop.f32.mrf.mxu2 }
  0xd3   :  { %2207 = vmatpush.bf16.msrb.mxu0 %v6411_v28  ;;  %2220 = vmatpush.bf16.msrb.mxu1 %v6413_v5  ;;  %7947 = vst [vmem:[#allocation93_spill] sm:$0xff] %v6429_v16  ;;  %v4828_v26 = vld [vmem:[#allocation4 + $0x6b0] sm:$0xf0]  ;;  %v6443_v5 = vadd.f32 %v393_v57, %v7951_v62  ;;  %v5540_v63 = vld [vmem:[#allocation4 + $0x464] sm:$0xf]  ;;  %v7954_v62 = vperm.slane %v6267_v34, 1 }
  0xd4   :  { %7948 = vst [vmem:[#allocation94_spill] sm:$0xff] %v6431_v46  ;;  %v4956_v6 = vld [vmem:[#allocation4 + $0x7b0] sm:$0xf0]  ;;  %2188 = vmatmul.bf16.vlgmr.msra.gmra.mxu2 %v6300_v23  ;;  %v5572_v24 = vld [vmem:[#allocation4 + $0x564] sm:$0xf]  ;;  %v6458_v36 = vor.u32 %v5612_v53, %v4828_v26  ;;  %v7957_v28 = vperm.slane %v6267_v34, 2 }
  0xd5   :  { %2232 = vmatpush.bf16.msrb.mxu2 %v6422_v47  ;;  %7949 = vst [vmem:[#allocation95_spill] sm:$0xff] %v6436_v29  ;;  %v6449_v47 = vor.u32 %v5576_v55, %v4684_v30  ;;  %2201 = vmatmul.bf16.vlgmr.msra.gmra.mxu3 %v6307_v18  ;;  %v4540_v7 = vld [vmem:[#allocation4 + $0x470] sm:$0xf0]  ;;  %v6461_v55 = vor.u32 %v5644_v41, %v4956_v6  ;;  %v5608_v30 = vld [vmem:[#allocation4 + $0x684] sm:$0xf] }
  0xd6   :  { %2245 = vmatpush.bf16.msrb.mxu3 %v6425_v48  ;;  %7950 = vst [vmem:[#allocation96_spill] sm:$0xff] %v6439_v50  ;;  %v406_v48 = vpop.f32.mrf.mxu1  ;;  %v4668_v57 = vld [vmem:[#allocation4 + $0x570] sm:$0xf0]  ;;  %v6465_v35 = vadd.f32 %v419_v59, %v7957_v28  ;;  %v5640_v53 = vld [vmem:[#allocation4 + $0x784] sm:$0xf]  ;;  %v395_v59 = vpop.f32.mrf.mxu0 }
  0xd7   :  { %2208 = vmatpush.bf16.msrb.mxu0 %v6429_v16  ;;  %2221 = vmatpush.bf16.msrb.mxu1 %v6431_v46  ;;  %7952 = vst [vmem:[#allocation97_spill] sm:$0xff] %v6447_v2  ;;  %v6455_v16 = vadd.f32 %v406_v48, %v7954_v62  ;;  %v4812_v46 = vld [vmem:[#allocation4 + $0x690] sm:$0xf0]  ;;  %v6469_v48 = vor.u32 %v5540_v63, %v4540_v7  ;;  %v5568_v6 = vld [vmem:[#allocation4 + $0x544] sm:$0xf] }
  0xd8   :  { %7953 = vst [vmem:[#allocation98_spill] sm:$0xff] %v6449_v47  ;;  %v6471_v62 = vor.u32 %v5572_v24, %v4668_v57  ;;  %v4940_v26 = vld [vmem:[#allocation4 + $0x790] sm:$0xf0]  ;;  %v6478_v28 = vor.u32 %v5608_v30, %v4812_v46  ;;  %v5604_v7 = vld [vmem:[#allocation4 + $0x664] sm:$0xf] }
  0xd9   :  { %2233 = vmatpush.bf16.msrb.mxu2 %v6436_v29  ;;  %7955 = vst [vmem:[#allocation99_spill] sm:$0xff] %v6458_v36  ;;  %v5536_v29 = vld [vmem:[#allocation4 + $0x444] sm:$0xf]  ;;  %v4524_v41 = vld [vmem:[#allocation4 + $0x450] sm:$0xf0]  ;;  %v6481_v63 = vor.u32 %v5640_v53, %v4940_v26 }
  0xda   :  { %2246 = vmatpush.bf16.msrb.mxu3 %v6439_v50  ;;  %7956 = vst [vmem:[#allocation100_spill] sm:$0xff] %v6461_v55  ;;  %v432_v50 = vpop.f32.mrf.mxu3  ;;  %v4652_v22 = vld [vmem:[#allocation4 + $0x550] sm:$0xf0]  ;;  %v6485_v57 = vor.u32 %v5536_v29, %v4524_v41  ;;  %v5564_v59 = vld [vmem:[#allocation4 + $0x524] sm:$0xf]  ;;  %v421_v26 = vpop.f32.mrf.mxu2 }
  0xdb   :  { %7958 = vst [vmem:[#allocation101_spill] sm:$0xff] %v6465_v35  ;;  %2209 = vmatpush.bf16.msrb.mxu0 %v6447_v2  ;;  %2222 = vmatpush.bf16.msrb.mxu1 %v6449_v47  ;;  %v6475_v43 = vadd.f32 %v432_v50, %v7961_v19  ;;  %v4796_v24 = vld [vmem:[#allocation4 + $0x670] sm:$0xf0]  ;;  %v6487_v47 = vor.u32 %v5568_v6, %v4652_v22  ;;  %v5636_v19 = vld [vmem:[#allocation4 + $0x764] sm:$0xf] }
  0xdc   :  { %7959 = vst [vmem:[#allocation102_spill] sm:$0xff] %v6469_v48  ;;  %v4924_v50 = vld [vmem:[#allocation4 + $0x770] sm:$0xf0]  ;;  %v6490_v53 = vor.u32 %v5604_v7, %v4796_v24  ;;  %v5600_v29 = vld [vmem:[#allocation4 + $0x644] sm:$0xf] }
  0xdd   :  { %7960 = vst [vmem:[#allocation103_spill] sm:$0xff] %v6471_v62  ;;  %2234 = vmatpush.bf16.msrb.mxu2 %v6458_v36  ;;  %v5532_v36 = vld [vmem:[#allocation4 + $0x424] sm:$0xf]  ;;  %v4508_v30 = vld [vmem:[#allocation4 + $0x430] sm:$0xf0] }
  0xde   :  { %7962 = vst [vmem:[#allocation104_spill] sm:$0xff] %v6475_v43  ;;  %2247 = vmatpush.bf16.msrb.mxu3 %v6461_v55  ;;  %v408_v46 = vpop.f32.mrf.mxu1  ;;  %v4636_v2 = vld [vmem:[#allocation4 + $0x530] sm:$0xf0]  ;;  %v5632_v22 = vld [vmem:[#allocation4 + $0x744] sm:$0xf]  ;;  %v6497_v6 = vor.u32 %v5532_v36, %v4508_v30 }
  0xdf   :  { %7963 = vst [vmem:[#allocation105_spill] sm:$0xff] %v6478_v28  ;;  %2210 = vmatpush.bf16.msrb.mxu0 %v6469_v48  ;;  %2223 = vmatpush.bf16.msrb.mxu1 %v6471_v62  ;;  %v6493_v48 = vor.u32 %v5636_v19, %v4924_v50  ;;  %v4780_v41 = vld [vmem:[#allocation4 + $0x650] sm:$0xf0]  ;;  %v6499_v46 = vor.u32 %v5564_v59, %v4636_v2  ;;  %v5560_v26 = vld [vmem:[#allocation4 + $0x504] sm:$0xf] }
  0xe0   :  { %7964 = vst [vmem:[#allocation106_spill] sm:$0xff] %v6481_v63  ;;  %v4908_v62 = vld [vmem:[#allocation4 + $0x750] sm:$0xf0]  ;;  %v6502_v19 = vor.u32 %v5600_v29, %v4780_v41  ;;  %v5431_v50 = vld [vmem:[#allocation4 + $0xf4] sm:$0xf0] }
  0xe1   :  { %7965 = vst [vmem:[#allocation107_spill] sm:$0xff] %v6485_v57  ;;  %2235 = vmatpush.bf16.msrb.mxu2 %v6478_v28  ;;  %v5528_v28 = vld [vmem:[#allocation4 + $0x404] sm:$0xf]  ;;  %v4492_v7 = vld [vmem:[#allocation4 + $0x410] sm:$0xf0]  ;;  %v6505_v36 = vor.u32 %v5632_v22, %v4908_v62 }
  0xe2   :  { %7966 = vst [vmem:[#allocation108_spill] sm:$0xff] %v6487_v47  ;;  %2248 = vmatpush.bf16.msrb.mxu3 %v6481_v63  ;;  %v434_v24 = vpop.f32.mrf.mxu3  ;;  %v4620_v55 = vld [vmem:[#allocation4 + $0x510] sm:$0xf0]  ;;  %v4098_v63 = vld [vmem:[#allocation4 + $0xe8] sm:$0xf]  ;;  %v6509_v59 = vor.u32 %v5528_v28, %v4492_v7 }
  0xe3   :  { %7967 = vst [vmem:[#allocation109_spill] sm:$0xff] %v6490_v53  ;;  %2211 = vmatpush.bf16.msrb.mxu0 %v6485_v57  ;;  %2224 = vmatpush.bf16.msrb.mxu1 %v6487_v47  ;;  %v4226_v43 = vld [vmem:[#allocation4 + $0x1e8] sm:$0xf]  ;;  %v5463_v57 = vld [vmem:[#allocation4 + $0x1f4] sm:$0xf0]  ;;  %v6511_v24 = vor.u32 %v5560_v26, %v4620_v55  ;;  %v6513_v41 = vor.u32 %v5431_v50, %v4098_v63 }
  0xe4   :  { %7968 = vst [vmem:[#allocation110_spill] sm:$0xff] %v6493_v48  ;;  %v5596_v2 = vld [vmem:[#allocation4 + $0x624] sm:$0xf]  ;;  %v4764_v30 = vld [vmem:[#allocation4 + $0x630] sm:$0xf0]  ;;  %v6515_v47 = vor.u32 %v5463_v57, %v4226_v43 }
  0xe5   :  { %7969 = vst [vmem:[#allocation111_spill] sm:$0xff] %v6497_v6  ;;  %2236 = vmatpush.bf16.msrb.mxu2 %v6490_v53  ;;  %v5628_v53 = vld [vmem:[#allocation4 + $0x724] sm:$0xf]  ;;  %v4892_v29 = vld [vmem:[#allocation4 + $0x730] sm:$0xf0]  ;;  %v6518_v62 = vor.u32 %v5596_v2, %v4764_v30 }
  0xe6   :  { %7970 = vst [vmem:[#allocation112_spill] sm:$0xff] %v6499_v46  ;;  %2249 = vmatpush.bf16.msrb.mxu3 %v6493_v48  ;;  %v4082_v35 = vld [vmem:[#allocation4 + $0xc8] sm:$0xf]  ;;  %v5427_v22 = vld [vmem:[#allocation4 + $0xd4] sm:$0xf0]  ;;  %v6521_v28 = vor.u32 %v5628_v53, %v4892_v29 }
  0xe7   :  { %7971 = vst [vmem:[#allocation113_spill] sm:$0xff] %v6502_v19  ;;  %2212 = vmatpush.bf16.msrb.mxu0 %v6497_v6  ;;  %2225 = vmatpush.bf16.msrb.mxu1 %v6499_v46  ;;  %v4210_v48 = vld [vmem:[#allocation4 + $0x1c8] sm:$0xf]  ;;  %v5459_v6 = vld [vmem:[#allocation4 + $0x1d4] sm:$0xf0]  ;;  %v6527_v50 = vor.u32 %v5427_v22, %v4082_v35 }
  0xe8   :  { %7972 = vst [vmem:[#allocation114_spill] sm:$0xff] %v6505_v36  ;;  %v5592_v55 = vld [vmem:[#allocation4 + $0x604] sm:$0xf]  ;;  %v4748_v7 = vld [vmem:[#allocation4 + $0x610] sm:$0xf0]  ;;  %v6529_v2 = vor.u32 %v5459_v6, %v4210_v48 }
  0xe9   :  { %7973 = vst [vmem:[#allocation115_spill] sm:$0xff] %v6509_v59  ;;  %2237 = vmatpush.bf16.msrb.mxu2 %v6502_v19  ;;  %v5624_v26 = vld [vmem:[#allocation4 + $0x704] sm:$0xf]  ;;  %v4876_v43 = vld [vmem:[#allocation4 + $0x710] sm:$0xf0]  ;;  %v6532_v29 = vor.u32 %v5592_v55, %v4748_v7 }
  0xea   :  { %7974 = vst [vmem:[#allocation116_spill] sm:$0xff] %v6511_v24  ;;  %2250 = vmatpush.bf16.msrb.mxu3 %v6505_v36  ;;  %v4354_v63 = vld [vmem:[#allocation4 + $0x2e8] sm:$0xf]  ;;  %v5495_v57 = vld [vmem:[#allocation4 + $0x2f4] sm:$0xf0] }
  0xeb   :  { %7975 = vst [vmem:[#allocation117_spill] sm:$0xff] %v6513_v41  ;;  %2213 = vmatpush.bf16.msrb.mxu0 %v6509_v59  ;;  %2226 = vmatpush.bf16.msrb.mxu1 %v6511_v24  ;;  %v4482_v53 = vld [vmem:[#allocation4 + $0x3e8] sm:$0xf]  ;;  %v5527_v30 = vld [vmem:[#allocation4 + $0x3f4] sm:$0xf0]  ;;  %v6536_v24 = vor.u32 %v5624_v26, %v4876_v43 }
  0xec   :  { %7976 = vst [vmem:[#allocation118_spill] sm:$0xff] %v6515_v47  ;;  %v4066_v59 = vld [vmem:[#allocation4 + $0xa8] sm:$0xf]  ;;  %v5423_v36 = vld [vmem:[#allocation4 + $0xb4] sm:$0xf0]  ;;  %v6541_v48 = vor.u32 %v5527_v30, %v4482_v53 }
  0xed   :  { %7977 = vst [vmem:[#allocation119_spill] sm:$0xff] %v6518_v62  ;;  %2238 = vmatpush.bf16.msrb.mxu2 %v6518_v62  ;;  %v4194_v35 = vld [vmem:[#allocation4 + $0x1a8] sm:$0xf]  ;;  %v5455_v22 = vld [vmem:[#allocation4 + $0x1b4] sm:$0xf0]  ;;  %v6545_v55 = vor.u32 %v5423_v36, %v4066_v59 }
  0xee   :  { %7978 = vst [vmem:[#allocation120_spill] sm:$0xff] %v6521_v28  ;;  %2251 = vmatpush.bf16.msrb.mxu3 %v6521_v28  ;;  %2214 = vmatmul.bf16.vlgmr.msrb.gmra.mxu0 %v6340_v17  ;;  %v4338_v6 = vld [vmem:[#allocation4 + $0x2c8] sm:$0xf]  ;;  %v5491_v62 = vld [vmem:[#allocation4 + $0x2d4] sm:$0xf0]  ;;  %v6548_v26 = vor.u32 %v5455_v22, %v4194_v35  ;;  %v7989_v35 = vperm.slane %v6267_v34, 4 }
  0xef   :  { %2258 = vmatpush.bf16.msra.mxu0 %v6513_v41  ;;  %2271 = vmatpush.bf16.msra.mxu1 %v6515_v47  ;;  %7979 = vst [vmem:[#allocation121_spill] sm:$0xff] %v6527_v50  ;;  %v6538_v41 = vor.u32 %v5495_v57, %v4354_v63  ;;  %v4466_v7 = vld [vmem:[#allocation4 + $0x3c8] sm:$0xf]  ;;  %v5523_v28 = vld [vmem:[#allocation4 + $0x3d4] sm:$0xf0]  ;;  %v6552_v57 = vor.u32 %v5491_v62, %v4338_v6 }
  0xf0   :  { %7980 = vst [vmem:[#allocation122_spill] sm:$0xff] %v6529_v2  ;;  %2227 = vmatmul.bf16.vlgmr.msrb.gmra.mxu1 %v6347_v12  ;;  %v4050_v43 = vld [vmem:[#allocation4 + $0x88] sm:$0xf]  ;;  %v5419_v63 = vld [vmem:[#allocation4 + $0x94] sm:$0xf0]  ;;  %v6555_v36 = vor.u32 %v5523_v28, %v4466_v7 }
  0xf1   :  { %7981 = vst [vmem:[#allocation123_spill] sm:$0xff] %v6532_v29  ;;  %2239 = vmatpush.bf16.msrb.mxu2 %v6532_v29  ;;  %v4178_v53 = vld [vmem:[#allocation4 + $0x188] sm:$0xf]  ;;  %v5451_v30 = vld [vmem:[#allocation4 + $0x194] sm:$0xf0]  ;;  %v471_v29 = vpop.f32.mrf.mxu2 }
  0xf2   :  { %7982 = vst [vmem:[#allocation124_spill] sm:$0xff] %v6536_v24  ;;  %2252 = vmatpush.bf16.msrb.mxu3 %v6536_v24  ;;  %v4322_v59 = vld [vmem:[#allocation4 + $0x2a8] sm:$0xf]  ;;  %v5519_v6 = vld [vmem:[#allocation4 + $0x3b4] sm:$0xf0]  ;;  %v458_v24 = vpop.f32.mrf.mxu1  ;;  %v6567_v28 = vor.u32 %v5451_v30, %v4178_v53  ;;  %v7997_v30 = vperm.slane %v6267_v34, 6 }
  0xf3   :  { %7983 = vst [vmem:[#allocation125_spill] sm:$0xff] %v6538_v41  ;;  %2259 = vmatpush.bf16.msra.mxu0 %v6527_v50  ;;  %2272 = vmatpush.bf16.msra.mxu1 %v6529_v2  ;;  %v445_v50 = vpop.f32.mrf.mxu0  ;;  %v5487_v2 = vld [vmem:[#allocation4 + $0x2b4] sm:$0xf0]  ;;  %v4450_v62 = vld [vmem:[#allocation4 + $0x3a8] sm:$0xf] }
  0xf4   :  { %7984 = vst [vmem:[#allocation126_spill] sm:$0xff] %v6541_v48  ;;  %v6559_v22 = vadd.f32 %v445_v50, %v7989_v35  ;;  %2240 = vmatmul.bf16.vlgmr.msrb.gmra.mxu2 %v6370_v54  ;;  %v4034_v7 = vld [vmem:[#allocation4 + $0x68] sm:$0xf]  ;;  %v7993_v50 = vperm.slane %v6267_v34, 5  ;;  %v6577_v47 = vor.u32 %v5519_v6, %v4450_v62  ;;  %v5483_v53 = vld [vmem:[#allocation4 + $0x294] sm:$0xf0]  ;;  %v6581_v19 = vadd.f32 %v471_v29, %v7997_v30 }
  0xf5   :  { %7985 = vst [vmem:[#allocation127_spill] sm:$0xff] %v6545_v55  ;;  %2284 = vmatpush.bf16.msra.mxu2 %v6538_v41  ;;  %v6563_v41 = vor.u32 %v5419_v63, %v4050_v43  ;;  %2253 = vmatmul.bf16.vlgmr.msrb.gmra.mxu3 %v6375_v52  ;;  %v4162_v43 = vld [vmem:[#allocation4 + $0x168] sm:$0xf]  ;;  %v5447_v63 = vld [vmem:[#allocation4 + $0x174] sm:$0xf0]  ;;  %v8001_v6 = vperm.slane %v6267_v34, 7 }
  0xf6   :  { %7986 = vst [vmem:[#allocation128_spill] sm:$0xff] %v6548_v26  ;;  %2297 = vmatpush.bf16.msra.mxu3 %v6541_v48  ;;  %v5415_v48 = vld [vmem:[#allocation4 + $0x74] sm:$0xf0]  ;;  %v6571_v35 = vadd.f32 %v458_v24, %v7993_v50  ;;  %v4434_v50 = vld [vmem:[#allocation4 + $0x388] sm:$0xf] }
  0xf7   :  { %7987 = vst [vmem:[#allocation129_spill] sm:$0xff] %v6552_v57  ;;  %2260 = vmatpush.bf16.msra.mxu0 %v6545_v55  ;;  %2273 = vmatpush.bf16.msra.mxu1 %v6548_v26  ;;  %v6574_v55 = vor.u32 %v5487_v2, %v4322_v59  ;;  %v4306_v26 = vld [vmem:[#allocation4 + $0x288] sm:$0xf]  ;;  %v6584_v24 = vor.u32 %v5415_v48, %v4034_v7  ;;  %v5515_v2 = vld [vmem:[#allocation4 + $0x394] sm:$0xf0]  ;;  %v484_v59 = vpop.f32.mrf.mxu3 }
  0xf8   :  { %7988 = vst [vmem:[#allocation130_spill] sm:$0xff] %v6555_v36  ;;  %v5411_v62 = vld [vmem:[#allocation4 + $0x54] sm:$0xf0]  ;;  %v6591_v46 = vadd.f32 %v484_v59, %v8001_v6  ;;  %v6594_v29 = vor.u32 %v5483_v53, %v4306_v26  ;;  %v4146_v30 = vld [vmem:[#allocation4 + $0x148] sm:$0xf] }
  0xf9   :  { %7990 = vst [vmem:[#allocation131_spill] sm:$0xff] %v6559_v22  ;;  %2285 = vmatpush.bf16.msra.mxu2 %v6552_v57  ;;  %v6587_v57 = vor.u32 %v5447_v63, %v4162_v43  ;;  %v5443_v48 = vld [vmem:[#allocation4 + $0x154] sm:$0xf0]  ;;  %v4418_v34 = vld [vmem:[#allocation4 + $0x368] sm:$0xf] }
  0xfa   :  { %7991 = vst [vmem:[#allocation132_spill] sm:$0xff] %v6563_v41  ;;  %2298 = vmatpush.bf16.msra.mxu3 %v6555_v36  ;;  %v4018_v36 = vld [vmem:[#allocation4 + $0x48] sm:$0xf]  ;;  %v5479_v43 = vld [vmem:[#allocation4 + $0x274] sm:$0xf0]  ;;  %v460_v6 = vpop.f32.mrf.mxu1  ;;  %v6603_v26 = vor.u32 %v5443_v48, %v4146_v30 }
  0xfb   :  { %7992 = vst [vmem:[#allocation133_spill] sm:$0xff] %v6567_v28  ;;  %2261 = vmatpush.bf16.msra.mxu0 %v6563_v41  ;;  %2274 = vmatpush.bf16.msra.mxu1 %v6567_v28  ;;  %v447_v7 = vpop.f32.mrf.mxu0  ;;  %v6597_v41 = vor.u32 %v5515_v2, %v4434_v50  ;;  %v4290_v28 = vld [vmem:[#allocation4 + $0x268] sm:$0xf]  ;;  %v6600_v63 = vor.u32 %v5411_v62, %v4018_v36  ;;  %v5511_v59 = vld [vmem:[#allocation4 + $0x374] sm:$0xf0] }
  0xfc   :  { %7994 = vst [vmem:[#allocation134_spill] sm:$0xff] %v6571_v35  ;;  %v4002_v53 = vld [vmem:[#allocation4 + $0x28] sm:$0xf]  ;;  %v6606_v7 = vor.u32 %v5479_v43, %v4290_v28  ;;  %v5439_v2 = vld [vmem:[#allocation4 + $0x134] sm:$0xf0]  ;;  %v6609_v36 = vor.u32 %v5511_v59, %v4418_v34 }
  0xfd   :  { %7995 = vst [vmem:[#allocation135_spill] sm:$0xff] %v6574_v55  ;;  %2286 = vmatpush.bf16.msra.mxu2 %v6574_v55  ;;  %v5407_v55 = vld [vmem:[#allocation4 + $0x34] sm:$0xf0]  ;;  %v4130_v50 = vld [vmem:[#allocation4 + $0x128] sm:$0xf] }
  0xfe   :  { %7996 = vst [vmem:[#allocation136_spill] sm:$0xff] %v6577_v47  ;;  %2299 = vmatpush.bf16.msra.mxu3 %v6577_v47  ;;  %v473_v47 = vpop.f32.mrf.mxu2  ;;  %v4274_v62 = vld [vmem:[#allocation4 + $0x248] sm:$0xf]  ;;  %v6612_v6 = vor.u32 %v5407_v55, %v4002_v53  ;;  %v5507_v48 = vld [vmem:[#allocation4 + $0x354] sm:$0xf0]  ;;  %v6615_v28 = vor.u32 %v5439_v2, %v4130_v50 }
  0xff   :  { %7998 = vst [vmem:[#allocation137_spill] sm:$0xff] %v6581_v19  ;;  %2262 = vmatpush.bf16.msra.mxu0 %v6584_v24  ;;  %2275 = vmatpush.bf16.msra.mxu1 %v6587_v57  ;;  %v4402_v30 = vld [vmem:[#allocation4 + $0x348] sm:$0xf]  ;;  %v5403_v43 = vld [vmem:[#allocation4 + $0x14] sm:$0xf0] }
 0x100   :  { %7999 = vst [vmem:[#allocation138_spill] sm:$0xff] %v6584_v24  ;;  %v5475_v24 = vld [vmem:[#allocation4 + $0x254] sm:$0xf0]  ;;  %v4114_v47 = vld [vmem:[#allocation4 + $0x108] sm:$0xf]  ;;  %v6621_v55 = vor.u32 %v5507_v48, %v4402_v30 }
 0x101   :  { %8000 = vst [vmem:[#allocation139_spill] sm:$0xff] %v6587_v57  ;;  %2287 = vmatpush.bf16.msra.mxu2 %v6594_v29  ;;  %v3986_v57 = vld [vmem:[#allocation4 + $0x8] sm:$0xf]  ;;  %v6618_v34 = vor.u32 %v5475_v24, %v4274_v62  ;;  %v5591_v53 = vld [vmem:[#allocation4 + $0x5f4] sm:$0xf0] }
 0x102   :  { %8002 = vst [vmem:[#allocation140_spill] sm:$0xff] %v6591_v46  ;;  %2300 = vmatpush.bf16.msra.mxu3 %v6597_v41  ;;  %v486_v46 = vpop.f32.mrf.mxu3  ;;  %v4610_v59 = vld [vmem:[#allocation4 + $0x4e8] sm:$0xf]  ;;  %v5471_v19 = vld [vmem:[#allocation4 + $0x234] sm:$0xf0]  ;;  %v6624_v50 = vor.u32 %v5403_v43, %v3986_v57 }
 0x103   :  { %8003 = vst [vmem:[#allocation141_spill] sm:$0xff] %v6594_v29  ;;  %2263 = vmatpush.bf16.msra.mxu0 %v6600_v63  ;;  %2276 = vmatpush.bf16.msra.mxu1 %v6603_v26  ;;  %v5435_v29 = vld [vmem:[#allocation4 + $0x114] sm:$0xf0]  ;;  %v4258_v46 = vld [vmem:[#allocation4 + $0x228] sm:$0xf] }
 0x104   :  { %8004 = vst [vmem:[#allocation142_spill] sm:$0xff] %v6597_v41  ;;  %v5559_v41 = vld [vmem:[#allocation4 + $0x4f4] sm:$0xf0]  ;;  %v4386_v2 = vld [vmem:[#allocation4 + $0x328] sm:$0xf]  ;;  %v6627_v24 = vor.u32 %v5435_v29, %v4114_v47  ;;  %v6634_v48 = vor.u32 %v5471_v19, %v4258_v46 }
 0x105   :  { %8005 = vst [vmem:[#allocation143_spill] sm:$0xff] %v6600_v63  ;;  %2288 = vmatpush.bf16.msra.mxu2 %v6606_v7  ;;  %v4738_v63 = vld [vmem:[#allocation4 + $0x5e8] sm:$0xf]  ;;  %v6629_v62 = vor.u32 %v5559_v41, %v4610_v59  ;;  %v5499_v41 = vld [vmem:[#allocation4 + $0x314] sm:$0xf0] }
 0x106   :  { %8006 = vst [vmem:[#allocation144_spill] sm:$0xff] %v6603_v26  ;;  %2301 = vmatpush.bf16.msra.mxu3 %v6609_v36  ;;  %v5503_v26 = vld [vmem:[#allocation4 + $0x334] sm:$0xf0]  ;;  %v6632_v30 = vor.u32 %v5591_v53, %v4738_v63  ;;  %v4722_v35 = vld [vmem:[#allocation4 + $0x5c8] sm:$0xf] }
 0x107   :  { %8007 = vst [vmem:[#allocation145_spill] sm:$0xff] %v6606_v7  ;;  %2264 = vmatpush.bf16.msra.mxu0 %v6612_v6  ;;  %2277 = vmatpush.bf16.msra.mxu1 %v6615_v28  ;;  %v4594_v7 = vld [vmem:[#allocation4 + $0x4c8] sm:$0xf]  ;;  %v6637_v57 = vor.u32 %v5503_v26, %v4386_v2  ;;  %v5623_v59 = vld [vmem:[#allocation4 + $0x6f4] sm:$0xf0] }
 0x108   :  { %8008 = vst [vmem:[#allocation146_spill] sm:$0xff] %v6609_v36  ;;  %v5555_v36 = vld [vmem:[#allocation4 + $0x4d4] sm:$0xf0]  ;;  %v4242_v43 = vld [vmem:[#allocation4 + $0x208] sm:$0xf] }
 0x109   :  { %8009 = vst [vmem:[#allocation147_spill] sm:$0xff] %v6612_v6  ;;  %2289 = vmatpush.bf16.msra.mxu2 %v6618_v34  ;;  %v5587_v6 = vld [vmem:[#allocation4 + $0x5d4] sm:$0xf0]  ;;  %v4370_v29 = vld [vmem:[#allocation4 + $0x308] sm:$0xf]  ;;  %v6642_v19 = vor.u32 %v5555_v36, %v4594_v7 }
 0x10a   :  { %8010 = vst [vmem:[#allocation148_spill] sm:$0xff] %v6615_v28  ;;  %2302 = vmatpush.bf16.msra.mxu3 %v6621_v55  ;;  %v5467_v28 = vld [vmem:[#allocation4 + $0x214] sm:$0xf0]  ;;  %v4866_v47 = vld [vmem:[#allocation4 + $0x6e8] sm:$0xf]  ;;  %v6646_v26 = vor.u32 %v5587_v6, %v4722_v35 }
 0x10b   :  { %8011 = vst [vmem:[#allocation149_spill] sm:$0xff] %v6618_v34  ;;  %2265 = vmatpush.bf16.msra.mxu0 %v6624_v50  ;;  %2278 = vmatpush.bf16.msra.mxu1 %v6627_v24  ;;  %v4994_v63 = vld [vmem:[#allocation4 + $0x7e8] sm:$0xf]  ;;  %v5655_v53 = vld [vmem:[#allocation4 + $0x7f4] sm:$0xf0]  ;;  %v6648_v46 = vor.u32 %v5467_v28, %v4242_v43  ;;  %v6654_v7 = vor.u32 %v5623_v59, %v4866_v47 }
 0x10c   :  { %8012 = vst [vmem:[#allocation150_spill] sm:$0xff] %v6621_v55  ;;  %v4578_v2 = vld [vmem:[#allocation4 + $0x4a8] sm:$0xf]  ;;  %v5619_v6 = vld [vmem:[#allocation4 + $0x6d4] sm:$0xf0] }
 0x10d   :  { %8013 = vst [vmem:[#allocation151_spill] sm:$0xff] %v6624_v50  ;;  %2290 = vmatpush.bf16.msra.mxu2 %v6634_v48  ;;  %v5551_v50 = vld [vmem:[#allocation4 + $0x4b4] sm:$0xf0]  ;;  %v4706_v36 = vld [vmem:[#allocation4 + $0x5a8] sm:$0xf] }
 0x10e   :  { %8014 = vst [vmem:[#allocation152_spill] sm:$0xff] %v6627_v24  ;;  %2303 = vmatpush.bf16.msra.mxu3 %v6637_v57  ;;  %2266 = vmatmul.bf16.vlgmr.msra.gmra.mxu0 %v6278_v11  ;;  %v6652_v24 = vor.u32 %v5499_v41, %v4370_v29  ;;  %v4850_v35 = vld [vmem:[#allocation4 + $0x6c8] sm:$0xf]  ;;  %v6660_v28 = vor.u32 %v5551_v50, %v4578_v2  ;;  %v5547_v47 = vld [vmem:[#allocation4 + $0x494] sm:$0xf0] }
 0x10f   :  { %8015 = vst [vmem:[#allocation153_spill] sm:$0xff] %v6629_v62  ;;  %2310 = vmatpush.bf16.msrb.mxu0 %v6629_v62  ;;  %2323 = vmatpush.bf16.msrb.mxu1 %v6632_v30  ;;  %v5583_v62 = vld [vmem:[#allocation4 + $0x5b4] sm:$0xf0]  ;;  %v4978_v43 = vld [vmem:[#allocation4 + $0x7c8] sm:$0xf]  ;;  %v6668_v59 = vor.u32 %v5619_v6, %v4850_v35 }
 0x110   :  { %8016 = vst [vmem:[#allocation154_spill] sm:$0xff] %v6632_v30  ;;  %2279 = vmatmul.bf16.vlgmr.msra.gmra.mxu1 %v6283_v42  ;;  %v6657_v30 = vor.u32 %v5655_v53, %v4994_v63  ;;  %v6664_v29 = vor.u32 %v5583_v62, %v4706_v36  ;;  %v4562_v41 = vld [vmem:[#allocation4 + $0x488] sm:$0xf]  ;;  %v5579_v53 = vld [vmem:[#allocation4 + $0x594] sm:$0xf0] }
 0x111   :  { %8017 = vst [vmem:[#allocation155_spill] sm:$0xff] %v6634_v48  ;;  %2291 = vmatpush.bf16.msra.mxu2 %v6648_v46  ;;  %v4690_v63 = vld [vmem:[#allocation4 + $0x588] sm:$0xf]  ;;  %v6675_v62 = vor.u32 %v5547_v47, %v4562_v41  ;;  %v5461_v48 = vld [vmem:[#allocation4 + $0x1ec] sm:$0xf] }
 0x112   :  { %8018 = vst [vmem:[#allocation156_spill] sm:$0xff] %v6637_v57  ;;  %v5651_v57 = vld [vmem:[#allocation4 + $0x7d4] sm:$0xf0]  ;;  %2304 = vmatpush.bf16.msra.mxu3 %v6652_v24  ;;  %v4834_v2 = vld [vmem:[#allocation4 + $0x6a8] sm:$0xf]  ;;  %v6679_v35 = vor.u32 %v5579_v53, %v4690_v63 }
 0x113   :  { %8019 = vst [vmem:[#allocation157_spill] sm:$0xff] %v6642_v19  ;;  %2311 = vmatpush.bf16.msrb.mxu0 %v6642_v19  ;;  %2324 = vmatpush.bf16.msrb.mxu1 %v6646_v26  ;;  %v6671_v50 = vor.u32 %v5651_v57, %v4978_v43  ;;  %v4962_v36 = vld [vmem:[#allocation4 + $0x7a8] sm:$0xf]  ;;  %v5643_v53 = vld [vmem:[#allocation4 + $0x794] sm:$0xf0] }
 0x114   :  { %8020 = vst [vmem:[#allocation158_spill] sm:$0xff] %v6646_v26  ;;  %v5615_v26 = vld [vmem:[#allocation4 + $0x6b4] sm:$0xf0]  ;;  %2292 = vmatmul.bf16.vlgmr.msra.gmra.mxu2 %v6300_v23  ;;  %v4546_v6 = vld [vmem:[#allocation4 + $0x468] sm:$0xf] }
 0x115   :  { %8021 = vst [vmem:[#allocation159_spill] sm:$0xff] %v6648_v46  ;;  %2336 = vmatpush.bf16.msrb.mxu2 %v6654_v7  ;;  %2305 = vmatmul.bf16.vlgmr.msra.gmra.mxu3 %v6307_v18  ;;  %v6682_v57 = vor.u32 %v5615_v26, %v4834_v2  ;;  %v4674_v43 = vld [vmem:[#allocation4 + $0x568] sm:$0xf]  ;;  %v5539_v2 = vld [vmem:[#allocation4 + $0x454] sm:$0xf0] }
 0x116   :  { %8022 = vst [vmem:[#allocation160_spill] sm:$0xff] %v6652_v24  ;;  %2349 = vmatpush.bf16.msrb.mxu3 %v6657_v30  ;;  %v5647_v24 = vld [vmem:[#allocation4 + $0x7b4] sm:$0xf0]  ;;  %v4818_v47 = vld [vmem:[#allocation4 + $0x688] sm:$0xf] }
 0x117   :  { %8023 = vst [vmem:[#allocation161_spill] sm:$0xff] %v6654_v7  ;;  %2312 = vmatpush.bf16.msrb.mxu0 %v6660_v28  ;;  %2325 = vmatpush.bf16.msrb.mxu1 %v6664_v29  ;;  %v5575_v7 = vld [vmem:[#allocation4 + $0x574] sm:$0xf0]  ;;  %v6685_v41 = vor.u32 %v5647_v24, %v4962_v36  ;;  %v4946_v63 = vld [vmem:[#allocation4 + $0x788] sm:$0xf] }
 0x118   :  { %8024 = vst [vmem:[#allocation162_spill] sm:$0xff] %v6657_v30  ;;  %v5543_v30 = vld [vmem:[#allocation4 + $0x474] sm:$0xf0]  ;;  %v4530_v26 = vld [vmem:[#allocation4 + $0x448] sm:$0xf] }
 0x119   :  { %8025 = vst [vmem:[#allocation163_spill] sm:$0xff] %v6660_v28  ;;  %2337 = vmatpush.bf16.msrb.mxu2 %v6668_v59  ;;  %v5611_v28 = vld [vmem:[#allocation4 + $0x694] sm:$0xf0]  ;;  %v6688_v46 = vor.u32 %v5543_v30, %v4546_v6  ;;  %v4658_v24 = vld [vmem:[#allocation4 + $0x548] sm:$0xf] }
 0x11a   :  { %8026 = vst [vmem:[#allocation164_spill] sm:$0xff] %v6664_v29  ;;  %2350 = vmatpush.bf16.msrb.mxu3 %v6671_v50  ;;  %v6691_v29 = vor.u32 %v5575_v7, %v4674_v43  ;;  %v5571_v36 = vld [vmem:[#allocation4 + $0x554] sm:$0xf0]  ;;  %v4802_v30 = vld [vmem:[#allocation4 + $0x668] sm:$0xf] }
 0x11b   :  { %8027 = vst [vmem:[#allocation165_spill] sm:$0xff] %v6668_v59  ;;  %2313 = vmatpush.bf16.msrb.mxu0 %v6675_v62  ;;  %2326 = vmatpush.bf16.msrb.mxu1 %v6679_v35  ;;  %v6694_v59 = vor.u32 %v5611_v28, %v4818_v47  ;;  %v5607_v6 = vld [vmem:[#allocation4 + $0x674] sm:$0xf0]  ;;  %v4930_v7 = vld [vmem:[#allocation4 + $0x768] sm:$0xf] }
 0x11c   :  { %8028 = vst [vmem:[#allocation166_spill] sm:$0xff] %v6671_v50  ;;  %v6697_v50 = vor.u32 %v5643_v53, %v4946_v63  ;;  %v5639_v43 = vld [vmem:[#allocation4 + $0x774] sm:$0xf0]  ;;  %v4514_v28 = vld [vmem:[#allocation4 + $0x428] sm:$0xf] }
 0x11d   :  { %8029 = vst [vmem:[#allocation167_spill] sm:$0xff] %v6675_v62  ;;  %2338 = vmatpush.bf16.msrb.mxu2 %v6682_v57  ;;  %v6700_v62 = vor.u32 %v5539_v2, %v4530_v26  ;;  %v5535_v47 = vld [vmem:[#allocation4 + $0x434] sm:$0xf0]  ;;  %v4642_v63 = vld [vmem:[#allocation4 + $0x528] sm:$0xf] }
 0x11e   :  { %8030 = vst [vmem:[#allocation168_spill] sm:$0xff] %v6679_v35  ;;  %2351 = vmatpush.bf16.msrb.mxu3 %v6685_v41  ;;  %v6703_v35 = vor.u32 %v5571_v36, %v4658_v24  ;;  %v5567_v53 = vld [vmem:[#allocation4 + $0x534] sm:$0xf0]  ;;  %v4786_v26 = vld [vmem:[#allocation4 + $0x648] sm:$0xf] }
 0x11f   :  { %8031 = vst [vmem:[#allocation169_spill] sm:$0xff] %v6682_v57  ;;  %2314 = vmatpush.bf16.msrb.mxu0 %v6688_v46  ;;  %2327 = vmatpush.bf16.msrb.mxu1 %v6691_v29  ;;  %v6706_v57 = vor.u32 %v5607_v6, %v4802_v30  ;;  %v5603_v2 = vld [vmem:[#allocation4 + $0x654] sm:$0xf0]  ;;  %v4914_v24 = vld [vmem:[#allocation4 + $0x748] sm:$0xf] }
 0x120   :  { %8032 = vst [vmem:[#allocation170_spill] sm:$0xff] %v6685_v41  ;;  %v6709_v41 = vor.u32 %v5639_v43, %v4930_v7  ;;  %v5635_v36 = vld [vmem:[#allocation4 + $0x754] sm:$0xf0]  ;;  %v4626_v6 = vld [vmem:[#allocation4 + $0x508] sm:$0xf]  ;;  %v6718_v7 = vor.u32 %v5603_v2, %v4786_v26 }
 0x121   :  { %8033 = vst [vmem:[#allocation171_spill] sm:$0xff] %v6688_v46  ;;  %2339 = vmatpush.bf16.msrb.mxu2 %v6694_v59  ;;  %v6712_v46 = vor.u32 %v5535_v47, %v4514_v28  ;;  %v5531_v30 = vld [vmem:[#allocation4 + $0x414] sm:$0xf0]  ;;  %v5429_v43 = vld [vmem:[#allocation4 + $0xec] sm:$0xf]  ;;  %v6721_v28 = vor.u32 %v5635_v36, %v4914_v24 }
 0x122   :  { %8034 = vst [vmem:[#allocation172_spill] sm:$0xff] %v6691_v29  ;;  %2352 = vmatpush.bf16.msrb.mxu3 %v6697_v50  ;;  %v4498_v29 = vld [vmem:[#allocation4 + $0x408] sm:$0xf]  ;;  %v5563_v19 = vld [vmem:[#allocation4 + $0x514] sm:$0xf0] }
 0x123   :  { %8035 = vst [vmem:[#allocation173_spill] sm:$0xff] %v6694_v59  ;;  %2315 = vmatpush.bf16.msrb.mxu0 %v6700_v62  ;;  %2328 = vmatpush.bf16.msrb.mxu1 %v6703_v35  ;;  %v6715_v59 = vor.u32 %v5567_v53, %v4642_v63  ;;  %v4228_v47 = vld [vmem:[#allocation4 + $0x1f8] sm:$0xf0]  ;;  %v5599_v55 = vld [vmem:[#allocation4 + $0x634] sm:$0xf0]  ;;  %v6724_v63 = vor.u32 %v5531_v30, %v4498_v29 }
 0x124   :  { %8036 = vst [vmem:[#allocation174_spill] sm:$0xff] %v6697_v50  ;;  %v4100_v50 = vld [vmem:[#allocation4 + $0xf8] sm:$0xf0]  ;;  %v4898_v53 = vld [vmem:[#allocation4 + $0x728] sm:$0xf]  ;;  %v6727_v26 = vor.u32 %v5563_v19, %v4626_v6  ;;  %v6732_v24 = vor.u32 %v5461_v48, %v4228_v47 }
 0x125   :  { %8037 = vst [vmem:[#allocation175_spill] sm:$0xff] %v6700_v62  ;;  %2340 = vmatpush.bf16.msrb.mxu2 %v6706_v57  ;;  %v4770_v62 = vld [vmem:[#allocation4 + $0x628] sm:$0xf]  ;;  %v6729_v2 = vor.u32 %v5429_v43, %v4100_v50  ;;  %v5457_v34 = vld [vmem:[#allocation4 + $0x1cc] sm:$0xf] }
 0x126   :  { %8038 = vst [vmem:[#allocation176_spill] sm:$0xff] %v6703_v35  ;;  %2353 = vmatpush.bf16.msrb.mxu3 %v6709_v41  ;;  %v5631_v35 = vld [vmem:[#allocation4 + $0x734] sm:$0xf0]  ;;  %v6734_v36 = vor.u32 %v5599_v55, %v4770_v62  ;;  %v4754_v30 = vld [vmem:[#allocation4 + $0x608] sm:$0xf] }
 0x127   :  { %8039 = vst [vmem:[#allocation177_spill] sm:$0xff] %v6706_v57  ;;  %2316 = vmatpush.bf16.msrb.mxu0 %v6712_v46  ;;  %2329 = vmatpush.bf16.msrb.mxu1 %v6715_v59  ;;  %v5425_v57 = vld [vmem:[#allocation4 + $0xcc] sm:$0xf]  ;;  %v6737_v29 = vor.u32 %v5631_v35, %v4898_v53  ;;  %v4882_v19 = vld [vmem:[#allocation4 + $0x708] sm:$0xf] }
 0x128   :  { %8040 = vst [vmem:[#allocation178_spill] sm:$0xff] %v6709_v41  ;;  %v4084_v41 = vld [vmem:[#allocation4 + $0xd8] sm:$0xf0]  ;;  %v5627_v50 = vld [vmem:[#allocation4 + $0x714] sm:$0xf0] }
 0x129   :  { %8041 = vst [vmem:[#allocation179_spill] sm:$0xff] %v6712_v46  ;;  %2341 = vmatpush.bf16.msrb.mxu2 %v6718_v7  ;;  %v4212_v46 = vld [vmem:[#allocation4 + $0x1d8] sm:$0xf0]  ;;  %v5493_v6 = vld [vmem:[#allocation4 + $0x2ec] sm:$0xf]  ;;  %v6742_v55 = vor.u32 %v5425_v57, %v4084_v41  ;;  %v6757_v57 = vor.u32 %v5627_v50, %v4882_v19 }
 0x12a   :  { %8042 = vst [vmem:[#allocation180_spill] sm:$0xff] %v6715_v59  ;;  %2354 = vmatpush.bf16.msrb.mxu3 %v6721_v28  ;;  %v5595_v59 = vld [vmem:[#allocation4 + $0x614] sm:$0xf0]  ;;  %v4356_v43 = vld [vmem:[#allocation4 + $0x2f8] sm:$0xf0]  ;;  %v6746_v35 = vor.u32 %v5457_v34, %v4212_v46 }
 0x12b   :  { %8043 = vst [vmem:[#allocation181_spill] sm:$0xff] %v6718_v7  ;;  %2317 = vmatpush.bf16.msrb.mxu0 %v6724_v63  ;;  %2330 = vmatpush.bf16.msrb.mxu1 %v6727_v26  ;;  %v5525_v48 = vld [vmem:[#allocation4 + $0x3ec] sm:$0xf]  ;;  %v4484_v62 = vld [vmem:[#allocation4 + $0x3f8] sm:$0xf0]  ;;  %v6748_v47 = vor.u32 %v5595_v59, %v4754_v30  ;;  %v6759_v41 = vor.u32 %v5493_v6, %v4356_v43 }
 0x12c   :  { %8044 = vst [vmem:[#allocation182_spill] sm:$0xff] %v6721_v28  ;;  %v5421_v53 = vld [vmem:[#allocation4 + $0xac] sm:$0xf]  ;;  %v4196_v34 = vld [vmem:[#allocation4 + $0x1b8] sm:$0xf0]  ;;  %v6762_v46 = vor.u32 %v5525_v48, %v4484_v62  ;;  %v2059_v62 = vpop.f32.mrf.mxu0 }
 0x12d   :  { %8045 = vst [vmem:[#allocation183_spill] sm:$0xff] %v6724_v63  ;;  %2342 = vmatpush.bf16.msrb.mxu2 %v6734_v36  ;;  %v4068_v63 = vld [vmem:[#allocation4 + $0xb8] sm:$0xf0]  ;;  %v5489_v59 = vld [vmem:[#allocation4 + $0x2cc] sm:$0xf] }
 0x12e   :  { %8046 = vst [vmem:[#allocation184_spill] sm:$0xff] %v6727_v26  ;;  %v6753_v26 = vld [vmem:[%s7617_s4] sm:$0xf]  ;;  %2355 = vmatpush.bf16.msrb.mxu3 %v6737_v29  ;;  %2318 = vmatmul.bf16.vlgmr.msrb.gmra.mxu0 %v6340_v17  ;;  %v4340_v30 = vld [vmem:[#allocation4 + $0x2d8] sm:$0xf0] }
 0x12f   :  { %8047 = vst [vmem:[#allocation185_spill] sm:$0xff] %v6729_v2  ;;  %2362 = vmatpush.bf16.msra.mxu0 %v6729_v2  ;;  %2375 = vmatpush.bf16.msra.mxu1 %v6732_v24  ;;  %v5521_v2 = vld [vmem:[#allocation4 + $0x3cc] sm:$0xf]  ;;  %v4468_v28 = vld [vmem:[#allocation4 + $0x3d8] sm:$0xf0]  ;;  %v6774_v43 = vor.u32 %v5489_v59, %v4340_v30 }
 0x130   :  { %8048 = vst [vmem:[#allocation186_spill] sm:$0xff] %v6732_v24  ;;  %2331 = vmatmul.bf16.vlgmr.msrb.gmra.mxu1 %v6347_v12  ;;  %v6765_v24 = vor.u32 %v5421_v53, %v4068_v63  ;;  %v5417_v50 = vld [vmem:[#allocation4 + $0x8c] sm:$0xf]  ;;  %v4052_v6 = vld [vmem:[#allocation4 + $0x98] sm:$0xf0]  ;;  %v6777_v53 = vor.u32 %v5521_v2, %v4468_v28 }
 0x131   :  { %8049 = vst [vmem:[#allocation187_spill] sm:$0xff] %v6734_v36  ;;  %v5453_v36 = vld [vmem:[#allocation4 + $0x1ac] sm:$0xf]  ;;  %2343 = vmatpush.bf16.msrb.mxu2 %v6748_v47  ;;  %v4180_v48 = vld [vmem:[#allocation4 + $0x198] sm:$0xf0] }
 0x132   :  { %8050 = vst [vmem:[#allocation188_spill] sm:$0xff] %v6737_v29  ;;  %v6770_v19 = vor.u32 %v5453_v36, %v4196_v34  ;;  %2356 = vmatpush.bf16.msrb.mxu3 %v6757_v57  ;;  %v5449_v63 = vld [vmem:[#allocation4 + $0x18c] sm:$0xf]  ;;  %v8061_v36 = vperm.slane %v6753_v26, 0  ;;  %v4452_v30 = vld [vmem:[#allocation4 + $0x3b8] sm:$0xf0] }
 0x133   :  { %8051 = vst [vmem:[#allocation189_spill] sm:$0xff] %v6742_v55  ;;  %2363 = vmatpush.bf16.msra.mxu0 %v6742_v55  ;;  %2376 = vmatpush.bf16.msra.mxu1 %v6746_v35  ;;  %v5485_v29 = vld [vmem:[#allocation4 + $0x2ac] sm:$0xf]  ;;  %v6787_v28 = vor.u32 %v5449_v63, %v4180_v48  ;;  %v4436_v48 = vld [vmem:[#allocation4 + $0x398] sm:$0xf0] }
 0x134   :  { %8052 = vst [vmem:[#allocation190_spill] sm:$0xff] %v6746_v35  ;;  %v4324_v35 = vld [vmem:[#allocation4 + $0x2b8] sm:$0xf0]  ;;  %2344 = vmatmul.bf16.vlgmr.msrb.gmra.mxu2 %v6370_v54  ;;  %v2060_v34 = vadd.f32 %v2059_v62, %v8061_v36  ;;  %v5517_v59 = vld [vmem:[#allocation4 + $0x3ac] sm:$0xf] }
 0x135   :  { %8053 = vst [vmem:[#allocation191_spill] sm:$0xff] %v6748_v47  ;;  %2388 = vmatpush.bf16.msra.mxu2 %v6759_v41  ;;  %2357 = vmatmul.bf16.vlgmr.msrb.gmra.mxu3 %v6375_v52  ;;  %v5413_v2 = vld [vmem:[#allocation4 + $0x6c] sm:$0xf]  ;;  %v4164_v62 = vld [vmem:[#allocation4 + $0x178] sm:$0xf0] }
 0x136   :  { %8054 = vst [vmem:[#allocation192_spill] sm:$0xff] %v6757_v57  ;;  %2401 = vmatpush.bf16.msra.mxu3 %v6762_v46  ;;  %v2072_v57 = vpop.f32.mrf.mxu1  ;;  %v5445_v55 = vld [vmem:[#allocation4 + $0x16c] sm:$0xf]  ;;  %v4308_v36 = vld [vmem:[#allocation4 + $0x298] sm:$0xf0] }
 0x137   :  { %8055 = vst [vmem:[#allocation193_spill] sm:$0xff] %v6759_v41  ;;  %2364 = vmatpush.bf16.msra.mxu0 %v6765_v24  ;;  %v6783_v41 = vor.u32 %v5417_v50, %v4052_v6  ;;  %2377 = vmatpush.bf16.msra.mxu1 %v6770_v19  ;;  %v2073_v47 = vadd.f32 %v2072_v57, %v2060_v34  ;;  %v5481_v6 = vld [vmem:[#allocation4 + $0x28c] sm:$0xf]  ;;  %v3988_v7 = vld [vmem:[#allocation4 + $0x18] sm:$0xf0] }
 0x138   :  { %8056 = vst [vmem:[#allocation194_spill] sm:$0xff] %v6762_v46  ;;  %v4036_v46 = vld [vmem:[#allocation4 + $0x78] sm:$0xf0]  ;;  %v6793_v50 = vor.u32 %v5517_v59, %v4452_v30  ;;  %v5513_v63 = vld [vmem:[#allocation4 + $0x38c] sm:$0xf]  ;;  %v6799_v57 = vor.u32 %v5445_v55, %v4164_v62  ;;  %v6802_v34 = vor.u32 %v5481_v6, %v4308_v36 }
 0x139   :  { %8057 = vst [vmem:[#allocation195_spill] sm:$0xff] %v6765_v24  ;;  %2389 = vmatpush.bf16.msra.mxu2 %v6774_v43  ;;  %v6790_v24 = vor.u32 %v5485_v29, %v4324_v35  ;;  %v5409_v29 = vld [vmem:[#allocation4 + $0x4c] sm:$0xf]  ;;  %v4020_v35 = vld [vmem:[#allocation4 + $0x58] sm:$0xf0] }
 0x13a   :  { %8058 = vst [vmem:[#allocation196_spill] sm:$0xff] %v6770_v19  ;;  %2402 = vmatpush.bf16.msra.mxu3 %v6777_v53  ;;  %v6796_v19 = vor.u32 %v5413_v2, %v4036_v46  ;;  %v5441_v59 = vld [vmem:[#allocation4 + $0x14c] sm:$0xf]  ;;  %v4148_v30 = vld [vmem:[#allocation4 + $0x158] sm:$0xf0]  ;;  %v6808_v55 = vor.u32 %v5409_v29, %v4020_v35  ;;  %v2085_v35 = vpop.f32.mrf.mxu2 }
 0x13b   :  { %8059 = vst [vmem:[#allocation197_spill] sm:$0xff] %v6774_v43  ;;  %2365 = vmatpush.bf16.msra.mxu0 %v6783_v41  ;;  %2378 = vmatpush.bf16.msra.mxu1 %v6787_v28  ;;  %v5477_v46 = vld [vmem:[#allocation4 + $0x26c] sm:$0xf]  ;;  %v4292_v2 = vld [vmem:[#allocation4 + $0x278] sm:$0xf0]  ;;  %v6811_v6 = vor.u32 %v5441_v59, %v4148_v30 }
 0x13c   :  { %8060 = vst [vmem:[#allocation198_spill] sm:$0xff] %v6777_v53  ;;  %v2061_v53 = vpop.f32.mrf.mxu0  ;;  %v5509_v62 = vld [vmem:[#allocation4 + $0x36c] sm:$0xf]  ;;  %v4420_v43 = vld [vmem:[#allocation4 + $0x378] sm:$0xf0] }
 0x13d   :  { %8062 = vst [vmem:[#allocation199_spill] sm:$0xff] %v6783_v41  ;;  %2390 = vmatpush.bf16.msra.mxu2 %v6790_v24  ;;  %v6805_v41 = vor.u32 %v5513_v63, %v4436_v48  ;;  %v5405_v36 = vld [vmem:[#allocation4 + $0x2c] sm:$0xf]  ;;  %v6814_v53 = vor.u32 %v5477_v46, %v4292_v2  ;;  %v4132_v48 = vld [vmem:[#allocation4 + $0x138] sm:$0xf0]  ;;  %v2086_v46 = vadd.f32 %v2085_v35, %v2073_v47  ;;  %v2098_v2 = vpop.f32.mrf.mxu3 }
 0x13e   :  { %8063 = vst [vmem:[#allocation200_spill] sm:$0xff] %v6787_v28  ;;  %2403 = vmatpush.bf16.msra.mxu3 %v6793_v50  ;;  %v2074_v28 = vpop.f32.mrf.mxu1  ;;  %v5437_v63 = vld [vmem:[#allocation4 + $0x12c] sm:$0xf]  ;;  %v4276_v29 = vld [vmem:[#allocation4 + $0x258] sm:$0xf0] }
 0x13f   :  { %8064 = vst [vmem:[#allocation201_spill] sm:$0xff] %v6790_v24  ;;  %2366 = vmatpush.bf16.msra.mxu0 %v6796_v19  ;;  %2379 = vmatpush.bf16.msra.mxu1 %v6799_v57  ;;  %v4004_v24 = vld [vmem:[#allocation4 + $0x38] sm:$0xf0]  ;;  %v5473_v28 = vld [vmem:[#allocation4 + $0x24c] sm:$0xf] }
 0x140   :  { %8065 = vst [vmem:[#allocation202_spill] sm:$0xff] %v6793_v50  ;;  %v5505_v59 = vld [vmem:[#allocation4 + $0x34c] sm:$0xf]  ;;  %v4404_v30 = vld [vmem:[#allocation4 + $0x358] sm:$0xf0] }
 0x141   :  { %8066 = vst [vmem:[#allocation203_spill] sm:$0xff] %v6796_v19  ;;  %2391 = vmatpush.bf16.msra.mxu2 %v6802_v34  ;;  %v6817_v19 = vor.u32 %v5509_v62, %v4420_v43  ;;  %v5401_v50 = vld [vmem:[#allocation4 + $0xc] sm:$0xf]  ;;  %v4116_v43 = vld [vmem:[#allocation4 + $0x118] sm:$0xf0]  ;;  %v6826_v62 = vor.u32 %v5473_v28, %v4276_v29  ;;  %v6829_v38 = vor.u32 %v5505_v59, %v4404_v30 }
 0x142   :  { %8067 = vst [vmem:[#allocation204_spill] sm:$0xff] %v6799_v57  ;;  %2404 = vmatpush.bf16.msra.mxu3 %v6805_v41  ;;  %v6820_v57 = vor.u32 %v5405_v36, %v4004_v24  ;;  %v4612_v22 = vld [vmem:[#allocation4 + $0x4f8] sm:$0xf0]  ;;  %v5589_v24 = vld [vmem:[#allocation4 + $0x5ec] sm:$0xf]  ;;  %v2099_v36 = vadd.f32 %v2098_v2, %v2086_v46 }
 0x143   :  { %8068 = vst [vmem:[#allocation205_spill] sm:$0xff] %v6802_v34  ;;  %2367 = vmatpush.bf16.msra.mxu0 %v6808_v55  ;;  %2380 = vmatpush.bf16.msra.mxu1 %v6811_v6  ;;  %v6823_v34 = vor.u32 %v5437_v63, %v4132_v48  ;;  %v4740_v47 = vld [vmem:[#allocation4 + $0x5f8] sm:$0xf0]  ;;  %v5469_v35 = vld [vmem:[#allocation4 + $0x22c] sm:$0xf] }
 0x144   :  { %8069 = vst [vmem:[#allocation206_spill] sm:$0xff] %v6805_v41  ;;  %v5433_v41 = vld [vmem:[#allocation4 + $0x10c] sm:$0xf]  ;;  %v2111_v40 = vpop.f32.mrf.mxu0  ;;  %v4260_v63 = vld [vmem:[#allocation4 + $0x238] sm:$0xf0]  ;;  %v6840_v59 = vor.u32 %v5589_v24, %v4740_v47 }
 0x145   :  { %8070 = vst [vmem:[#allocation207_spill] sm:$0xff] %v6808_v55  ;;  %2392 = vmatpush.bf16.msra.mxu2 %v6814_v53  ;;  %v5557_v55 = vld [vmem:[#allocation4 + $0x4ec] sm:$0xf]  ;;  %v4388_v28 = vld [vmem:[#allocation4 + $0x338] sm:$0xf0]  ;;  %v2112_v29 = vadd.f32 %v2111_v40, %v2099_v36  ;;  %v6835_v31 = vor.u32 %v5433_v41, %v4116_v43  ;;  %v6842_v30 = vor.u32 %v5469_v35, %v4260_v63  ;;  %v2100_v47 = vpop.f32.mrf.mxu3 }
 0x146   :  { %8071 = vst [vmem:[#allocation208_spill] sm:$0xff] %v6811_v6  ;;  %2405 = vmatpush.bf16.msra.mxu3 %v6817_v19  ;;  %v2124_v48 = vpop.f32.mrf.mxu1  ;;  %v6832_v6 = vor.u32 %v5401_v50, %v3988_v7  ;;  %v6837_v46 = vor.u32 %v5557_v55, %v4612_v22  ;;  %v5553_v2 = vld [vmem:[#allocation4 + $0x4cc] sm:$0xf]  ;;  %v4724_v7 = vld [vmem:[#allocation4 + $0x5d8] sm:$0xf0]  ;;  %v2087_v22 = vpop.f32.mrf.mxu2 }
 0x147   :  { %8072 = vst [vmem:[#allocation209_spill] sm:$0xff] %v6814_v53  ;;  %2368 = vmatpush.bf16.msra.mxu0 %v6820_v57  ;;  %v5501_v53 = vld [vmem:[#allocation4 + $0x32c] sm:$0xf]  ;;  %2381 = vmatpush.bf16.msra.mxu1 %v6823_v34  ;;  %v2125_v50 = vadd.f32 %v2124_v48, %v2112_v29  ;;  %v4244_v41 = vld [vmem:[#allocation4 + $0x218] sm:$0xf0] }
 0x148   :  { %8073 = vst [vmem:[#allocation210_spill] sm:$0xff] %v6817_v19  ;;  %v5585_v19 = vld [vmem:[#allocation4 + $0x5cc] sm:$0xf]  ;;  %v6845_v4 = vor.u32 %v5501_v53, %v4388_v28  ;;  %v4372_v55 = vld [vmem:[#allocation4 + $0x318] sm:$0xf0] }
 0x149   :  { %8074 = vst [vmem:[#allocation211_spill] sm:$0xff] %v6820_v57  ;;  %2393 = vmatpush.bf16.msra.mxu2 %v6826_v62  ;;  %v4596_v57 = vld [vmem:[#allocation4 + $0x4d8] sm:$0xf0]  ;;  %v5465_v40 = vld [vmem:[#allocation4 + $0x20c] sm:$0xf]  ;;  %v6854_v53 = vor.u32 %v5585_v19, %v4724_v7 }
 0x14a   :  { %8075 = vst [vmem:[#allocation212_spill] sm:$0xff] %v6835_v31  ;;  %2406 = vmatpush.bf16.msra.mxu3 %v6829_v38  ;;  %v5497_v43 = vld [vmem:[#allocation4 + $0x30c] sm:$0xf]  ;;  %v4868_v24 = vld [vmem:[#allocation4 + $0x6f8] sm:$0xf0]  ;;  %v6850_v35 = vor.u32 %v5553_v2, %v4596_v57  ;;  %v6856_v28 = vor.u32 %v5465_v40, %v4244_v41 }
 0x14b   :  { %8076 = vst [vmem:[#allocation213_spill] sm:$0xff] %v6837_v46  ;;  %2369 = vmatpush.bf16.msra.mxu0 %v6832_v6  ;;  %v5621_v36 = vld [vmem:[#allocation4 + $0x6ec] sm:$0xf]  ;;  %2382 = vmatpush.bf16.msra.mxu1 %v6835_v31  ;;  %v4996_v48 = vld [vmem:[#allocation4 + $0x7f8] sm:$0xf0] }
 0x14c   :  { %8077 = vst [vmem:[#allocation214_spill] sm:$0xff] %v6842_v30  ;;  %v5653_v63 = vld [vmem:[#allocation4 + $0x7ec] sm:$0xf]  ;;  %v4580_v22 = vld [vmem:[#allocation4 + $0x4b8] sm:$0xf0]  ;;  %v2113_v47 = vpop.f32.mrf.mxu0  ;;  %v6862_v57 = vor.u32 %v5621_v36, %v4868_v24 }
 0x14d   :  { %8078 = vst [vmem:[#allocation215_spill] sm:$0xff] %v6845_v4  ;;  %2394 = vmatpush.bf16.msra.mxu2 %v6842_v30  ;;  %v5549_v29 = vld [vmem:[#allocation4 + $0x4ac] sm:$0xf]  ;;  %v4708_v31 = vld [vmem:[#allocation4 + $0x5b8] sm:$0xf0]  ;;  %v6865_v19 = vor.u32 %v5653_v63, %v4996_v48 }
 0x14e   :  { %2407 = vmatpush.bf16.msra.mxu3 %v6845_v4  ;;  %2370 = vmatmul.bf16.vlgmr.msra.gmra.mxu0 %v6278_v11  ;;  %8080 = vst [vmem:[#allocation217_spill] sm:$0xff] %v6862_v57  ;;  %v5581_v2 = vld [vmem:[#allocation4 + $0x5ac] sm:$0xf]  ;;  %v2126_v30 = vpop.f32.mrf.mxu1  ;;  %v4852_v40 = vld [vmem:[#allocation4 + $0x6d8] sm:$0xf0]  ;;  %v6868_v41 = vor.u32 %v5549_v29, %v4580_v22  ;;  %v2137_v63 = vpop.f32.mrf.mxu2 }
 0x14f   :  { %2414 = vmatpush.bf16.msrb.mxu0 %v6837_v46  ;;  %2427 = vmatpush.bf16.msrb.mxu1 %v6840_v59  ;;  %v6860_v46 = vor.u32 %v5497_v43, %v4372_v55  ;;  %8081 = vst [vmem:[#allocation218_spill] sm:$0xff] %v6865_v19  ;;  %v5617_v7 = vld [vmem:[#allocation4 + $0x6cc] sm:$0xf]  ;;  %v4980_v11 = vld [vmem:[#allocation4 + $0x7d8] sm:$0xf0]  ;;  %v6872_v43 = vor.u32 %v5581_v2, %v4708_v31  ;;  %v2150_v31 = vpop.f32.mrf.mxu3 }
 0x150   :  { %2383 = vmatmul.bf16.vlgmr.msra.gmra.mxu1 %v6283_v42  ;;  %8082 = vst [vmem:[#allocation219_spill] sm:$0xff] %v6868_v41  ;;  %v5649_v4 = vld [vmem:[#allocation4 + $0x7cc] sm:$0xf]  ;;  %v4564_v36 = vld [vmem:[#allocation4 + $0x498] sm:$0xf0]  ;;  %v6876_v42 = vor.u32 %v5617_v7, %v4852_v40  ;;  %v2138_v47 = vadd.f32 %v2137_v63, %v2125_v50 }
 0x151   :  { %8079 = vst [vmem:[#allocation216_spill] sm:$0xff] %v6860_v46  ;;  %2395 = vmatpush.bf16.msra.mxu2 %v6856_v28  ;;  %v5545_v55 = vld [vmem:[#allocation4 + $0x48c] sm:$0xf]  ;;  %v4692_v24 = vld [vmem:[#allocation4 + $0x598] sm:$0xf0]  ;;  %v6879_v48 = vor.u32 %v5649_v4, %v4980_v11 }
 0x152   :  { %8083 = vst [vmem:[#allocation220_spill] sm:$0xff] %v6872_v43  ;;  %2408 = vmatpush.bf16.msra.mxu3 %v6860_v46  ;;  %v5577_v30 = vld [vmem:[#allocation4 + $0x58c] sm:$0xf]  ;;  %v4836_v22 = vld [vmem:[#allocation4 + $0x6b8] sm:$0xf0]  ;;  %v6890_v50 = vadd.f32 %v2150_v31, %v2138_v47 }
 0x153   :  { %2415 = vmatpush.bf16.msrb.mxu0 %v6850_v35  ;;  %2428 = vmatpush.bf16.msrb.mxu1 %v6854_v53  ;;  %8084 = vst [vmem:[#allocation221_spill] sm:$0xff] %v6876_v42  ;;  %v5613_v29 = vld [vmem:[#allocation4 + $0x6ac] sm:$0xf]  ;;  %v4964_v40 = vld [vmem:[#allocation4 + $0x7b8] sm:$0xf0]  ;;  %v6888_v4 = vor.u32 %v5577_v30, %v4692_v24  ;;  %v8090_v30 = vperm.slane %v6753_v26, 1 }
 0x154   :  { %8085 = vst [vmem:[#allocation222_spill] sm:$0xff] %v6879_v48  ;;  %2396 = vmatmul.bf16.vlgmr.msra.gmra.mxu2 %v6300_v23  ;;  %v5645_v7 = vld [vmem:[#allocation4 + $0x7ac] sm:$0xf]  ;;  %v6893_v23 = vor.u32 %v5613_v29, %v4836_v22  ;;  %v4676_v2 = vld [vmem:[#allocation4 + $0x578] sm:$0xf0] }
 0x155   :  { %2440 = vmatpush.bf16.msrb.mxu2 %v6862_v57  ;;  %v6884_v57 = vor.u32 %v5545_v55, %v4564_v36  ;;  %2409 = vmatmul.bf16.vlgmr.msra.gmra.mxu3 %v6307_v18  ;;  %v5541_v11 = vld [vmem:[#allocation4 + $0x46c] sm:$0xf]  ;;  %8087 = vst [vmem:[#allocation224_spill] sm:$0xff] %v6890_v50  ;;  %v2163_v55 = vpop.f32.mrf.mxu0  ;;  %v6896_v36 = vor.u32 %v5645_v7, %v4964_v40  ;;  %v4948_v29 = vld [vmem:[#allocation4 + $0x798] sm:$0xf0] }
 0x156   :  { %2453 = vmatpush.bf16.msrb.mxu3 %v6865_v19  ;;  %v4548_v19 = vld [vmem:[#allocation4 + $0x478] sm:$0xf0]  ;;  %8088 = vst [vmem:[#allocation225_spill] sm:$0xff] %v6893_v23  ;;  %v5573_v63 = vld [vmem:[#allocation4 + $0x56c] sm:$0xf]  ;;  %v2164_v24 = vadd.f32 %v2163_v55, %v8090_v30  ;;  %v2139_v30 = vpop.f32.mrf.mxu2 }
 0x157   :  { %2416 = vmatpush.bf16.msrb.mxu0 %v6868_v41  ;;  %8086 = vst [vmem:[#allocation223_spill] sm:$0xff] %v6884_v57  ;;  %2429 = vmatpush.bf16.msrb.mxu1 %v6872_v43  ;;  %v5609_v18 = vld [vmem:[#allocation4 + $0x68c] sm:$0xf]  ;;  %v4820_v41 = vld [vmem:[#allocation4 + $0x698] sm:$0xf0]  ;;  %v2176_v43 = vpop.f32.mrf.mxu1  ;;  %v6901_v47 = vor.u32 %v5541_v11, %v4548_v19  ;;  %v6904_v22 = vor.u32 %v5573_v63, %v4676_v2  ;;  %v2152_v46 = vpop.f32.mrf.mxu3 }
 0x158   :  { %8089 = vst [vmem:[#allocation226_spill] sm:$0xff] %v6896_v36  ;;  %v5641_v31 = vld [vmem:[#allocation4 + $0x78c] sm:$0xf]  ;;  %v2177_v7 = vadd.f32 %v2176_v43, %v2164_v24  ;;  %v6907_v40 = vor.u32 %v5609_v18, %v4820_v41  ;;  %v4660_v55 = vld [vmem:[#allocation4 + $0x558] sm:$0xf0] }
 0x159   :  { %2441 = vmatpush.bf16.msrb.mxu2 %v6876_v42  ;;  %8091 = vst [vmem:[#allocation227_spill] sm:$0xff] %v6901_v47  ;;  %v5537_v50 = vld [vmem:[#allocation4 + $0x44c] sm:$0xf]  ;;  %v6910_v19 = vor.u32 %v5641_v31, %v4948_v29  ;;  %v4932_v43 = vld [vmem:[#allocation4 + $0x778] sm:$0xf0] }
 0x15a   :  { %2454 = vmatpush.bf16.msrb.mxu3 %v6879_v48  ;;  %8092 = vst [vmem:[#allocation228_spill] sm:$0xff] %v6904_v22  ;;  %v4532_v48 = vld [vmem:[#allocation4 + $0x458] sm:$0xf0]  ;;  %v5569_v42 = vld [vmem:[#allocation4 + $0x54c] sm:$0xf] }
 0x15b   :  { %2417 = vmatpush.bf16.msrb.mxu0 %v6884_v57  ;;  %2430 = vmatpush.bf16.msrb.mxu1 %v6888_v4  ;;  %8093 = vst [vmem:[#allocation229_spill] sm:$0xff] %v6907_v40  ;;  %v5605_v11 = vld [vmem:[#allocation4 + $0x66c] sm:$0xf]  ;;  %v4804_v57 = vld [vmem:[#allocation4 + $0x678] sm:$0xf0]  ;;  %v6913_v2 = vor.u32 %v5537_v50, %v4532_v48  ;;  %v6916_v41 = vor.u32 %v5569_v42, %v4660_v55 }
 0x15c   :  { %8094 = vst [vmem:[#allocation230_spill] sm:$0xff] %v6910_v19  ;;  %v5637_v63 = vld [vmem:[#allocation4 + $0x76c] sm:$0xf]  ;;  %v4516_v24 = vld [vmem:[#allocation4 + $0x438] sm:$0xf0]  ;;  %v6919_v30 = vor.u32 %v5605_v11, %v4804_v57 }
 0x15d   :  { %2442 = vmatpush.bf16.msrb.mxu2 %v6893_v23  ;;  %8095 = vst [vmem:[#allocation231_spill] sm:$0xff] %v6913_v2  ;;  %v5533_v18 = vld [vmem:[#allocation4 + $0x42c] sm:$0xf]  ;;  %v4644_v29 = vld [vmem:[#allocation4 + $0x538] sm:$0xf0]  ;;  %v2165_v46 = vpop.f32.mrf.mxu0 }
 0x15e   :  { %2455 = vmatpush.bf16.msrb.mxu3 %v6896_v36  ;;  %8096 = vst [vmem:[#allocation232_spill] sm:$0xff] %v6916_v41  ;;  %v5565_v31 = vld [vmem:[#allocation4 + $0x52c] sm:$0xf]  ;;  %v4788_v50 = vld [vmem:[#allocation4 + $0x658] sm:$0xf0]  ;;  %v6925_v42 = vor.u32 %v5533_v18, %v4516_v24 }
 0x15f   :  { %2418 = vmatpush.bf16.msrb.mxu0 %v6901_v47  ;;  %2431 = vmatpush.bf16.msrb.mxu1 %v6904_v22  ;;  %v6922_v47 = vor.u32 %v5637_v63, %v4932_v43  ;;  %v5601_v48 = vld [vmem:[#allocation4 + $0x64c] sm:$0xf]  ;;  %v2178_v36 = vpop.f32.mrf.mxu1  ;;  %v4916_v22 = vld [vmem:[#allocation4 + $0x758] sm:$0xf0]  ;;  %v6928_v57 = vor.u32 %v5565_v31, %v4644_v29 }
 0x160   :  { %8098 = vst [vmem:[#allocation234_spill] sm:$0xff] %v6925_v42  ;;  %v5633_v55 = vld [vmem:[#allocation4 + $0x74c] sm:$0xf]  ;;  %v6931_v46 = vor.u32 %v5601_v48, %v4788_v50  ;;  %v4628_v43 = vld [vmem:[#allocation4 + $0x518] sm:$0xf0] }
 0x161   :  { %2443 = vmatpush.bf16.msrb.mxu2 %v6907_v40  ;;  %8097 = vst [vmem:[#allocation233_spill] sm:$0xff] %v6922_v47  ;;  %v5529_v11 = vld [vmem:[#allocation4 + $0x40c] sm:$0xf]  ;;  %v4500_v40 = vld [vmem:[#allocation4 + $0x418] sm:$0xf0]  ;;  %v6934_v36 = vor.u32 %v5633_v55, %v4916_v22 }
 0x162   :  { %2456 = vmatpush.bf16.msrb.mxu3 %v6910_v19  ;;  %v5561_v63 = vld [vmem:[#allocation4 + $0x50c] sm:$0xf]  ;;  %v4772_v24 = vld [vmem:[#allocation4 + $0x638] sm:$0xf0]  ;;  %v2202_v19 = vpop.f32.mrf.mxu3  ;;  %v6937_v31 = vor.u32 %v5529_v11, %v4500_v40 }
 0x163   :  { %2419 = vmatpush.bf16.msrb.mxu0 %v6913_v2  ;;  %2432 = vmatpush.bf16.msrb.mxu1 %v6916_v41  ;;  %v5597_v18 = vld [vmem:[#allocation4 + $0x62c] sm:$0xf]  ;;  %v2189_v2 = vpop.f32.mrf.mxu2  ;;  %v4900_v41 = vld [vmem:[#allocation4 + $0x738] sm:$0xf0]  ;;  %v6940_v48 = vor.u32 %v5561_v63, %v4628_v43  ;;  %v8113_v63 = vld [vmem:[#allocation26_spill] sm:$0xff] }
 0x164   :  { %v5629_v29 = vld [vmem:[#allocation4 + $0x72c] sm:$0xf]  ;;  %v2190_v23 = vadd.f32 %v2189_v2, %v2177_v7  ;;  %v6943_v50 = vor.u32 %v5597_v18, %v4772_v24  ;;  %v4884_v11 = vld [vmem:[#allocation4 + $0x718] sm:$0xf0]  ;;  %v7844_v18 = vperm.slane %v6753_v26, 2  ;;  %v8115_v24 = vld [vmem:[#allocation32_spill] sm:$0xff] }
 0x165   :  { %2444 = vmatpush.bf16.msrb.mxu2 %v6919_v30  ;;  %v6946_v55 = vor.u32 %v5629_v29, %v4900_v41  ;;  %v5625_v40 = vld [vmem:[#allocation4 + $0x70c] sm:$0xf]  ;;  %v8114_v43 = vld [vmem:[#allocation31_spill] sm:$0xff] }
 0x166   :  { %2457 = vmatpush.bf16.msrb.mxu3 %v6922_v47  ;;  %v2203_v22 = vadd.f32 %v2202_v19, %v2190_v23  ;;  %v5593_v47 = vld [vmem:[#allocation4 + $0x60c] sm:$0xf]  ;;  %v6957_v23 = vor.u32 %v5625_v40, %v4884_v11 }
 0x167   :  { %2420 = vmatpush.bf16.msrb.mxu0 %v6925_v42  ;;  %2433 = vmatpush.bf16.msrb.mxu1 %v6928_v57  ;;  %v4756_v42 = vld [vmem:[#allocation4 + $0x618] sm:$0xf0]  ;;  %v8112_v41 = vld [vmem:[#allocation25_spill] sm:$0xff] }
 0x168   :  { %v6953_v7 = vor.u32 %v5593_v47, %v4756_v42  ;;  %v8111_v47 = vld [vmem:[#allocation24_spill] sm:$0xff]  ;;  %v8116_v29 = vld [vmem:[#allocation29_spill] sm:$0xff] }
 0x169   :  { %2445 = vmatpush.bf16.msrb.mxu2 %v6931_v46 }
 0x16a   :  { %2458 = vmatpush.bf16.msrb.mxu3 %v6934_v36  ;;  %v2204_v2 = vpop.f32.mrf.mxu3 }
 0x16b   :  { %2421 = vmatpush.bf16.msrb.mxu0 %v6937_v31  ;;  %2434 = vmatpush.bf16.msrb.mxu1 %v6940_v48  ;;  %v2191_v19 = vpop.f32.mrf.mxu2  ;;  %v8118_v2 = vld [vmem:[#allocation35_spill] sm:$0xff] }
 0x16d   :  { %2446 = vmatpush.bf16.msrb.mxu2 %v6943_v50 }
 0x16e   :  { %2459 = vmatpush.bf16.msrb.mxu3 %v6946_v55  ;;  %2422 = vmatmul.bf16.vlgmr.msrb.gmra.mxu0 %v6340_v17 }
 0x16f   :  { %2474 = vmatpush.bf16.msra.mxu0 %v6056_v60  ;;  %2487 = vmatpush.bf16.msra.mxu1 %v6058_v61  ;;  %v2215_v60 = vpop.f32.mrf.mxu0 }
 0x170   :  { %2435 = vmatmul.bf16.vlgmr.msrb.gmra.mxu1 %v6347_v12  ;;  %v2216_v61 = vadd.f32 %v2215_v60, %v2203_v22  ;;  %v8117_v22 = vld [vmem:[#allocation30_spill] sm:$0xff]  ;;  %v8119_v60 = vld [vmem:[#allocation36_spill] sm:$0xff] }
 0x171   :  { %2447 = vmatpush.bf16.msrb.mxu2 %v6953_v7 }
 0x172   :  { %2460 = vmatpush.bf16.msrb.mxu3 %v6957_v23 }
 0x173   :  { %2475 = vmatpush.bf16.msra.mxu0 %v6073_v8  ;;  %2488 = vmatpush.bf16.msra.mxu1 %v6076_v9  ;;  %v2228_v8 = vpop.f32.mrf.mxu1 }
 0x174   :  { %2448 = vmatmul.bf16.vlgmr.msrb.gmra.mxu2 %v6370_v54  ;;  %v8108_v54 = vld [vmem:[#allocation27_spill] sm:$0xff] }
 0x175   :  { %2500 = vmatpush.bf16.msra.mxu2 %v6060_v1  ;;  %2461 = vmatmul.bf16.vlgmr.msrb.gmra.mxu3 %v6375_v52  ;;  %v2229_v1 = vadd.f32 %v2228_v8, %v2216_v61  ;;  %v8109_v52 = vld [vmem:[#allocation28_spill] sm:$0xff]  ;;  %v8120_v8 = vld [vmem:[#allocation33_spill] sm:$0xff] }
 0x176   :  { %2513 = vmatpush.bf16.msra.mxu3 %v6064_v3 }
 0x177   :  { %2476 = vmatpush.bf16.msra.mxu0 %v6085_v20  ;;  %2489 = vmatpush.bf16.msra.mxu1 %v6088_v21  ;;  %v2217_v3 = vpop.f32.mrf.mxu0  ;;  %v488_v21 = vmax.f32 %v6443_v5, 0.0  ;;  %v8110_v5 = vld [vmem:[#allocation23_spill] sm:$0xff] }
 0x178   :  { %v2254_v20 = vpop.f32.mrf.mxu3  ;;  %v8122_v3 = vld [vmem:[#allocation39_spill] sm:$0xff] }
 0x179   :  { %2501 = vmatpush.bf16.msra.mxu2 %v6079_v13  ;;  %v2241_v13 = vpop.f32.mrf.mxu2 }
 0x17a   :  { %2514 = vmatpush.bf16.msra.mxu3 %v6082_v15  ;;  %v2242_v15 = vadd.f32 %v2241_v13, %v2229_v1  ;;  %v8121_v1 = vld [vmem:[#allocation34_spill] sm:$0xff]  ;;  %v8124_v13 = vld [vmem:[#allocation37_spill] sm:$0xff] }
 0x17b   :  { %2477 = vmatpush.bf16.msra.mxu0 %v6097_v32  ;;  %2490 = vmatpush.bf16.msra.mxu1 %v6100_v33  ;;  %v2230_v9 = vpop.f32.mrf.mxu1  ;;  %v8099_v32 = vld [vmem:[#allocation16_spill] sm:$0xff]  ;;  %v8100_v33 = vld [vmem:[#allocation19_spill] sm:$0xff] }
 0x17c   :  { %v8123_v9 = vld [vmem:[#allocation40_spill] sm:$0xff] }
 0x17d   :  { %2502 = vmatpush.bf16.msra.mxu2 %v6091_v25  ;;  %v489_v25 = vmax.f32 %v6455_v16, 0.0 }
 0x17e   :  { %2515 = vmatpush.bf16.msra.mxu3 %v6094_v27  ;;  %v6988_v27 = vadd.f32 %v2254_v20, %v2242_v15  ;;  %v8125_v15 = vld [vmem:[#allocation38_spill] sm:$0xff] }
 0x17f   :  { %2478 = vmatpush.bf16.msra.mxu0 %v6109_v44  ;;  %2491 = vmatpush.bf16.msra.mxu1 %v6112_v45  ;;  %v8102_v44 = vld [vmem:[#allocation21_spill] sm:$0xff]  ;;  %v6997_v45 = vpack.c.bf16 %v489_v25, %v489_v25 }
 0x180   :  { %v2256_v17 = vpop.f32.mrf.mxu3  ;;  %v8126_v25 = vld [vmem:[#allocation41_spill] sm:$0xff] }
 0x181   :  { %2503 = vmatpush.bf16.msra.mxu2 %v6103_v37  ;;  %v6993_v37 = vpack.c.bf16 %v488_v21, %v488_v21 }
 0x182   :  { %2516 = vmatpush.bf16.msra.mxu3 %v6106_v39  ;;  %v8101_v39 = vld [vmem:[#allocation20_spill] sm:$0xff] }
 0x183   :  { %2479 = vmatpush.bf16.msra.mxu0 %v6127_v56  ;;  %2492 = vmatpush.bf16.msra.mxu1 %v6132_v58  ;;  %v8105_v56 = vld [vmem:[#allocation101_spill] sm:$0xff] }
 0x184   :  { %v490_v58 = vmax.f32 %v8105_v56, 0.0  ;;  %v8130_v56 = vld [vmem:[#allocation45_spill] sm:$0xff] }
 0x185   :  { %2504 = vmatpush.bf16.msra.mxu2 %v6115_v49  ;;  %v8103_v49 = vld [vmem:[#allocation22_spill] sm:$0xff] }
 0x186   :  { %2517 = vmatpush.bf16.msra.mxu3 %v6118_v51  ;;  %v8104_v51 = vld [vmem:[#allocation17_spill] sm:$0xff]  ;;  %v7009_v16 = vpack.c.bf16 %v490_v58, %v490_v58  ;;  %v8131_v58 = vld [vmem:[#allocation131_spill] sm:$0xff] }
 0x187   :  { %2480 = vmatpush.bf16.msra.mxu0 %v6141_v10  ;;  %2493 = vmatpush.bf16.msra.mxu1 %v6144_v14  ;;  %v8106_v10 = vld [vmem:[#allocation18_spill] sm:$0xff]  ;;  %v8107_v14 = vld [vmem:[#allocation104_spill] sm:$0xff] }
 0x188   :  { %v491_v12 = vmax.f32 %v8107_v14, 0.0  ;;  %v8133_v14 = vld [vmem:[#allocation134_spill] sm:$0xff] }
 0x189   :  { %2505 = vmatpush.bf16.msra.mxu2 %v6135_v0  ;;  %v2243_v0 = vpop.f32.mrf.mxu2 }
 0x18a   :  { %2518 = vmatpush.bf16.msra.mxu3 %v8099_v32  ;;  %v7013_v42 = vpack.c.bf16 %v491_v12, %v491_v12  ;;  %v8127_v32 = vld [vmem:[#allocation42_spill] sm:$0xff]  ;;  %v493_v12 = vmax.f32 %v8133_v14, 0.0  ;;  %v8157_v14 = vld [vmem:[#allocation68_spill] sm:$0xff] }
 0x18b   :  { %2481 = vmatpush.bf16.msra.mxu0 %v8100_v33  ;;  %2494 = vmatpush.bf16.msra.mxu1 %v8101_v39  ;;  %v2267_v40 = vpop.f32.mrf.mxu0  ;;  %v8128_v33 = vld [vmem:[#allocation43_spill] sm:$0xff]  ;;  %v8129_v39 = vld [vmem:[#allocation44_spill] sm:$0xff]  ;;  %v8132_v0 = vld [vmem:[#allocation46_spill] sm:$0xff] }
 0x18c   :  { %v2268_v11 = vadd.f32 %v2267_v40, %v7844_v18  ;;  %v5714_v18 = vld [vmem:[#allocation6 + $0x1d4] sm:$0xf] }
 0x18d   :  { %2506 = vmatpush.bf16.msra.mxu2 %v8104_v51  ;;  %v2280_v19 = vpop.f32.mrf.mxu1 }
 0x18e   :  { %2519 = vmatpush.bf16.msra.mxu3 %v8106_v10  ;;  %2482 = vmatmul.bf16.vlgmr.msra.gmra.mxu0 %v6993_v37  ;;  %v2281_v61 = vadd.f32 %v2280_v19, %v2268_v11  ;;  %v492_v10 = vmax.f32 %v8131_v58, 0.0  ;;  %v8142_v11 = vld [vmem:[#allocation52_spill] sm:$0xff]  ;;  %v8155_v58 = vld [vmem:[#allocation66_spill] sm:$0xff] }
 0x18f   :  { %2526 = vmatpush.bf16.msrb.mxu0 %v8102_v44  ;;  %2539 = vmatpush.bf16.msrb.mxu1 %v8103_v49 }
 0x190   :  { %2495 = vmatmul.bf16.vlgmr.msra.gmra.mxu1 %v6997_v45 }
 0x191   :  { %2507 = vmatpush.bf16.msra.mxu2 %v8110_v5  ;;  %v8136_v5 = vld [vmem:[#allocation49_spill] sm:$0xff] }
 0x192   :  { %2520 = vmatpush.bf16.msra.mxu3 %v8111_v47  ;;  %v7044_v47 = vpack.c.bf16 %v492_v10, %v492_v10 }
 0x193   :  { %2527 = vmatpush.bf16.msrb.mxu0 %v8108_v54  ;;  %2540 = vmatpush.bf16.msrb.mxu1 %v8109_v52  ;;  %v2269_v20 = vpop.f32.mrf.mxu0  ;;  %v8134_v54 = vld [vmem:[#allocation47_spill] sm:$0xff]  ;;  %v8135_v52 = vld [vmem:[#allocation48_spill] sm:$0xff] }
 0x194   :  { %2508 = vmatmul.bf16.vlgmr.msra.gmra.mxu2 %v7009_v16 }
 0x195   :  { %2552 = vmatpush.bf16.msrb.mxu2 %v8112_v41  ;;  %2521 = vmatmul.bf16.vlgmr.msra.gmra.mxu3 %v7013_v42  ;;  %v2282_v21 = vpop.f32.mrf.mxu1  ;;  %v8137_v41 = vld [vmem:[#allocation50_spill] sm:$0xff] }
 0x196   :  { %2565 = vmatpush.bf16.msrb.mxu3 %v8113_v63  ;;  %v8138_v63 = vld [vmem:[#allocation55_spill] sm:$0xff]  ;;  %v8149_v21 = vld [vmem:[#allocation60_spill] sm:$0xff] }
 0x197   :  { %2528 = vmatpush.bf16.msrb.mxu0 %v8114_v43  ;;  %2541 = vmatpush.bf16.msrb.mxu1 %v8115_v24  ;;  %v2293_v44 = vpop.f32.mrf.mxu2  ;;  %v7048_v43 = vpack.c.bf16 %v493_v12, %v493_v12  ;;  %v8139_v24 = vld [vmem:[#allocation56_spill] sm:$0xff]  ;;  %v8158_v12 = vld [vmem:[#allocation69_spill] sm:$0xff] }
 0x198   :  { %v2294_v49 = vadd.f32 %v2293_v44, %v2281_v61  ;;  %v2306_v51 = vpop.f32.mrf.mxu3 }
 0x199   :  { %2553 = vmatpush.bf16.msrb.mxu2 %v8116_v29  ;;  %v8140_v29 = vld [vmem:[#allocation51_spill] sm:$0xff] }
 0x19a   :  { %2566 = vmatpush.bf16.msrb.mxu3 %v8117_v22  ;;  %v2307_v17 = vadd.f32 %v2306_v51, %v2294_v49  ;;  %v8141_v22 = vld [vmem:[#allocation137_spill] sm:$0xff] }
 0x19b   :  { %2529 = vmatpush.bf16.msrb.mxu0 %v8118_v2  ;;  %2542 = vmatpush.bf16.msrb.mxu1 %v8119_v60  ;;  %v494_v40 = vmax.f32 %v8141_v22, 0.0  ;;  %v8143_v2 = vld [vmem:[#allocation140_spill] sm:$0xff] }
 0x19c   :  { %v495_v60 = vmax.f32 %v8143_v2, 0.0  ;;  %v8165_v22 = vld [vmem:[#allocation76_spill] sm:$0xff]  ;;  %v8166_v2 = vld [vmem:[#allocation77_spill] sm:$0xff] }
 0x19d   :  { %2554 = vmatpush.bf16.msrb.mxu2 %v8120_v8  ;;  %v8144_v8 = vld [vmem:[#allocation57_spill] sm:$0xff] }
 0x19e   :  { %2567 = vmatpush.bf16.msrb.mxu3 %v8121_v1  ;;  %v8145_v1 = vld [vmem:[#allocation58_spill] sm:$0xff]  ;;  %v7064_v20 = vpack.c.bf16 %v495_v60, %v495_v60 }
 0x19f   :  { %2530 = vmatpush.bf16.msrb.mxu0 %v8122_v3  ;;  %2543 = vmatpush.bf16.msrb.mxu1 %v8123_v9  ;;  %v2295_v19 = vpop.f32.mrf.mxu2  ;;  %v8146_v3 = vld [vmem:[#allocation53_spill] sm:$0xff]  ;;  %v7060_v9 = vpack.c.bf16 %v494_v40, %v494_v40  ;;  %v8167_v60 = vld [vmem:[#allocation78_spill] sm:$0xff] }
 0x1a0   :  { %v2308_v61 = vpop.f32.mrf.mxu3 }
 0x1a1   :  { %2555 = vmatpush.bf16.msrb.mxu2 %v8124_v13  ;;  %v8147_v13 = vld [vmem:[#allocation54_spill] sm:$0xff] }
 0x1a2   :  { %2568 = vmatpush.bf16.msrb.mxu3 %v8125_v15  ;;  %v8148_v15 = vld [vmem:[#allocation59_spill] sm:$0xff] }
 0x1a3   :  { %2531 = vmatpush.bf16.msrb.mxu0 %v8126_v25  ;;  %2544 = vmatpush.bf16.msrb.mxu1 %v8127_v32  ;;  %v8150_v25 = vld [vmem:[#allocation61_spill] sm:$0xff]  ;;  %v8151_v32 = vld [vmem:[#allocation62_spill] sm:$0xff] }
 0x1a5   :  { %2556 = vmatpush.bf16.msrb.mxu2 %v8128_v33  ;;  %v8152_v33 = vld [vmem:[#allocation63_spill] sm:$0xff] }
 0x1a6   :  { %2569 = vmatpush.bf16.msrb.mxu3 %v8129_v39  ;;  %v8153_v39 = vld [vmem:[#allocation64_spill] sm:$0xff] }
 0x1a7   :  { %2532 = vmatpush.bf16.msrb.mxu0 %v8130_v56  ;;  %2545 = vmatpush.bf16.msrb.mxu1 %v8132_v0  ;;  %v8154_v56 = vld [vmem:[#allocation65_spill] sm:$0xff]  ;;  %v8156_v0 = vld [vmem:[#allocation67_spill] sm:$0xff] }
 0x1a9   :  { %2557 = vmatpush.bf16.msrb.mxu2 %v8134_v54  ;;  %v8159_v54 = vld [vmem:[#allocation70_spill] sm:$0xff] }
 0x1aa   :  { %2570 = vmatpush.bf16.msrb.mxu3 %v8135_v52  ;;  %v8160_v52 = vld [vmem:[#allocation71_spill] sm:$0xff] }
 0x1ab   :  { %2533 = vmatpush.bf16.msrb.mxu0 %v8136_v5  ;;  %2546 = vmatpush.bf16.msrb.mxu1 %v8137_v41  ;;  %v2319_v44 = vpop.f32.mrf.mxu0  ;;  %v8161_v5 = vld [vmem:[#allocation72_spill] sm:$0xff] }
 0x1ac   :  { %v2320_v49 = vadd.f32 %v2319_v44, %v2307_v17  ;;  %v8176_v44 = vld [vmem:[#allocation87_spill] sm:$0xff] }
 0x1ad   :  { %2558 = vmatpush.bf16.msrb.mxu2 %v8140_v29  ;;  %v2332_v51 = vpop.f32.mrf.mxu1  ;;  %v8164_v29 = vld [vmem:[#allocation75_spill] sm:$0xff] }
 0x1ae   :  { %2571 = vmatpush.bf16.msrb.mxu3 %v8142_v11  ;;  %2534 = vmatmul.bf16.vlgmr.msrb.gmra.mxu0 %v7044_v47  ;;  %v2333_v10 = vadd.f32 %v2332_v51, %v2320_v49  ;;  %v8177_v49 = vld [vmem:[#allocation88_spill] sm:$0xff]  ;;  %v8178_v51 = vld [vmem:[#allocation89_spill] sm:$0xff] }
 0x1af   :  { %2578 = vmatpush.bf16.msra.mxu0 %v8138_v63  ;;  %2591 = vmatpush.bf16.msra.mxu1 %v8139_v24  ;;  %v8162_v63 = vld [vmem:[#allocation73_spill] sm:$0xff]  ;;  %v8163_v24 = vld [vmem:[#allocation74_spill] sm:$0xff] }
 0x1b0   :  { %2547 = vmatmul.bf16.vlgmr.msrb.gmra.mxu1 %v7048_v43 }
 0x1b1   :  { %2559 = vmatpush.bf16.msrb.mxu2 %v8146_v3  ;;  %v8170_v3 = vld [vmem:[#allocation81_spill] sm:$0xff] }
 0x1b2   :  { %2572 = vmatpush.bf16.msrb.mxu3 %v8147_v13  ;;  %v8171_v13 = vld [vmem:[#allocation82_spill] sm:$0xff] }
 0x1b3   :  { %2579 = vmatpush.bf16.msra.mxu0 %v8144_v8  ;;  %2592 = vmatpush.bf16.msra.mxu1 %v8145_v1  ;;  %v2321_v41 = vpop.f32.mrf.mxu0  ;;  %v8168_v8 = vld [vmem:[#allocation79_spill] sm:$0xff]  ;;  %v8169_v1 = vld [vmem:[#allocation80_spill] sm:$0xff] }
 0x1b4   :  { %2560 = vmatmul.bf16.vlgmr.msrb.gmra.mxu2 %v7060_v9 }
 0x1b5   :  { %2604 = vmatpush.bf16.msra.mxu2 %v8148_v15  ;;  %2573 = vmatmul.bf16.vlgmr.msrb.gmra.mxu3 %v7064_v20  ;;  %v2334_v17 = vpop.f32.mrf.mxu1  ;;  %v8172_v15 = vld [vmem:[#allocation83_spill] sm:$0xff] }
 0x1b6   :  { %2617 = vmatpush.bf16.msra.mxu3 %v8149_v21  ;;  %v8173_v21 = vld [vmem:[#allocation84_spill] sm:$0xff] }
 0x1b7   :  { %2580 = vmatpush.bf16.msra.mxu0 %v8150_v25  ;;  %2593 = vmatpush.bf16.msra.mxu1 %v8151_v32  ;;  %v2345_v40 = vpop.f32.mrf.mxu2  ;;  %v8174_v25 = vld [vmem:[#allocation85_spill] sm:$0xff]  ;;  %v8175_v32 = vld [vmem:[#allocation86_spill] sm:$0xff] }
 0x1b8   :  { %v2346_v11 = vadd.f32 %v2345_v40, %v2333_v10  ;;  %v2358_v19 = vpop.f32.mrf.mxu3  ;;  %v8181_v10 = vld [vmem:[#allocation92_spill] sm:$0xff] }
 0x1b9   :  { %2605 = vmatpush.bf16.msra.mxu2 %v8152_v33  ;;  %v8189_v40 = vld [vmem:[#allocation100_spill] sm:$0xff] }
 0x1ba   :  { %2618 = vmatpush.bf16.msra.mxu3 %v8153_v39  ;;  %v7087_v61 = vadd.f32 %v2358_v19, %v2346_v11  ;;  %v8190_v11 = vld [vmem:[#allocation102_spill] sm:$0xff]  ;;  %v8191_v19 = vld [vmem:[#allocation103_spill] sm:$0xff] }
 0x1bb   :  { %2581 = vmatpush.bf16.msra.mxu0 %v8154_v56  ;;  %2594 = vmatpush.bf16.msra.mxu1 %v8155_v58  ;;  %v8179_v56 = vld [vmem:[#allocation90_spill] sm:$0xff]  ;;  %v8180_v58 = vld [vmem:[#allocation91_spill] sm:$0xff] }
 0x1bd   :  { %2606 = vmatpush.bf16.msra.mxu2 %v8156_v0  ;;  %v8182_v0 = vld [vmem:[#allocation93_spill] sm:$0xff] }
 0x1be   :  { %2619 = vmatpush.bf16.msra.mxu3 %v8157_v14  ;;  %v7843_v14 = vperm.slane %v6753_v26, 3 }
 0x1bf   :  { %2582 = vmatpush.bf16.msra.mxu0 %v8158_v12  ;;  %2595 = vmatpush.bf16.msra.mxu1 %v8159_v54  ;;  %v2347_v33 = vpop.f32.mrf.mxu2  ;;  %v8183_v12 = vld [vmem:[#allocation94_spill] sm:$0xff]  ;;  %v8184_v54 = vld [vmem:[#allocation95_spill] sm:$0xff] }
 0x1c0   :  { %v2360_v39 = vpop.f32.mrf.mxu3 }
 0x1c1   :  { %2607 = vmatpush.bf16.msra.mxu2 %v8160_v52  ;;  %v8185_v52 = vld [vmem:[#allocation96_spill] sm:$0xff]  ;;  %v8198_v39 = vld [vmem:[#allocation111_spill] sm:$0xff] }
 0x1c2   :  { %2620 = vmatpush.bf16.msra.mxu3 %v8161_v5 }
 0x1c3   :  { %2583 = vmatpush.bf16.msra.mxu0 %v8162_v63  ;;  %2596 = vmatpush.bf16.msra.mxu1 %v8163_v24  ;;  %v8186_v63 = vld [vmem:[#allocation97_spill] sm:$0xff]  ;;  %v8187_v24 = vld [vmem:[#allocation98_spill] sm:$0xff] }
 0x1c5   :  { %2608 = vmatpush.bf16.msra.mxu2 %v8164_v29 }
 0x1c6   :  { %2621 = vmatpush.bf16.msra.mxu3 %v8165_v22  ;;  %v8188_v22 = vld [vmem:[#allocation99_spill] sm:$0xff] }
 0x1c7   :  { %2584 = vmatpush.bf16.msra.mxu0 %v8166_v2  ;;  %2597 = vmatpush.bf16.msra.mxu1 %v8167_v60  ;;  %v8192_v2 = vld [vmem:[#allocation105_spill] sm:$0xff]  ;;  %v8193_v60 = vld [vmem:[#allocation106_spill] sm:$0xff] }
 0x1c9   :  { %2609 = vmatpush.bf16.msra.mxu2 %v8168_v8 }
 0x1ca   :  { %2622 = vmatpush.bf16.msra.mxu3 %v8169_v1 }
 0x1cb   :  { %2585 = vmatpush.bf16.msra.mxu0 %v8170_v3  ;;  %2598 = vmatpush.bf16.msra.mxu1 %v8171_v13  ;;  %v2371_v5 = vpop.f32.mrf.mxu0  ;;  %v8194_v3 = vld [vmem:[#allocation107_spill] sm:$0xff]  ;;  %v8195_v13 = vld [vmem:[#allocation108_spill] sm:$0xff] }
 0x1cc   :  { %v2372_v41 = vadd.f32 %v2371_v5, %v7843_v14  ;;  %v5716_v14 = vld [vmem:[#allocation6 + $0x1e4] sm:$0xf] }
 0x1cd   :  { %2610 = vmatpush.bf16.msra.mxu2 %v8174_v25  ;;  %v2384_v17 = vpop.f32.mrf.mxu1 }
 0x1ce   :  { %2623 = vmatpush.bf16.msra.mxu3 %v8175_v32  ;;  %2586 = vmatmul.bf16.vlgmr.msra.gmra.mxu0 %v6993_v37  ;;  %v2385_v29 = vadd.f32 %v2384_v17, %v2372_v41  ;;  %v8208_v17 = vld [vmem:[#allocation121_spill] sm:$0xff] }
 0x1cf   :  { %2630 = vmatpush.bf16.msrb.mxu0 %v8172_v15  ;;  %2643 = vmatpush.bf16.msrb.mxu1 %v8173_v21  ;;  %v8196_v15 = vld [vmem:[#allocation109_spill] sm:$0xff]  ;;  %v8197_v21 = vld [vmem:[#allocation110_spill] sm:$0xff] }
 0x1d0   :  { %2599 = vmatmul.bf16.vlgmr.msra.gmra.mxu1 %v6997_v45 }
 0x1d1   :  { %2611 = vmatpush.bf16.msra.mxu2 %v8178_v51  ;;  %v8200_v51 = vld [vmem:[#allocation113_spill] sm:$0xff] }
 0x1d2   :  { %2624 = vmatpush.bf16.msra.mxu3 %v8179_v56  ;;  %v8201_v56 = vld [vmem:[#allocation114_spill] sm:$0xff] }
 0x1d3   :  { %2631 = vmatpush.bf16.msrb.mxu0 %v8176_v44  ;;  %2644 = vmatpush.bf16.msrb.mxu1 %v8177_v49  ;;  %v2373_v8 = vpop.f32.mrf.mxu0  ;;  %v8199_v44 = vld [vmem:[#allocation112_spill] sm:$0xff] }
 0x1d4   :  { %2612 = vmatmul.bf16.vlgmr.msra.gmra.mxu2 %v7009_v16 }
 0x1d5   :  { %2656 = vmatpush.bf16.msrb.mxu2 %v8180_v58  ;;  %2625 = vmatmul.bf16.vlgmr.msra.gmra.mxu3 %v7013_v42  ;;  %v2386_v1 = vpop.f32.mrf.mxu1  ;;  %v8202_v58 = vld [vmem:[#allocation115_spill] sm:$0xff] }
 0x1d6   :  { %2669 = vmatpush.bf16.msrb.mxu3 %v8181_v10  ;;  %v8203_v10 = vld [vmem:[#allocation116_spill] sm:$0xff] }
 0x1d7   :  { %2632 = vmatpush.bf16.msrb.mxu0 %v8182_v0  ;;  %2645 = vmatpush.bf16.msrb.mxu1 %v8183_v12  ;;  %v2397_v25 = vpop.f32.mrf.mxu2  ;;  %v8204_v0 = vld [vmem:[#allocation117_spill] sm:$0xff]  ;;  %v8205_v12 = vld [vmem:[#allocation118_spill] sm:$0xff] }
 0x1d8   :  { %v2398_v32 = vadd.f32 %v2397_v25, %v2385_v29  ;;  %v2410_v33 = vpop.f32.mrf.mxu3  ;;  %v8211_v29 = vld [vmem:[#allocation124_spill] sm:$0xff]  ;;  %v8220_v25 = vld [vmem:[#allocation135_spill] sm:$0xff] }
 0x1d9   :  { %2657 = vmatpush.bf16.msrb.mxu2 %v8184_v54  ;;  %v8206_v54 = vld [vmem:[#allocation119_spill] sm:$0xff] }
 0x1da   :  { %2670 = vmatpush.bf16.msrb.mxu3 %v8185_v52  ;;  %v2411_v49 = vadd.f32 %v2410_v33, %v2398_v32  ;;  %v8207_v52 = vld [vmem:[#allocation120_spill] sm:$0xff]  ;;  %v8222_v33 = vld [vmem:[#allocation138_spill] sm:$0xff] }
 0x1db   :  { %2633 = vmatpush.bf16.msrb.mxu0 %v8186_v63  ;;  %2646 = vmatpush.bf16.msrb.mxu1 %v8187_v24  ;;  %v8209_v63 = vld [vmem:[#allocation122_spill] sm:$0xff]  ;;  %v8210_v24 = vld [vmem:[#allocation123_spill] sm:$0xff]  ;;  %v8221_v32 = vld [vmem:[#allocation136_spill] sm:$0xff] }
 0x1dd   :  { %2658 = vmatpush.bf16.msrb.mxu2 %v8188_v22  ;;  %v8212_v22 = vld [vmem:[#allocation125_spill] sm:$0xff] }
 0x1de   :  { %2671 = vmatpush.bf16.msrb.mxu3 %v8189_v40  ;;  %v8213_v40 = vld [vmem:[#allocation126_spill] sm:$0xff] }
 0x1df   :  { %2634 = vmatpush.bf16.msrb.mxu0 %v8190_v11  ;;  %2647 = vmatpush.bf16.msrb.mxu1 %v8191_v19  ;;  %v2399_v5 = vpop.f32.mrf.mxu2  ;;  %v8214_v11 = vld [vmem:[#allocation127_spill] sm:$0xff]  ;;  %v8215_v19 = vld [vmem:[#allocation128_spill] sm:$0xff] }
 0x1e0   :  { %v2412_v41 = vpop.f32.mrf.mxu3 }
 0x1e1   :  { %2659 = vmatpush.bf16.msrb.mxu2 %v8192_v2  ;;  %v8216_v2 = vld [vmem:[#allocation129_spill] sm:$0xff]  ;;  %v8230_v41 = vld [vmem:[#allocation147_spill] sm:$0xff] }
 0x1e2   :  { %2672 = vmatpush.bf16.msrb.mxu3 %v8193_v60  ;;  %v8217_v60 = vld [vmem:[#allocation130_spill] sm:$0xff] }
 0x1e3   :  { %2635 = vmatpush.bf16.msrb.mxu0 %v8194_v3  ;;  %2648 = vmatpush.bf16.msrb.mxu1 %v8195_v13  ;;  %v8218_v13 = vld [vmem:[#allocation132_spill] sm:$0xff] }
 0x1e5   :  { %2660 = vmatpush.bf16.msrb.mxu2 %v8196_v15  ;;  %v8219_v15 = vld [vmem:[#allocation133_spill] sm:$0xff] }
 0x1e6   :  { %2673 = vmatpush.bf16.msrb.mxu3 %v8197_v21 }
 0x1e7   :  { %2636 = vmatpush.bf16.msrb.mxu0 %v8198_v39  ;;  %2649 = vmatpush.bf16.msrb.mxu1 %v8199_v44  ;;  %v8223_v39 = vld [vmem:[#allocation139_spill] sm:$0xff]  ;;  %v8224_v44 = vld [vmem:[#allocation141_spill] sm:$0xff] }
 0x1e9   :  { %2661 = vmatpush.bf16.msrb.mxu2 %v8200_v51  ;;  %v8225_v51 = vld [vmem:[#allocation142_spill] sm:$0xff] }
 0x1ea   :  { %2674 = vmatpush.bf16.msrb.mxu3 %v8201_v56 }
 0x1eb   :  { %2637 = vmatpush.bf16.msrb.mxu0 %v8202_v58  ;;  %2650 = vmatpush.bf16.msrb.mxu1 %v8203_v10  ;;  %v2423_v8 = vpop.f32.mrf.mxu0  ;;  %v8226_v58 = vld [vmem:[#allocation143_spill] sm:$0xff]  ;;  %v8227_v10 = vld [vmem:[#allocation144_spill] sm:$0xff] }
 0x1ec   :  { %v2424_v1 = vadd.f32 %v2423_v8, %v2411_v49 }
 0x1ed   :  { %2662 = vmatpush.bf16.msrb.mxu2 %v8206_v54  ;;  %v2436_v3 = vpop.f32.mrf.mxu1 }
 0x1ee   :  { %2675 = vmatpush.bf16.msrb.mxu3 %v8207_v52  ;;  %2638 = vmatmul.bf16.vlgmr.msrb.gmra.mxu0 %v7044_v47  ;;  %v2437_v21 = vadd.f32 %v2436_v3, %v2424_v1  ;;  %v8240_v3 = vld [vmem:[#allocation157_spill] sm:$0xff] }
 0x1ef   :  { %2682 = vmatpush.bf16.msra.mxu0 %v8204_v0  ;;  %2695 = vmatpush.bf16.msra.mxu1 %v8205_v12  ;;  %v8228_v0 = vld [vmem:[#allocation145_spill] sm:$0xff]  ;;  %v8229_v12 = vld [vmem:[#allocation146_spill] sm:$0xff] }
 0x1f0   :  { %2651 = vmatmul.bf16.vlgmr.msrb.gmra.mxu1 %v7048_v43 }
 0x1f1   :  { %2663 = vmatpush.bf16.msrb.mxu2 %v8210_v24  ;;  %v8232_v24 = vld [vmem:[#allocation149_spill] sm:$0xff] }
 0x1f2   :  { %2676 = vmatpush.bf16.msrb.mxu3 %v8211_v29  ;;  %v8233_v29 = vld [vmem:[#allocation150_spill] sm:$0xff] }
 0x1f3   :  { %2683 = vmatpush.bf16.msra.mxu0 %v8208_v17  ;;  %2696 = vmatpush.bf16.msra.mxu1 %v8209_v63  ;;  %v2425_v56 = vpop.f32.mrf.mxu0  ;;  %v8231_v17 = vld [vmem:[#allocation148_spill] sm:$0xff] }
 0x1f4   :  { %2664 = vmatmul.bf16.vlgmr.msrb.gmra.mxu2 %v7060_v9 }
 0x1f5   :  { %2708 = vmatpush.bf16.msra.mxu2 %v8212_v22  ;;  %2677 = vmatmul.bf16.vlgmr.msrb.gmra.mxu3 %v7064_v20  ;;  %v2438_v49 = vpop.f32.mrf.mxu1  ;;  %v8234_v22 = vld [vmem:[#allocation151_spill] sm:$0xff] }
 0x1f6   :  { %2721 = vmatpush.bf16.msra.mxu3 %v8213_v40  ;;  %v8235_v40 = vld [vmem:[#allocation152_spill] sm:$0xff]  ;;  %v8250_v49 = vperm.slane %v6753_v26, 0 }
 0x1f7   :  { %2684 = vmatpush.bf16.msra.mxu0 %v8214_v11  ;;  %2697 = vmatpush.bf16.msra.mxu1 %v8215_v19  ;;  %v2449_v54 = vpop.f32.mrf.mxu2  ;;  %v8236_v11 = vld [vmem:[#allocation153_spill] sm:$0xff]  ;;  %v8237_v19 = vld [vmem:[#allocation154_spill] sm:$0xff] }
 0x1f8   :  { %v2450_v52 = vadd.f32 %v2449_v54, %v2437_v21  ;;  %v2462_v5 = vpop.f32.mrf.mxu3  ;;  %v8243_v21 = vld [vmem:[#allocation160_spill] sm:$0xff] }
 0x1f9   :  { %2709 = vmatpush.bf16.msra.mxu2 %v8216_v2  ;;  %v8238_v2 = vld [vmem:[#allocation155_spill] sm:$0xff] }
 0x1fa   :  { %2722 = vmatpush.bf16.msra.mxu3 %v8217_v60  ;;  %v7164_v63 = vadd.f32 %v2462_v5, %v2450_v52  ;;  %v8239_v60 = vld [vmem:[#allocation156_spill] sm:$0xff]  ;;  %v8253_v52 = vld [vmem:[#allocation169_spill] sm:$0xff]  ;;  %v8254_v5 = vld [vmem:[#allocation170_spill] sm:$0xff] }
 0x1fb   :  { %2685 = vmatpush.bf16.msra.mxu0 %v8218_v13  ;;  %2698 = vmatpush.bf16.msra.mxu1 %v8219_v15  ;;  %v8241_v13 = vld [vmem:[#allocation158_spill] sm:$0xff]  ;;  %v8242_v15 = vld [vmem:[#allocation159_spill] sm:$0xff] }
 0x1fd   :  { %2710 = vmatpush.bf16.msra.mxu2 %v8220_v25  ;;  %v8244_v25 = vld [vmem:[#allocation161_spill] sm:$0xff] }
 0x1fe   :  { %2723 = vmatpush.bf16.msra.mxu3 %v8221_v32  ;;  %v8245_v32 = vld [vmem:[#allocation162_spill] sm:$0xff] }
 0x1ff   :  { %2686 = vmatpush.bf16.msra.mxu0 %v8222_v33  ;;  %2699 = vmatpush.bf16.msra.mxu1 %v8223_v39  ;;  %v2451_v8 = vpop.f32.mrf.mxu2  ;;  %v8246_v33 = vld [vmem:[#allocation163_spill] sm:$0xff]  ;;  %v8247_v39 = vld [vmem:[#allocation164_spill] sm:$0xff] }
 0x200   :  { %v2464_v1 = vpop.f32.mrf.mxu3 }
 0x201   :  { %2711 = vmatpush.bf16.msra.mxu2 %v8224_v44  ;;  %v8248_v44 = vld [vmem:[#allocation165_spill] sm:$0xff] }
 0x202   :  { %2724 = vmatpush.bf16.msra.mxu3 %v8225_v51  ;;  %v8249_v51 = vld [vmem:[#allocation166_spill] sm:$0xff] }
 0x203   :  { %2687 = vmatpush.bf16.msra.mxu0 %v8226_v58  ;;  %2700 = vmatpush.bf16.msra.mxu1 %v8227_v10 }
 0x205   :  { %2712 = vmatpush.bf16.msra.mxu2 %v8228_v0  ;;  %v8251_v0 = vld [vmem:[#allocation167_spill] sm:$0xff] }
 0x206   :  { %2725 = vmatpush.bf16.msra.mxu3 %v8229_v12  ;;  %v8252_v12 = vld [vmem:[#allocation168_spill] sm:$0xff] }
 0x207   :  { %2688 = vmatpush.bf16.msra.mxu0 %v8230_v41  ;;  %2701 = vmatpush.bf16.msra.mxu1 %v8231_v17  ;;  %v8255_v41 = vld [vmem:[#allocation171_spill] sm:$0xff]  ;;  %v8256_v17 = vld [vmem:[#allocation172_spill] sm:$0xff] }
 0x209   :  { %2713 = vmatpush.bf16.msra.mxu2 %v8232_v24  ;;  %v8257_v24 = vld [vmem:[#allocation173_spill] sm:$0xff] }
 0x20a   :  { %2726 = vmatpush.bf16.msra.mxu3 %v8233_v29  ;;  %v8258_v29 = vld [vmem:[#allocation174_spill] sm:$0xff] }
 0x20b   :  { %2689 = vmatpush.bf16.msra.mxu0 %v8234_v22  ;;  %2702 = vmatpush.bf16.msra.mxu1 %v8235_v40  ;;  %v2483_v56 = vpop.f32.mrf.mxu0 }
 0x20c   :  { %v2484_v58 = vadd.f32 %v2483_v56, %v8250_v49  ;;  %v8271_v56 = vld [vmem:[#allocation187_spill] sm:$0xff]  ;;  %v8272_v49 = vld [vmem:[#allocation188_spill] sm:$0xff] }
 0x20d   :  { %2714 = vmatpush.bf16.msra.mxu2 %v8238_v2  ;;  %v2496_v10 = vpop.f32.mrf.mxu1  ;;  %v8261_v2 = vld [vmem:[#allocation177_spill] sm:$0xff] }
 0x20e   :  { %2727 = vmatpush.bf16.msra.mxu3 %v8239_v60  ;;  %2690 = vmatmul.bf16.vlgmr.msra.gmra.mxu0 %v6993_v37  ;;  %v2497_v54 = vadd.f32 %v2496_v10, %v2484_v58  ;;  %v8262_v60 = vld [vmem:[#allocation178_spill] sm:$0xff] }
 0x20f   :  { %2734 = vmatpush.bf16.msrb.mxu0 %v8236_v11  ;;  %2747 = vmatpush.bf16.msrb.mxu1 %v8237_v19  ;;  %v8259_v11 = vld [vmem:[#allocation175_spill] sm:$0xff]  ;;  %v8260_v19 = vld [vmem:[#allocation176_spill] sm:$0xff] }
 0x210   :  { %2703 = vmatmul.bf16.vlgmr.msra.gmra.mxu1 %v6997_v45 }
 0x211   :  { %2715 = vmatpush.bf16.msra.mxu2 %v8242_v15  ;;  %v8264_v15 = vld [vmem:[#allocation180_spill] sm:$0xff] }
 0x212   :  { %2728 = vmatpush.bf16.msra.mxu3 %v8243_v21 }
 0x213   :  { %2735 = vmatpush.bf16.msrb.mxu0 %v8240_v3  ;;  %2748 = vmatpush.bf16.msrb.mxu1 %v8241_v13  ;;  %v2485_v22 = vpop.f32.mrf.mxu0  ;;  %v8263_v13 = vld [vmem:[#allocation179_spill] sm:$0xff] }
 0x214   :  { %2716 = vmatmul.bf16.vlgmr.msra.gmra.mxu2 %v7009_v16  ;;  %v8282_v22 = vld [vmem:[#allocation198_spill] sm:$0xff] }
 0x215   :  { %2760 = vmatpush.bf16.msrb.mxu2 %v8244_v25  ;;  %2729 = vmatmul.bf16.vlgmr.msra.gmra.mxu3 %v7013_v42  ;;  %v2498_v40 = vpop.f32.mrf.mxu1  ;;  %v8265_v25 = vld [vmem:[#allocation181_spill] sm:$0xff] }
 0x216   :  { %2773 = vmatpush.bf16.msrb.mxu3 %v8245_v32  ;;  %v8266_v32 = vld [vmem:[#allocation182_spill] sm:$0xff] }
 0x217   :  { %2736 = vmatpush.bf16.msrb.mxu0 %v8246_v33  ;;  %2749 = vmatpush.bf16.msrb.mxu1 %v8247_v39  ;;  %v2509_v8 = vpop.f32.mrf.mxu2  ;;  %v8267_v33 = vld [vmem:[#allocation183_spill] sm:$0xff]  ;;  %v8268_v39 = vld [vmem:[#allocation184_spill] sm:$0xff] }
 0x218   :  { %v2510_v1 = vadd.f32 %v2509_v8, %v2497_v54  ;;  %v2522_v3 = vpop.f32.mrf.mxu3  ;;  %v8275_v54 = vld [vmem:[#allocation191_spill] sm:$0xff] }
 0x219   :  { %2761 = vmatpush.bf16.msrb.mxu2 %v8248_v44  ;;  %v8269_v44 = vld [vmem:[#allocation185_spill] sm:$0xff] }
 0x21a   :  { %2774 = vmatpush.bf16.msrb.mxu3 %v8249_v51  ;;  %v2523_v21 = vadd.f32 %v2522_v3, %v2510_v1  ;;  %v8270_v51 = vld [vmem:[#allocation186_spill] sm:$0xff]  ;;  %v8285_v1 = vld [vmem:[#allocation201_spill] sm:$0xff] }
 0x21b   :  { %2737 = vmatpush.bf16.msrb.mxu0 %v8251_v0  ;;  %2750 = vmatpush.bf16.msrb.mxu1 %v8252_v12  ;;  %v8273_v0 = vld [vmem:[#allocation189_spill] sm:$0xff]  ;;  %v8274_v12 = vld [vmem:[#allocation190_spill] sm:$0xff] }
 0x21c   :  { %v8286_v3 = vld [vmem:[#allocation202_spill] sm:$0xff] }
 0x21d   :  { %2762 = vmatpush.bf16.msrb.mxu2 %v8253_v52  ;;  %v8276_v52 = vld [vmem:[#allocation192_spill] sm:$0xff] }
 0x21e   :  { %2775 = vmatpush.bf16.msrb.mxu3 %v8254_v5  ;;  %v8277_v5 = vld [vmem:[#allocation193_spill] sm:$0xff] }
 0x21f   :  { %2738 = vmatpush.bf16.msrb.mxu0 %v8255_v41  ;;  %2751 = vmatpush.bf16.msrb.mxu1 %v8256_v17  ;;  %v2511_v58 = vpop.f32.mrf.mxu2  ;;  %v8278_v41 = vld [vmem:[#allocation194_spill] sm:$0xff]  ;;  %v8279_v17 = vld [vmem:[#allocation195_spill] sm:$0xff] }
 0x220   :  { %v2524_v10 = vpop.f32.mrf.mxu3 }
 0x221   :  { %2763 = vmatpush.bf16.msrb.mxu2 %v8257_v24  ;;  %v8280_v24 = vld [vmem:[#allocation196_spill] sm:$0xff] }
 0x222   :  { %2776 = vmatpush.bf16.msrb.mxu3 %v8258_v29  ;;  %v8281_v29 = vld [vmem:[#allocation197_spill] sm:$0xff] }
 0x223   :  { %2739 = vmatpush.bf16.msrb.mxu0 %v8259_v11  ;;  %2752 = vmatpush.bf16.msrb.mxu1 %v8260_v19 }
 0x225   :  { %2764 = vmatpush.bf16.msrb.mxu2 %v8261_v2  ;;  %v8283_v2 = vld [vmem:[#allocation199_spill] sm:$0xff] }
 0x226   :  { %2777 = vmatpush.bf16.msrb.mxu3 %v8262_v60  ;;  %v8284_v60 = vld [vmem:[#allocation200_spill] sm:$0xff] }
 0x227   :  { %2740 = vmatpush.bf16.msrb.mxu0 %v8263_v13  ;;  %2753 = vmatpush.bf16.msrb.mxu1 %v8264_v15  ;;  %v8287_v13 = vld [vmem:[#allocation203_spill] sm:$0xff]  ;;  %v8288_v15 = vld [vmem:[#allocation204_spill] sm:$0xff] }
 0x229   :  { %2765 = vmatpush.bf16.msrb.mxu2 %v8265_v25  ;;  %v8289_v25 = vld [vmem:[#allocation205_spill] sm:$0xff] }
 0x22a   :  { %2778 = vmatpush.bf16.msrb.mxu3 %v8266_v32  ;;  %v8290_v32 = vld [vmem:[#allocation206_spill] sm:$0xff] }
 0x22b   :  { %2741 = vmatpush.bf16.msrb.mxu0 %v8267_v33  ;;  %2754 = vmatpush.bf16.msrb.mxu1 %v8268_v39  ;;  %v2535_v40 = vpop.f32.mrf.mxu0  ;;  %v8291_v39 = vld [vmem:[#allocation207_spill] sm:$0xff] }
 0x22c   :  { %v2536_v11 = vadd.f32 %v2535_v40, %v2523_v21  ;;  %v8309_v40 = vld [vmem:[#allocation225_spill] sm:$0xff] }
 0x22d   :  { %2766 = vmatpush.bf16.msrb.mxu2 %v8271_v56  ;;  %v2548_v19 = vpop.f32.mrf.mxu1  ;;  %v8294_v56 = vld [vmem:[#allocation210_spill] sm:$0xff] }
 0x22e   :  { %2779 = vmatpush.bf16.msrb.mxu3 %v8272_v49  ;;  %2742 = vmatmul.bf16.vlgmr.msrb.gmra.mxu0 %v7044_v47  ;;  %v2549_v8 = vadd.f32 %v2548_v19, %v2536_v11  ;;  %v8310_v11 = vld [vmem:[#allocation226_spill] sm:$0xff]  ;;  %v8312_v19 = vld [vmem:[#allocation228_spill] sm:$0xff] }
 0x22f   :  { %2786 = vmatpush.bf16.msra.mxu0 %v8269_v44  ;;  %2799 = vmatpush.bf16.msra.mxu1 %v8270_v51  ;;  %v8292_v44 = vld [vmem:[#allocation208_spill] sm:$0xff]  ;;  %v8293_v51 = vld [vmem:[#allocation209_spill] sm:$0xff] }
 0x230   :  { %2755 = vmatmul.bf16.vlgmr.msrb.gmra.mxu1 %v7048_v43 }
 0x231   :  { %2767 = vmatpush.bf16.msrb.mxu2 %v8275_v54  ;;  %v8296_v54 = vld [vmem:[#allocation212_spill] sm:$0xff] }
 0x232   :  { %2780 = vmatpush.bf16.msrb.mxu3 %v8276_v52  ;;  %v8297_v52 = vld [vmem:[#allocation213_spill] sm:$0xff] }
 0x233   :  { %2787 = vmatpush.bf16.msra.mxu0 %v8273_v0  ;;  %2800 = vmatpush.bf16.msra.mxu1 %v8274_v12  ;;  %v2537_v33 = vpop.f32.mrf.mxu0  ;;  %v8295_v0 = vld [vmem:[#allocation211_spill] sm:$0xff] }
 0x234   :  { %2768 = vmatmul.bf16.vlgmr.msrb.gmra.mxu2 %v7060_v9  ;;  %v5122_v33 = vld [vmem:[#allocation6 + $0xf0] sm:$0xf] }
 0x235   :  { %2812 = vmatpush.bf16.msra.mxu2 %v8277_v5  ;;  %2781 = vmatmul.bf16.vlgmr.msrb.gmra.mxu3 %v7064_v20  ;;  %v2550_v21 = vpop.f32.mrf.mxu1  ;;  %v8298_v5 = vld [vmem:[#allocation214_spill] sm:$0xff] }
 0x236   :  { %2825 = vmatpush.bf16.msra.mxu3 %v8278_v41  ;;  %v8299_v41 = vld [vmem:[#allocation215_spill] sm:$0xff] }
 0x237   :  { %2788 = vmatpush.bf16.msra.mxu0 %v8279_v17  ;;  %2801 = vmatpush.bf16.msra.mxu1 %v8280_v24  ;;  %v2561_v49 = vpop.f32.mrf.mxu2  ;;  %v5687_v21 = vld [vmem:[#allocation6 + $0xf4] sm:$0xf0] }
 0x238   :  { %v2562_v58 = vadd.f32 %v2561_v49, %v2549_v8  ;;  %v2574_v10 = vpop.f32.mrf.mxu3 }
 0x239   :  { %2813 = vmatpush.bf16.msra.mxu2 %v8281_v29 }
 0x23a   :  { %2826 = vmatpush.bf16.msra.mxu3 %v8282_v22  ;;  %v7240_v12 = vadd.f32 %v2574_v10, %v2562_v58  ;;  %v8308_v22 = vld [vmem:[#allocation223_spill] sm:$0xff]  ;;  %v5050_v58 = vld [vmem:[#allocation6 + $0x60] sm:$0xf]  ;;  %v5669_v10 = vld [vmem:[#allocation6 + $0x64] sm:$0xf0] }
 0x23b   :  { %2789 = vmatpush.bf16.msra.mxu0 %v8283_v2  ;;  %2802 = vmatpush.bf16.msra.mxu1 %v8284_v60  ;;  %v8313_v2 = vld [vmem:[#allocation229_spill] sm:$0xff]  ;;  %v8314_v60 = vld [vmem:[#allocation230_spill] sm:$0xff] }
 0x23d   :  { %2814 = vmatpush.bf16.msra.mxu2 %v8285_v1 }
 0x23e   :  { %2827 = vmatpush.bf16.msra.mxu3 %v8286_v3  ;;  %v8315_v3 = vld [vmem:[#allocation231_spill] sm:$0xff] }
 0x23f   :  { %2790 = vmatpush.bf16.msra.mxu0 %v8287_v13  ;;  %2803 = vmatpush.bf16.msra.mxu1 %v8288_v15  ;;  %v2563_v17 = vpop.f32.mrf.mxu2  ;;  %v8316_v13 = vld [vmem:[#allocation232_spill] sm:$0xff]  ;;  %v5671_v15 = vld [vmem:[#allocation6 + $0x74] sm:$0xf0] }
 0x241   :  { %2815 = vmatpush.bf16.msra.mxu2 %v8289_v25  ;;  %v8317_v25 = vld [vmem:[#allocation233_spill] sm:$0xff] }
 0x242   :  { %2828 = vmatpush.bf16.msra.mxu3 %v8290_v32 }
 0x243   :  { %2791 = vmatpush.bf16.msra.mxu0 %v8291_v39  ;;  %2804 = vmatpush.bf16.msra.mxu1 %v8292_v44 }
 0x245   :  { %2816 = vmatpush.bf16.msra.mxu2 %v8293_v51  ;;  %v8318_v51 = vld [vmem:[#allocation234_spill] sm:$0xff] }
 0x246   :  { %2829 = vmatpush.bf16.msra.mxu3 %v8294_v56 }
 0x247   :  { %2792 = vmatpush.bf16.msra.mxu0 %v8295_v0  ;;  %2805 = vmatpush.bf16.msra.mxu1 %v6823_v34  ;;  %v2576_v34 = vpop.f32.mrf.mxu3  ;;  %v5114_v0 = vld [vmem:[#allocation6 + $0xe0] sm:$0xf] }
 0x248   :  { %v5667_v34 = vld [vmem:[#allocation6 + $0x54] sm:$0xf0] }
 0x249   :  { %2817 = vmatpush.bf16.msra.mxu2 %v6826_v62  ;;  %v8302_v62 = vld [vmem:[#allocation218_spill] sm:$0xff] }
 0x24a   :  { %2830 = vmatpush.bf16.msra.mxu3 %v6829_v38  ;;  %v8300_v38 = vld [vmem:[#allocation216_spill] sm:$0xff] }
 0x24b   :  { %2793 = vmatpush.bf16.msra.mxu0 %v6832_v6  ;;  %2806 = vmatpush.bf16.msra.mxu1 %v8296_v54  ;;  %v8301_v6 = vld [vmem:[#allocation217_spill] sm:$0xff] }
 0x24c   :  { %v5685_v54 = vld [vmem:[#allocation6 + $0xe4] sm:$0xf0] }
 0x24d   :  { %2818 = vmatpush.bf16.msra.mxu2 %v8298_v5  ;;  %v2600_v29 = vpop.f32.mrf.mxu1  ;;  %v5703_v5 = vld [vmem:[#allocation6 + $0x174] sm:$0xf0]  ;;  %v7295_v17 = vor.u32 %v5685_v54, %v5114_v0  ;;  %v5154_v54 = vld [vmem:[#allocation6 + $0x130] sm:$0xf] }
 0x24e   :  { %2831 = vmatpush.bf16.msra.mxu3 %v8299_v41  ;;  %2794 = vmatmul.bf16.vlgmr.msra.gmra.mxu0 %v6993_v37  ;;  %v8304_v37 = vld [vmem:[#allocation220_spill] sm:$0xff]  ;;  %v5250_v41 = vld [vmem:[#allocation6 + $0x1f0] sm:$0xf] }
 0x24f   :  { %2838 = vmatpush.bf16.msrb.mxu0 %v8297_v52  ;;  %2851 = vmatpush.bf16.msrb.mxu1 %v6840_v59  ;;  %v8303_v59 = vld [vmem:[#allocation219_spill] sm:$0xff]  ;;  %v5186_v52 = vld [vmem:[#allocation6 + $0x170] sm:$0xf] }
 0x250   :  { %2807 = vmatmul.bf16.vlgmr.msra.gmra.mxu1 %v6997_v45  ;;  %v8305_v45 = vld [vmem:[#allocation221_spill] sm:$0xff] }
 0x251   :  { %2819 = vmatpush.bf16.msra.mxu2 %v6856_v28  ;;  %v8307_v28 = vperm.slane %v6753_v26, 1 }
 0x252   :  { %2832 = vmatpush.bf16.msra.mxu3 %v8300_v38  ;;  %v5106_v38 = vld [vmem:[#allocation6 + $0xd0] sm:$0xf] }
 0x253   :  { %2839 = vmatpush.bf16.msrb.mxu0 %v6850_v35  ;;  %2852 = vmatpush.bf16.msrb.mxu1 %v6854_v53  ;;  %v8306_v35 = vld [vmem:[#allocation222_spill] sm:$0xff]  ;;  %v2587_v53 = vpop.f32.mrf.mxu0 }
 0x254   :  { %2820 = vmatmul.bf16.vlgmr.msra.gmra.mxu2 %v7009_v16  ;;  %v2588_v24 = vadd.f32 %v2587_v53, %v8307_v28  ;;  %v5034_v53 = vld [vmem:[#allocation6 + $0x40] sm:$0xf]  ;;  %v5665_v28 = vld [vmem:[#allocation6 + $0x44] sm:$0xf0] }
 0x255   :  { %2864 = vmatpush.bf16.msrb.mxu2 %v8301_v6  ;;  %2833 = vmatmul.bf16.vlgmr.msra.gmra.mxu3 %v7013_v42  ;;  %v8311_v42 = vld [vmem:[#allocation227_spill] sm:$0xff]  ;;  %v2602_v1 = vpop.f32.mrf.mxu1 }
 0x256   :  { %2877 = vmatpush.bf16.msrb.mxu3 %v8302_v62  ;;  %v2601_v16 = vadd.f32 %v2600_v29, %v2588_v24  ;;  %v5683_v6 = vld [vmem:[#allocation6 + $0xd4] sm:$0xf0]  ;;  %v5098_v24 = vld [vmem:[#allocation6 + $0xc0] sm:$0xf]  ;;  %v5681_v29 = vld [vmem:[#allocation6 + $0xc4] sm:$0xf0] }
 0x257   :  { %2840 = vmatpush.bf16.msrb.mxu0 %v8303_v59  ;;  %2853 = vmatpush.bf16.msrb.mxu1 %v8304_v37  ;;  %v2613_v32 = vpop.f32.mrf.mxu2  ;;  %v5178_v37 = vld [vmem:[#allocation6 + $0x160] sm:$0xf] }
 0x258   :  { %v2614_v39 = vadd.f32 %v2613_v32, %v2601_v16  ;;  %v2626_v44 = vpop.f32.mrf.mxu3  ;;  %v5170_v16 = vld [vmem:[#allocation6 + $0x150] sm:$0xf]  ;;  %v5226_v32 = vld [vmem:[#allocation6 + $0x1c0] sm:$0xf] }
 0x259   :  { %2865 = vmatpush.bf16.msrb.mxu2 %v8305_v45 }
 0x25a   :  { %2878 = vmatpush.bf16.msrb.mxu3 %v8306_v35  ;;  %v7282_v49 = vadd.f32 %v2626_v44, %v2614_v39  ;;  %v5242_v35 = vld [vmem:[#allocation6 + $0x1e0] sm:$0xf]  ;;  %v5661_v44 = vld [vmem:[#allocation6 + $0x24] sm:$0xf0] }
 0x25b   :  { %2841 = vmatpush.bf16.msrb.mxu0 %v8308_v22  ;;  %2854 = vmatpush.bf16.msrb.mxu1 %v6888_v4  ;;  %v2589_v8 = vpop.f32.mrf.mxu0  ;;  %v5058_v4 = vld [vmem:[#allocation6 + $0x70] sm:$0xf]  ;;  %v5018_v39 = vld [vmem:[#allocation6 + $0x20] sm:$0xf] }
 0x25c   :  { %v7280_v56 = vor.u32 %v5671_v15, %v5058_v4  ;;  %v5090_v8 = vld [vmem:[#allocation6 + $0xb0] sm:$0xf]  ;;  %v5697_v4 = vld [vmem:[#allocation6 + $0x144] sm:$0xf0] }
 0x25d   :  { %2866 = vmatpush.bf16.msrb.mxu2 %v8309_v40  ;;  %v5699_v40 = vld [vmem:[#allocation6 + $0x154] sm:$0xf0] }
 0x25e   :  { %2879 = vmatpush.bf16.msrb.mxu3 %v8310_v11  ;;  %v5234_v11 = vld [vmem:[#allocation6 + $0x1d0] sm:$0xf] }
 0x25f   :  { %2842 = vmatpush.bf16.msrb.mxu0 %v8311_v42  ;;  %2855 = vmatpush.bf16.msrb.mxu1 %v8312_v19  ;;  %v7324_v42 = vor.u32 %v5681_v29, %v5098_v24  ;;  %v5026_v19 = vld [vmem:[#allocation6 + $0x30] sm:$0xf]  ;;  %v5210_v24 = vld [vmem:[#allocation6 + $0x1a0] sm:$0xf]  ;;  %v5709_v29 = vld [vmem:[#allocation6 + $0x1a4] sm:$0xf0] }
 0x260   :  { %v2628_v62 = vpop.f32.mrf.mxu3 }
 0x261   :  { %2867 = vmatpush.bf16.msrb.mxu2 %v8313_v2  ;;  %v5663_v2 = vld [vmem:[#allocation6 + $0x34] sm:$0xf0] }
 0x262   :  { %2880 = vmatpush.bf16.msrb.mxu3 %v8314_v60  ;;  %v7327_v60 = vor.u32 %v5699_v40, %v5170_v16  ;;  %v5675_v62 = vld [vmem:[#allocation6 + $0x94] sm:$0xf0]  ;;  %v5002_v16 = vld [vmem:[#allocation6] sm:$0xf] }
 0x263   :  { %2843 = vmatpush.bf16.msrb.mxu0 %v8315_v3  ;;  %2856 = vmatpush.bf16.msrb.mxu1 %v8316_v13  ;;  %v5162_v13 = vld [vmem:[#allocation6 + $0x140] sm:$0xf] }
 0x265   :  { %2868 = vmatpush.bf16.msrb.mxu2 %v6919_v30  ;;  %v7285_v30 = vor.u32 %v5687_v21, %v5122_v33  ;;  %v5713_v33 = vld [vmem:[#allocation6 + $0x1c4] sm:$0xf0] }
 0x266   :  { %2881 = vmatpush.bf16.msrb.mxu3 %v8317_v25  ;;  %v7334_v25 = vor.u32 %v5663_v2, %v5026_v19  ;;  %v7345_v0 = vor.u32 %v5713_v33, %v5226_v32  ;;  %v5673_v19 = vld [vmem:[#allocation6 + $0x84] sm:$0xf0]  ;;  %v5691_v32 = vld [vmem:[#allocation6 + $0x114] sm:$0xf0] }
 0x267   :  { %2844 = vmatpush.bf16.msrb.mxu0 %v8318_v51  ;;  %2857 = vmatpush.bf16.msrb.mxu1 %v6928_v57  ;;  %v7291_v57 = vor.u32 %v5669_v10, %v5050_v58  ;;  %v7342_v58 = vor.u32 %v5697_v4, %v5162_v13  ;;  %v5677_v10 = vld [vmem:[#allocation6 + $0xa4] sm:$0xf0]  ;;  %v7371_v4 = vor.u32 %v5709_v29, %v5210_v24  ;;  %v5194_v24 = vld [vmem:[#allocation6 + $0x180] sm:$0xf] }
 0x268   :  { %v5705_v29 = vld [vmem:[#allocation6 + $0x184] sm:$0xf0] }
 0x269   :  { %2869 = vmatpush.bf16.msrb.mxu2 %v6931_v46  ;;  %v5719_v46 = vld [vmem:[#allocation6 + $0x1f4] sm:$0xf0] }
 0x26a   :  { %2882 = vmatpush.bf16.msrb.mxu3 %v6934_v36  ;;  %v5042_v36 = vld [vmem:[#allocation6 + $0x50] sm:$0xf]  ;;  %v7302_v59 = vor.u32 %v5719_v46, %v5250_v41  ;;  %v5711_v46 = vld [vmem:[#allocation6 + $0x1b4] sm:$0xf0] }
 0x26b   :  { %2845 = vmatpush.bf16.msrb.mxu0 %v6937_v31  ;;  %2858 = vmatpush.bf16.msrb.mxu1 %v6940_v48  ;;  %v2615_v31 = vpop.f32.mrf.mxu2  ;;  %v7299_v48 = vor.u32 %v5703_v5, %v5186_v52  ;;  %v7305_v45 = vor.u32 %v5667_v34, %v5042_v36  ;;  %v2639_v1 = vpop.f32.mrf.mxu0  ;;  %v5695_v52 = vld [vmem:[#allocation6 + $0x134] sm:$0xf0]  ;;  %v7348_v5 = vor.u32 %v5661_v44, %v5018_v39  ;;  %v5218_v41 = vld [vmem:[#allocation6 + $0x1b0] sm:$0xf] }
 0x26c   :  { %v5010_v34 = vld [vmem:[#allocation6 + $0x10] sm:$0xf]  ;;  %v5659_v31 = vld [vmem:[#allocation6 + $0x14] sm:$0xf0] }
 0x26d   :  { %2870 = vmatpush.bf16.msrb.mxu2 %v6943_v50  ;;  %v5701_v50 = vld [vmem:[#allocation6 + $0x164] sm:$0xf0]  ;;  %v2652_v15 = vpop.f32.mrf.mxu1  ;;  %v5202_v44 = vld [vmem:[#allocation6 + $0x190] sm:$0xf] }
 0x26e   :  { %2883 = vmatpush.bf16.msrb.mxu3 %v6946_v55  ;;  %2846 = vmatmul.bf16.vlgmr.msrb.gmra.mxu0 %v7044_v47  ;;  %v5717_v55 = vld [vmem:[#allocation6 + $0x1e4] sm:$0xf0]  ;;  %v7309_v47 = vor.u32 %v5683_v6, %v5106_v38  ;;  %v7354_v38 = vor.u32 %v5695_v52, %v5154_v54  ;;  %v5074_v6 = vld [vmem:[#allocation6 + $0x90] sm:$0xf]  ;;  %v2467_v52 = vmax.f32 %v6988_v27, 0.0 }
 0x26f   :  { %3288 = vmatpush.bf16.msra.mxu0 %v7280_v56  ;;  %3301 = vmatpush.bf16.msra.mxu1 %v7285_v30  ;;  %v7316_v22 = vor.u32 %v5717_v55, %v5242_v35  ;;  %v5146_v35 = vld [vmem:[#allocation6 + $0x120] sm:$0xf]  ;;  %v5693_v55 = vld [vmem:[#allocation6 + $0x124] sm:$0xf0]  ;;  %v7363_v40 = vor.u32 %v5675_v62, %v5074_v6  ;;  %v5052_v62 = vld [vmem:[#allocation6 + $0x68] sm:$0xf0] }
 0x270   :  { %2859 = vmatmul.bf16.vlgmr.msrb.gmra.mxu1 %v7048_v43  ;;  %v7313_v43 = vor.u32 %v5701_v50, %v5178_v37  ;;  %v7357_v50 = vor.u32 %v5711_v46, %v5218_v41  ;;  %v7366_v2 = vor.u32 %v5693_v55, %v5146_v35  ;;  %v5116_v35 = vld [vmem:[#allocation6 + $0xe8] sm:$0xf0]  ;;  %v5130_v27 = vld [vmem:[#allocation6 + $0x100] sm:$0xf] }
 0x271   :  { %2871 = vmatpush.bf16.msrb.mxu2 %v6953_v7  ;;  %v7320_v7 = vor.u32 %v5665_v28, %v5034_v53  ;;  %v7360_v28 = vor.u32 %v5659_v31, %v5010_v34  ;;  %v5668_v34 = vld [vmem:[#allocation6 + $0x64] sm:$0xf] }
 0x272   :  { %2884 = vmatpush.bf16.msrb.mxu3 %v6957_v23  ;;  %v5715_v23 = vld [vmem:[#allocation6 + $0x1d4] sm:$0xf0] }
 0x273   :  { %3289 = vmatpush.bf16.msra.mxu0 %v7291_v57  ;;  %3302 = vmatpush.bf16.msra.mxu1 %v7295_v17  ;;  %v7330_v3 = vor.u32 %v5715_v23, %v5234_v11  ;;  %v2641_v37 = vpop.f32.mrf.mxu0  ;;  %v5657_v11 = vld [vmem:[#allocation6 + $0x4] sm:$0xf0]  ;;  %v5066_v23 = vld [vmem:[#allocation6 + $0x80] sm:$0xf] }
 0x274   :  { %2872 = vmatmul.bf16.vlgmr.msrb.gmra.mxu2 %v7060_v9  ;;  %v5679_v9 = vld [vmem:[#allocation6 + $0xb4] sm:$0xf0]  ;;  %v7376_v39 = vor.u32 %v5657_v11, %v5002_v16  ;;  %v7381_v41 = vor.u32 %v5673_v19, %v5066_v23  ;;  %v5684_v37 = vld [vmem:[#allocation6 + $0xe4] sm:$0xf]  ;;  %v5702_v16 = vld [vmem:[#allocation6 + $0x174] sm:$0xf]  ;;  %v7398_v19 = vor.u32 %v5668_v34, %v5052_v62 }
 0x275   :  { %3314 = vmatpush.bf16.msra.mxu2 %v7299_v48  ;;  %2885 = vmatmul.bf16.vlgmr.msrb.gmra.mxu3 %v7064_v20  ;;  %v2640_v20 = vadd.f32 %v2639_v1, %v7282_v49  ;;  %v7337_v21 = vor.u32 %v5679_v9, %v5090_v8  ;;  %v5082_v49 = vld [vmem:[#allocation6 + $0xa0] sm:$0xf]  ;;  %v2654_v53 = vpop.f32.mrf.mxu1  ;;  %v5670_v8 = vld [vmem:[#allocation6 + $0x74] sm:$0xf]  ;;  %v5060_v9 = vld [vmem:[#allocation6 + $0x78] sm:$0xf0] }
 0x276   :  { %3327 = vmatpush.bf16.msra.mxu3 %v7302_v59  ;;  %v7351_v36 = vor.u32 %v5677_v10, %v5082_v49  ;;  %v5686_v1 = vld [vmem:[#allocation6 + $0xf4] sm:$0xf]  ;;  %v5707_v49 = vld [vmem:[#allocation6 + $0x194] sm:$0xf0]  ;;  %v8319_v10 = vld [vmem:[#allocation224_spill] sm:$0xff]  ;;  %v7383_v46 = vor.u32 %v5670_v8, %v5060_v9  ;;  %8320 = vst [vmem:[#allocation16_spill] sm:$0xff] %v7398_v19 }
 0x277   :  { %3290 = vmatpush.bf16.msra.mxu0 %v7305_v45  ;;  %3303 = vmatpush.bf16.msra.mxu1 %v7309_v47  ;;  %v7339_v51 = vadd.f32 %v2652_v15, %v2640_v20  ;;  %v7369_v13 = vpop.f32.mrf.mxu2  ;;  %v5124_v20 = vld [vmem:[#allocation6 + $0xf8] sm:$0xf0]  ;;  %v5138_v15 = vld [vmem:[#allocation6 + $0x110] sm:$0xf]  ;;  %v2466_v54 = vmax.f32 %v8319_v10, 0.0  ;;  %v7391_v55 = vor.u32 %v5707_v49, %v5202_v44  ;;  %v2468_v49 = vmax.f32 %v7087_v61, 0.0 }
 0x278   :  { %v7373_v33 = vpop.f32.mrf.mxu3  ;;  %v7386_v31 = vor.u32 %v5686_v1, %v5124_v20  ;;  %v7388_v6 = vor.u32 %v5691_v32, %v5138_v15  ;;  %v5689_v53 = vld [vmem:[#allocation6 + $0x104] sm:$0xf0]  ;;  %v5188_v11 = vld [vmem:[#allocation6 + $0x178] sm:$0xf0]  ;;  %v5718_v8 = vld [vmem:[#allocation6 + $0x1f4] sm:$0xf]  ;;  %v7400_v1 = vpack.c.bf16 %v2467_v52, %v2467_v52  ;;  %v7404_v20 = vor.u32 %v5684_v37, %v5116_v35 }
 0x279   :  { %3315 = vmatpush.bf16.msra.mxu2 %v7313_v43  ;;  %v7394_v23 = vpack.c.bf16 %v2466_v54, %v2466_v54  ;;  %v5252_v9 = vld [vmem:[#allocation6 + $0x1f8] sm:$0xf0]  ;;  %v7406_v15 = vor.u32 %v5689_v53, %v5130_v27  ;;  %v5666_v32 = vld [vmem:[#allocation6 + $0x54] sm:$0xf]  ;;  %v7411_v54 = vor.u32 %v5705_v29, %v5194_v24  ;;  %v7413_v52 = vor.u32 %v5702_v16, %v5188_v11  ;;  %v5700_v53 = vld [vmem:[#allocation6 + $0x164] sm:$0xf] }
 0x27a   :  { %3328 = vmatpush.bf16.msra.mxu3 %v7316_v22  ;;  %8321 = vst [vmem:[#allocation19_spill] sm:$0xff] %v7404_v20  ;;  %v5044_v44 = vld [vmem:[#allocation6 + $0x58] sm:$0xf0]  ;;  %v5682_v34 = vld [vmem:[#allocation6 + $0xd4] sm:$0xf]  ;;  %v2469_v37 = vmax.f32 %v7164_v63, 0.0  ;;  %v7417_v27 = vor.u32 %v5718_v8, %v5252_v9  ;;  %v7426_v11 = vpack.c.bf16 %v2468_v49, %v2468_v49 }
 0x27b   :  { %3291 = vmatpush.bf16.msra.mxu0 %v7320_v7  ;;  %3304 = vmatpush.bf16.msra.mxu1 %v7324_v42  ;;  %8322 = vst [vmem:[#allocation20_spill] sm:$0xff] %v7406_v15  ;;  %v5108_v62 = vld [vmem:[#allocation6 + $0xd8] sm:$0xf0]  ;;  %v5180_v61 = vld [vmem:[#allocation6 + $0x168] sm:$0xf0] }
 0x27c   :  { %8323 = vst [vmem:[#allocation21_spill] sm:$0xff] %v7411_v54  ;;  %v5244_v24 = vld [vmem:[#allocation6 + $0x1e8] sm:$0xf0]  ;;  %v7424_v29 = vor.u32 %v5682_v34, %v5108_v62  ;;  %v5664_v63 = vld [vmem:[#allocation6 + $0x44] sm:$0xf]  ;;  %v7430_v8 = vor.u32 %v5700_v53, %v5180_v61 }
 0x27d   :  { %3316 = vmatpush.bf16.msra.mxu2 %v7327_v60  ;;  %8324 = vst [vmem:[#allocation22_spill] sm:$0xff] %v7413_v52  ;;  %v5036_v16 = vld [vmem:[#allocation6 + $0x48] sm:$0xf0]  ;;  %v5680_v9 = vld [vmem:[#allocation6 + $0xc4] sm:$0xf] }
 0x27e   :  { %3329 = vmatpush.bf16.msra.mxu3 %v7330_v3  ;;  %8325 = vst [vmem:[#allocation17_spill] sm:$0xff] %v7417_v27  ;;  %v5698_v34 = vld [vmem:[#allocation6 + $0x154] sm:$0xf]  ;;  %v5172_v62 = vld [vmem:[#allocation6 + $0x158] sm:$0xf0]  ;;  %v7439_v49 = vor.u32 %v5664_v63, %v5036_v16 }
 0x27f   :  { %3292 = vmatpush.bf16.msra.mxu0 %v7334_v25  ;;  %3305 = vmatpush.bf16.msra.mxu1 %v7337_v21  ;;  %v2667_v10 = vpop.f32.mrf.mxu2  ;;  %8327 = vst [vmem:[#allocation18_spill] sm:$0xff] %v7424_v29  ;;  %v5662_v53 = vld [vmem:[#allocation6 + $0x34] sm:$0xf]  ;;  %v5028_v61 = vld [vmem:[#allocation6 + $0x38] sm:$0xf0] }
 0x280   :  { %v2680_v35 = vpop.f32.mrf.mxu3  ;;  %v7420_v10 = vor.u32 %v5666_v32, %v5044_v44  ;;  %8328 = vst [vmem:[#allocation104_spill] sm:$0xff] %v7430_v8  ;;  %v5100_v32 = vld [vmem:[#allocation6 + $0xc8] sm:$0xf0]  ;;  %v7432_v44 = vpack.c.bf16 %v2469_v37, %v2469_v37 }
 0x281   :  { %3317 = vmatpush.bf16.msra.mxu2 %v7342_v58  ;;  %v7435_v35 = vor.u32 %v5716_v14, %v5244_v24  ;;  %8330 = vst [vmem:[#allocation28_spill] sm:$0xff] %v7439_v49  ;;  %v7443_v37 = vor.u32 %v5680_v9, %v5100_v32  ;;  %v7446_v14 = vor.u32 %v5698_v34, %v5172_v62  ;;  %v5678_v24 = vld [vmem:[#allocation6 + $0xb4] sm:$0xf]  ;;  %v5712_v32 = vld [vmem:[#allocation6 + $0x1c4] sm:$0xf] }
 0x282   :  { %3330 = vmatpush.bf16.msra.mxu3 %v7345_v0  ;;  %8326 = vst [vmem:[#allocation101_spill] sm:$0xff] %v7420_v10  ;;  %v7456_v9 = vor.u32 %v5662_v53, %v5028_v61  ;;  %v5660_v62 = vld [vmem:[#allocation6 + $0x24] sm:$0xf]  ;;  %v5694_v53 = vld [vmem:[#allocation6 + $0x134] sm:$0xf] }
 0x283   :  { %3293 = vmatpush.bf16.msra.mxu0 %v7348_v5  ;;  %3306 = vmatpush.bf16.msra.mxu1 %v7351_v36  ;;  %8329 = vst [vmem:[#allocation27_spill] sm:$0xff] %v7435_v35  ;;  %v5156_v61 = vld [vmem:[#allocation6 + $0x138] sm:$0xf0] }
 0x284   :  { %8331 = vst [vmem:[#allocation23_spill] sm:$0xff] %v7443_v37 }
 0x285   :  { %3318 = vmatpush.bf16.msra.mxu2 %v7354_v38  ;;  %8332 = vst [vmem:[#allocation24_spill] sm:$0xff] %v7446_v14 }
 0x286   :  { %3331 = vmatpush.bf16.msra.mxu3 %v7357_v50  ;;  %8334 = vst [vmem:[#allocation26_spill] sm:$0xff] %v7456_v9 }
 0x287   :  { %3294 = vmatpush.bf16.msra.mxu0 %v7360_v28  ;;  %3307 = vmatpush.bf16.msra.mxu1 %v7363_v40 }
 0x289   :  { %3319 = vmatpush.bf16.msra.mxu2 %v7366_v2 }
 0x28a   :  { %3332 = vmatpush.bf16.msra.mxu3 %v7371_v4 }
 0x28b   :  { %3295 = vmatpush.bf16.msra.mxu0 %v7376_v39  ;;  %3308 = vmatpush.bf16.msra.mxu1 %v7381_v41  ;;  %v7449_v63 = vpop.f32.mrf.mxu0 }
 0x28d   :  { %3320 = vmatpush.bf16.msra.mxu2 %v7388_v6 }
 0x28e   :  { %3333 = vmatpush.bf16.msra.mxu3 %v7391_v55  ;;  %3296 = vmatmul.bf16.vlgmr.msra.gmra.mxu0 %v7394_v23 }
 0x28f   :  { %3340 = vmatpush.bf16.msrb.mxu0 %v7383_v46  ;;  %3353 = vmatpush.bf16.msrb.mxu1 %v7386_v31 }
 0x290   :  { %3309 = vmatmul.bf16.vlgmr.msra.gmra.mxu1 %v7400_v1 }
 0x291   :  { %3321 = vmatpush.bf16.msra.mxu2 %v7406_v15  ;;  %v7453_v15 = vpop.f32.mrf.mxu1 }
 0x292   :  { %3334 = vmatpush.bf16.msra.mxu3 %v7411_v54  ;;  %v5236_v54 = vld [vmem:[#allocation6 + $0x1d8] sm:$0xf0] }
 0x293   :  { %3341 = vmatpush.bf16.msrb.mxu0 %v7398_v19  ;;  %3354 = vmatpush.bf16.msrb.mxu1 %v7404_v20  ;;  %v7451_v16 = vor.u32 %v5714_v18, %v5236_v54  ;;  %v5676_v54 = vld [vmem:[#allocation6 + $0xa4] sm:$0xf] }
 0x294   :  { %3322 = vmatmul.bf16.vlgmr.msra.gmra.mxu2 %v7426_v11 }
 0x295   :  { %3366 = vmatpush.bf16.msrb.mxu2 %v7413_v52  ;;  %3335 = vmatmul.bf16.vlgmr.msra.gmra.mxu3 %v7432_v44  ;;  %8333 = vst [vmem:[#allocation25_spill] sm:$0xff] %v7451_v16  ;;  %v5164_v52 = vld [vmem:[#allocation6 + $0x148] sm:$0xf0] }
 0x296   :  { %3379 = vmatpush.bf16.msrb.mxu3 %v7417_v27  ;;  %v5092_v27 = vld [vmem:[#allocation6 + $0xb8] sm:$0xf0] }
 0x297   :  { %3342 = vmatpush.bf16.msrb.mxu0 %v7420_v10  ;;  %3355 = vmatpush.bf16.msrb.mxu1 %v7424_v29  ;;  %v5696_v10 = vld [vmem:[#allocation6 + $0x144] sm:$0xf]  ;;  %v7459_v34 = vor.u32 %v5678_v24, %v5092_v27  ;;  %v5084_v29 = vld [vmem:[#allocation6 + $0xa8] sm:$0xf0]  ;;  %v5710_v27 = vld [vmem:[#allocation6 + $0x1b4] sm:$0xf] }
 0x298   :  { %v7462_v18 = vor.u32 %v5696_v10, %v5164_v52  ;;  %v5220_v24 = vld [vmem:[#allocation6 + $0x1b8] sm:$0xf0]  ;;  %v5658_v52 = vld [vmem:[#allocation6 + $0x14] sm:$0xf] }
 0x299   :  { %3367 = vmatpush.bf16.msrb.mxu2 %v7430_v8  ;;  %v5228_v8 = vld [vmem:[#allocation6 + $0x1c8] sm:$0xf0]  ;;  %8335 = vst [vmem:[#allocation31_spill] sm:$0xff] %v7459_v34  ;;  %v5012_v10 = vld [vmem:[#allocation6 + $0x18] sm:$0xf0]  ;;  %v2706_v19 = vpop.f32.mrf.mxu1 }
 0x29a   :  { %3380 = vmatpush.bf16.msrb.mxu3 %v7435_v35  ;;  %v5020_v35 = vld [vmem:[#allocation6 + $0x28] sm:$0xf0]  ;;  %8336 = vst [vmem:[#allocation32_spill] sm:$0xff] %v7462_v18  ;;  %v7465_v20 = vor.u32 %v5712_v32, %v5228_v8  ;;  %v5674_v8 = vld [vmem:[#allocation6 + $0x94] sm:$0xf]  ;;  %v2717_v19 = vpop.f32.mrf.mxu2 }
 0x29b   :  { %3343 = vmatpush.bf16.msrb.mxu0 %v7439_v49  ;;  %3356 = vmatpush.bf16.msrb.mxu1 %v7443_v37  ;;  %v7468_v49 = vor.u32 %v5660_v62, %v5020_v35  ;;  %v7471_v37 = vor.u32 %v5676_v54, %v5084_v29  ;;  %v5076_v32 = vld [vmem:[#allocation6 + $0x98] sm:$0xf0]  ;;  %v5692_v35 = vld [vmem:[#allocation6 + $0x124] sm:$0xf]  ;;  %v5148_v62 = vld [vmem:[#allocation6 + $0x128] sm:$0xf0]  ;;  %v7480_v29 = vor.u32 %v5658_v52, %v5012_v10 }
 0x29c   :  { %8337 = vst [vmem:[#allocation29_spill] sm:$0xff] %v7465_v20  ;;  %v5708_v54 = vld [vmem:[#allocation6 + $0x1a4] sm:$0xf]  ;;  %v5690_v52 = vld [vmem:[#allocation6 + $0x114] sm:$0xf] }
 0x29d   :  { %3368 = vmatpush.bf16.msrb.mxu2 %v7446_v14  ;;  %8338 = vst [vmem:[#allocation30_spill] sm:$0xff] %v7468_v49  ;;  %v7474_v14 = vor.u32 %v5694_v53, %v5156_v61  ;;  %v7483_v53 = vor.u32 %v5674_v8, %v5076_v32  ;;  %v5656_v61 = vld [vmem:[#allocation6 + $0x4] sm:$0xf]  ;;  %v5140_v10 = vld [vmem:[#allocation6 + $0x118] sm:$0xf0] }
 0x29e   :  { %3381 = vmatpush.bf16.msrb.mxu3 %v7451_v16  ;;  %8339 = vst [vmem:[#allocation35_spill] sm:$0xff] %v7471_v37  ;;  %v2693_v16 = vpop.f32.mrf.mxu0  ;;  %v5706_v32 = vld [vmem:[#allocation6 + $0x194] sm:$0xf] }
 0x29f   :  { %3344 = vmatpush.bf16.msrb.mxu0 %v7456_v9  ;;  %3357 = vmatpush.bf16.msrb.mxu1 %v7459_v34  ;;  %v7477_v9 = vor.u32 %v5710_v27, %v5220_v24  ;;  %v5212_v34 = vld [vmem:[#allocation6 + $0x1a8] sm:$0xf0]  ;;  %v7486_v16 = vor.u32 %v5692_v35, %v5148_v62  ;;  %v5672_v27 = vld [vmem:[#allocation6 + $0x84] sm:$0xf]  ;;  %v7498_v62 = vor.u32 %v5690_v52, %v5140_v10 }
 0x2a0   :  { %v5068_v24 = vld [vmem:[#allocation6 + $0x88] sm:$0xf0] }
 0x2a1   :  { %3369 = vmatpush.bf16.msrb.mxu2 %v7462_v18  ;;  %8340 = vst [vmem:[#allocation36_spill] sm:$0xff] %v7477_v9  ;;  %v5004_v18 = vld [vmem:[#allocation6 + $0x8] sm:$0xf0]  ;;  %v7495_v35 = vor.u32 %v5672_v27, %v5068_v24 }
 0x2a2   :  { %3382 = vmatpush.bf16.msrb.mxu3 %v7465_v20  ;;  %v2730_v20 = vpop.f32.mrf.mxu3  ;;  %v7492_v8 = vor.u32 %v5656_v61, %v5004_v18  ;;  %v5704_v18 = vld [vmem:[#allocation6 + $0x184] sm:$0xf]  ;;  %v5196_v61 = vld [vmem:[#allocation6 + $0x188] sm:$0xf0] }
 0x2a3   :  { %3345 = vmatpush.bf16.msrb.mxu0 %v7468_v49  ;;  %3358 = vmatpush.bf16.msrb.mxu1 %v7471_v37  ;;  %v7489_v49 = vor.u32 %v5708_v54, %v5212_v34  ;;  %v5204_v37 = vld [vmem:[#allocation6 + $0x198] sm:$0xf0]  ;;  %v5688_v54 = vld [vmem:[#allocation6 + $0x104] sm:$0xf]  ;;  %v7512_v24 = vor.u32 %v5704_v18, %v5196_v61  ;;  %v8359_v10 = vld [vmem:[#allocation29_spill] sm:$0xff] }
 0x2a4   :  { %v7501_v34 = vor.u32 %v5706_v32, %v5204_v37  ;;  %v2719_v37 = vpop.f32.mrf.mxu2 }
 0x2a5   :  { %3370 = vmatpush.bf16.msrb.mxu2 %v7474_v14  ;;  %v8361_v18 = vld [vmem:[#allocation35_spill] sm:$0xff] }
 0x2a6   :  { %3383 = vmatpush.bf16.msrb.mxu3 %v7477_v9  ;;  %v5132_v9 = vld [vmem:[#allocation6 + $0x108] sm:$0xf0] }
 0x2a7   :  { %3346 = vmatpush.bf16.msrb.mxu0 %v7480_v29  ;;  %3359 = vmatpush.bf16.msrb.mxu1 %v7483_v53  ;;  %v7508_v27 = vor.u32 %v5688_v54, %v5132_v9  ;;  %v8358_v9 = vld [vmem:[#allocation32_spill] sm:$0xff]  ;;  %v8360_v54 = vld [vmem:[#allocation30_spill] sm:$0xff] }
 0x2a8   :  { %v8362_v37 = vld [vmem:[#allocation36_spill] sm:$0xff] }
 0x2a9   :  { %3371 = vmatpush.bf16.msrb.mxu2 %v7486_v16 }
 0x2aa   :  { %3384 = vmatpush.bf16.msrb.mxu3 %v7489_v49  ;;  %v2732_v52 = vpop.f32.mrf.mxu3 }
 0x2ab   :  { %3347 = vmatpush.bf16.msrb.mxu0 %v7492_v8  ;;  %3360 = vmatpush.bf16.msrb.mxu1 %v7495_v35 }
 0x2ad   :  { %3372 = vmatpush.bf16.msrb.mxu2 %v7498_v62 }
 0x2ae   :  { %3385 = vmatpush.bf16.msrb.mxu3 %v7501_v34  ;;  %3348 = vmatmul.bf16.vlgmr.msrb.gmra.mxu0 %v7394_v23 }
 0x2af   :  { %3396 = vmatpush.bf16.msra.mxu0 %v7280_v56  ;;  %3409 = vmatpush.bf16.msra.mxu1 %v7285_v30  ;;  %v8341_v56 = vperm.slane %v6753_v26, 2 }
 0x2b0   :  { %3361 = vmatmul.bf16.vlgmr.msrb.gmra.mxu1 %v7400_v1  ;;  %v2756_v1 = vpop.f32.mrf.mxu1 }
 0x2b1   :  { %3373 = vmatpush.bf16.msrb.mxu2 %v7508_v27  ;;  %v2692_v30 = vadd.f32 %v7449_v63, %v8341_v56  ;;  %v8357_v63 = vld [vmem:[#allocation31_spill] sm:$0xff] }
 0x2b2   :  { %3386 = vmatpush.bf16.msrb.mxu3 %v7512_v24  ;;  %v5727_v56 = vld [vmem:[#allocation7 + $0x38] sm:$0xff] }
 0x2b3   :  { %3397 = vmatpush.bf16.msra.mxu0 %v7291_v57  ;;  %3410 = vmatpush.bf16.msra.mxu1 %v7295_v17  ;;  %v2705_v57 = vadd.f32 %v7453_v15, %v2692_v30  ;;  %v2743_v17 = vpop.f32.mrf.mxu0  ;;  %v8354_v15 = vld [vmem:[#allocation24_spill] sm:$0xff]  ;;  %v5726_v30 = vld [vmem:[#allocation7 + $0x30] sm:$0xff] }
 0x2b4   :  { %3374 = vmatmul.bf16.vlgmr.msrb.gmra.mxu2 %v7426_v11  ;;  %v8355_v11 = vld [vmem:[#allocation25_spill] sm:$0xff] }
 0x2b5   :  { %3422 = vmatpush.bf16.msra.mxu2 %v7299_v48  ;;  %3387 = vmatmul.bf16.vlgmr.msrb.gmra.mxu3 %v7432_v44  ;;  %v2718_v23 = vadd.f32 %v2717_v19, %v2705_v57  ;;  %v8356_v44 = vld [vmem:[#allocation26_spill] sm:$0xff] }
 0x2b6   :  { %3435 = vmatpush.bf16.msra.mxu3 %v7302_v59  ;;  %v2666_v59 = vadd.f32 %v7369_v13, %v7339_v51  ;;  %v8346_v13 = vld [vmem:[#allocation21_spill] sm:$0xff] }
 0x2b7   :  { %3398 = vmatpush.bf16.msra.mxu0 %v7305_v45  ;;  %3411 = vmatpush.bf16.msra.mxu1 %v7309_v47  ;;  %v2731_v48 = vadd.f32 %v2730_v20, %v2718_v23  ;;  %v8353_v20 = vld [vmem:[#allocation23_spill] sm:$0xff] }
 0x2b9   :  { %3423 = vmatpush.bf16.msra.mxu2 %v7313_v43  ;;  %v2744_v45 = vadd.f32 %v2743_v17, %v2731_v48  ;;  %v2758_v43 = vpop.f32.mrf.mxu1  ;;  %v5723_v17 = vld [vmem:[#allocation7 + $0x18] sm:$0xff] }
 0x2ba   :  { %3436 = vmatpush.bf16.msra.mxu3 %v7316_v22  ;;  %v2679_v22 = vadd.f32 %v7373_v33, %v2666_v59  ;;  %v8348_v33 = vld [vmem:[#allocation101_spill] sm:$0xff] }
 0x2bb   :  { %3399 = vmatpush.bf16.msra.mxu0 %v7320_v7  ;;  %3412 = vmatpush.bf16.msra.mxu1 %v7324_v42  ;;  %v2745_v47 = vpop.f32.mrf.mxu0  ;;  %v2757_v7 = vadd.f32 %v2756_v1, %v2744_v45  ;;  %v2769_v42 = vpop.f32.mrf.mxu2 }
 0x2bd   :  { %3424 = vmatpush.bf16.msra.mxu2 %v7327_v60  ;;  %v2770_v60 = vadd.f32 %v2769_v42, %v2757_v7  ;;  %v5735_v42 = vld [vmem:[#allocation7 + $0x78] sm:$0xff] }
 0x2be   :  { %3437 = vmatpush.bf16.msra.mxu3 %v7330_v3  ;;  %v2782_v3 = vpop.f32.mrf.mxu3 }
 0x2bf   :  { %3400 = vmatpush.bf16.msra.mxu0 %v7334_v25  ;;  %3413 = vmatpush.bf16.msra.mxu1 %v7337_v21  ;;  %v2890_v25 = vmax.f32 %v7240_v12, 0.0  ;;  %v2891_v21 = vmax.f32 %v2679_v22, 0.0  ;;  %v2783_v51 = vadd.f32 %v2782_v3, %v2770_v60  ;;  %v5720_v22 = vld [vmem:[#allocation7] sm:$0xff]  ;;  %v5734_v3 = vld [vmem:[#allocation7 + $0x70] sm:$0xff] }
 0x2c1   :  { %3425 = vmatpush.bf16.msra.mxu2 %v7342_v58  ;;  %v2894_v58 = vpack.c.bf16 %v2890_v25, %v2890_v25  ;;  %v2892_v12 = vmax.f32 %v2783_v51, 0.0 }
 0x2c2   :  { %3438 = vmatpush.bf16.msra.mxu3 %v7345_v0  ;;  %v2895_v0 = vpack.c.bf16 %v2891_v21, %v2891_v21 }
 0x2c3   :  { %3401 = vmatpush.bf16.msra.mxu0 %v7348_v5  ;;  %3414 = vmatpush.bf16.msra.mxu1 %v7351_v36  ;;  %v2771_v5 = vpop.f32.mrf.mxu2 }
 0x2c5   :  { %3426 = vmatpush.bf16.msra.mxu2 %v7354_v38  ;;  %v8342_v38 = vld [vmem:[#allocation16_spill] sm:$0xff] }
 0x2c6   :  { %3439 = vmatpush.bf16.msra.mxu3 %v7357_v50  ;;  %v2784_v36 = vpop.f32.mrf.mxu3  ;;  %v8343_v50 = vld [vmem:[#allocation19_spill] sm:$0xff] }
 0x2c7   :  { %3402 = vmatpush.bf16.msra.mxu0 %v7360_v28  ;;  %3415 = vmatpush.bf16.msra.mxu1 %v7363_v40  ;;  %v8344_v28 = vld [vmem:[#allocation20_spill] sm:$0xff]  ;;  %v2896_v40 = vpack.c.bf16 %v2892_v12, %v2892_v12  ;;  %v5731_v36 = vld [vmem:[#allocation7 + $0x58] sm:$0xff] }
 0x2c8   :  { %v7594_v12 = vld [vmem:[%s7619_s6] sm:$0x3] }
 0x2c9   :  { %3427 = vmatpush.bf16.msra.mxu2 %v7366_v2  ;;  %v8345_v2 = vld [vmem:[#allocation22_spill] sm:$0xff] }
 0x2ca   :  { %3440 = vmatpush.bf16.msra.mxu3 %v7371_v4  ;;  %v8347_v4 = vld [vmem:[#allocation17_spill] sm:$0xff] }
 0x2cb   :  { %3403 = vmatpush.bf16.msra.mxu0 %v7376_v39  ;;  %3416 = vmatpush.bf16.msra.mxu1 %v7381_v41  ;;  %v8349_v39 = vld [vmem:[#allocation18_spill] sm:$0xff]  ;;  %v8350_v41 = vld [vmem:[#allocation104_spill] sm:$0xff] }
 0x2cd   :  { %3428 = vmatpush.bf16.msra.mxu2 %v7388_v6  ;;  %v2808_v6 = vpop.f32.mrf.mxu1 }
 0x2ce   :  { %3404 = vmatmul.bf16.vlgmr.msra.gmra.mxu0 %v2894_v58  ;;  %3441 = vmatpush.bf16.msra.mxu3 %v7391_v55  ;;  %v8352_v55 = vld [vmem:[#allocation28_spill] sm:$0xff] }
 0x2cf   :  { %3448 = vmatpush.bf16.msrb.mxu0 %v7383_v46  ;;  %3461 = vmatpush.bf16.msrb.mxu1 %v7386_v31  ;;  %v2795_v46 = vpop.f32.mrf.mxu0  ;;  %v8351_v31 = vld [vmem:[#allocation27_spill] sm:$0xff] }
 0x2d0   :  { %3417 = vmatmul.bf16.vlgmr.msra.gmra.mxu1 %v2895_v0 }
 0x2d1   :  { %3429 = vmatpush.bf16.msra.mxu2 %v8344_v28  ;;  %v5730_v28 = vld [vmem:[#allocation7 + $0x50] sm:$0xff] }
 0x2d2   :  { %3442 = vmatpush.bf16.msra.mxu3 %v8346_v13 }
 0x2d3   :  { %3449 = vmatpush.bf16.msrb.mxu0 %v8342_v38  ;;  %3462 = vmatpush.bf16.msrb.mxu1 %v8343_v50  ;;  %v2964_v50 = vperm.slane %v7594_v12, 0 }
 0x2d4   :  { %3430 = vmatmul.bf16.vlgmr.msra.gmra.mxu2 %v2896_v40 }
 0x2d5   :  { %3474 = vmatpush.bf16.msrb.mxu2 %v8345_v2  ;;  %v2810_v32 = vpop.f32.mrf.mxu1 }
 0x2d6   :  { %3487 = vmatpush.bf16.msrb.mxu3 %v8347_v4  ;;  %v5729_v4 = vld [vmem:[#allocation7 + $0x48] sm:$0xff] }
 0x2d7   :  { %3450 = vmatpush.bf16.msrb.mxu0 %v8348_v33  ;;  %3463 = vmatpush.bf16.msrb.mxu1 %v8349_v39  ;;  %v2797_v19 = vpop.f32.mrf.mxu0  ;;  %v2821_v61 = vpop.f32.mrf.mxu2 }
 0x2d8   :  { %v2834_v52 = vpop.f32.mrf.mxu3 }
 0x2d9   :  { %3475 = vmatpush.bf16.msrb.mxu2 %v8350_v41 }
 0x2da   :  { %3488 = vmatpush.bf16.msrb.mxu3 %v8351_v31  ;;  %v5728_v31 = vld [vmem:[#allocation7 + $0x40] sm:$0xff] }
 0x2db   :  { %3451 = vmatpush.bf16.msrb.mxu0 %v8352_v55  ;;  %3464 = vmatpush.bf16.msrb.mxu1 %v8353_v20 }
 0x2dd   :  { %3476 = vmatpush.bf16.msrb.mxu2 %v8354_v15 }
 0x2de   :  { %3489 = vmatpush.bf16.msrb.mxu3 %v8355_v11 }
 0x2df   :  { %3452 = vmatpush.bf16.msrb.mxu0 %v8356_v44  ;;  %3465 = vmatpush.bf16.msrb.mxu1 %v8357_v63 }
 0x2e1   :  { %3477 = vmatpush.bf16.msrb.mxu2 %v8358_v9  ;;  %v2965_v9 = vperm.slane %v7594_v12, 1 }
 0x2e2   :  { %3490 = vmatpush.bf16.msrb.mxu3 %v8359_v10 }
 0x2e3   :  { %3453 = vmatpush.bf16.msrb.mxu0 %v8360_v54  ;;  %3466 = vmatpush.bf16.msrb.mxu1 %v8361_v18 }
 0x2e5   :  { %3478 = vmatpush.bf16.msrb.mxu2 %v7474_v14  ;;  %v2823_v14 = vpop.f32.mrf.mxu2 }
 0x2e6   :  { %3491 = vmatpush.bf16.msrb.mxu3 %v8362_v37 }
 0x2e7   :  { %3454 = vmatpush.bf16.msrb.mxu0 %v7480_v29  ;;  %3467 = vmatpush.bf16.msrb.mxu1 %v7483_v53  ;;  %v2836_v29 = vpop.f32.mrf.mxu3  ;;  %v5725_v53 = vld [vmem:[#allocation7 + $0x28] sm:$0xff] }
 0x2e9   :  { %3479 = vmatpush.bf16.msrb.mxu2 %v7486_v16 }
 0x2ea   :  { %3492 = vmatpush.bf16.msrb.mxu3 %v7489_v49  ;;  %v8363_v49 = vperm.slane %v6753_v26, 3 }
 0x2eb   :  { %3455 = vmatpush.bf16.msrb.mxu0 %v7492_v8  ;;  %3468 = vmatpush.bf16.msrb.mxu1 %v7495_v35  ;;  %v5724_v8 = vld [vmem:[#allocation7 + $0x20] sm:$0xff] }
 0x2ec   :  { %v2796_v16 = vadd.f32 %v2795_v46, %v8363_v49 }
 0x2ed   :  { %3480 = vmatpush.bf16.msrb.mxu2 %v7498_v62  ;;  %v2847_v62 = vpop.f32.mrf.mxu0 }
 0x2ee   :  { %3456 = vmatmul.bf16.vlgmr.msrb.gmra.mxu0 %v2894_v58  ;;  %3493 = vmatpush.bf16.msrb.mxu3 %v7501_v34  ;;  %v2809_v35 = vadd.f32 %v2808_v6, %v2796_v16  ;;  %v2860_v34 = vpop.f32.mrf.mxu1  ;;  %v5733_v58 = vld [vmem:[#allocation7 + $0x68] sm:$0xff] }
 0x2ef   :  { %3636 = vmatpush.bf16.msra.mxu0 %v5727_v56  ;;  %3469 = vmatmul.bf16.vlgmr.msrb.gmra.mxu1 %v2895_v0  ;;  %v5732_v0 = vld [vmem:[#allocation7 + $0x60] sm:$0xff] }
 0x2f0   :  { %v2822_v57 = vadd.f32 %v2821_v61, %v2809_v35  ;;  %3649 = vmatpush.bf16.msra.mxu1 %v5735_v42 }
 0x2f1   :  { %3481 = vmatpush.bf16.msrb.mxu2 %v7508_v27  ;;  %v5722_v27 = vld [vmem:[#allocation7 + $0x10] sm:$0xff] }
 0x2f2   :  { %3494 = vmatpush.bf16.msrb.mxu3 %v7512_v24  ;;  %v2835_v23 = vadd.f32 %v2834_v52, %v2822_v57  ;;  %v5721_v24 = vld [vmem:[#allocation7 + $0x8] sm:$0xff] }
 0x2f3   :  { %3637 = vmatpush.bf16.msra.mxu0 %v5726_v30 }
 0x2f4   :  { %3482 = vmatmul.bf16.vlgmr.msrb.gmra.mxu2 %v2896_v40  ;;  %v2848_v1 = vadd.f32 %v2847_v62, %v2835_v23  ;;  %3650 = vmatpush.bf16.msra.mxu1 %v5734_v3 }
 0x2f5   :  { %3664 = vmatpush.bf16.msra.mxu2 %v5727_v56  ;;  %v2849_v26 = vpop.f32.mrf.mxu0 }
 0x2f6   :  { %v2862_v48 = vpop.f32.mrf.mxu1  ;;  %v2861_v59 = vadd.f32 %v2860_v34, %v2848_v1  ;;  %v5743_v26 = vld [vmem:[#allocation9 + $0x38] sm:$0xff] }
 0x2f7   :  { %3638 = vmatpush.bf16.msra.mxu0 %v5725_v53  ;;  %v2873_v45 = vpop.f32.mrf.mxu2 }
 0x2f8   :  { %v2874_v47 = vadd.f32 %v2873_v45, %v2861_v59  ;;  %v2886_v43 = vpop.f32.mrf.mxu3  ;;  %3651 = vmatpush.bf16.msra.mxu1 %v5733_v58  ;;  %v5742_v45 = vld [vmem:[#allocation9 + $0x30] sm:$0xff] }
 0x2f9   :  { %3665 = vmatpush.bf16.msra.mxu2 %v5726_v30 }
 0x2fa   :  { %v2887_v7 = vadd.f32 %v2886_v43, %v2874_v47 }
 0x2fb   :  { %3639 = vmatpush.bf16.msra.mxu0 %v5724_v8 }
 0x2fc   :  { %v2893_v60 = vmax.f32 %v2887_v7, 0.0  ;;  %3652 = vmatpush.bf16.msra.mxu1 %v5732_v0 }
 0x2fd   :  { %3666 = vmatpush.bf16.msra.mxu2 %v5725_v53 }
 0x2fe   :  { %v2897_v25 = vpack.c.bf16 %v2893_v60, %v2893_v60  ;;  %v5740_v60 = vld [vmem:[#allocation9 + $0x20] sm:$0xff] }
 0x2ff   :  { %3640 = vmatpush.bf16.msra.mxu0 %v5723_v17  ;;  %v2875_v21 = vpop.f32.mrf.mxu2 }
 0x300   :  { %v2888_v51 = vpop.f32.mrf.mxu3  ;;  %3443 = vmatmul.bf16.vlgmr.msra.gmra.mxu3 %v2897_v25  ;;  %3653 = vmatpush.bf16.msra.mxu1 %v5731_v36  ;;  %v5739_v21 = vld [vmem:[#allocation9 + $0x18] sm:$0xff] }
 0x301   :  { %3667 = vmatpush.bf16.msra.mxu2 %v5724_v8  ;;  %3677 = vmatpush.bf16.msra.mxu3 %v5735_v42 }
 0x303   :  { %3641 = vmatpush.bf16.msra.mxu0 %v5722_v27 }
 0x304   :  { %3654 = vmatpush.bf16.msra.mxu1 %v5730_v28 }
 0x305   :  { %3668 = vmatpush.bf16.msra.mxu2 %v5723_v17  ;;  %3678 = vmatpush.bf16.msra.mxu3 %v5734_v3 }
 0x307   :  { %3642 = vmatpush.bf16.msra.mxu0 %v5721_v24 }
 0x308   :  { %3655 = vmatpush.bf16.msra.mxu1 %v5729_v4 }
 0x309   :  { %3669 = vmatpush.bf16.msra.mxu2 %v5722_v27  ;;  %3679 = vmatpush.bf16.msra.mxu3 %v5733_v58  ;;  %v5738_v58 = vld [vmem:[#allocation9 + $0x10] sm:$0xff] }
 0x30b   :  { %3643 = vmatpush.bf16.msra.mxu0 %v5720_v22  ;;  %v3297_v5 = vpop.f32.mrf.mxu0 }
 0x30c   :  { %v3298_v40 = vadd.f32 %v3297_v5, %v2964_v50  ;;  %3656 = vmatpush.bf16.msra.mxu1 %v5728_v31 }
 0x30d   :  { %3670 = vmatpush.bf16.msra.mxu2 %v5721_v24  ;;  %v3310_v38 = vpop.f32.mrf.mxu1  ;;  %3680 = vmatpush.bf16.msra.mxu3 %v5732_v0 }
 0x30e   :  { %v3311_v33 = vadd.f32 %v3310_v38, %v3298_v40  ;;  %v5737_v38 = vld [vmem:[#allocation9 + $0x8] sm:$0xff]  ;;  %v5736_v40 = vld [vmem:[#allocation9] sm:$0xff] }
 0x30f   :  { %3760 = vmatpush.bf16.msrb.mxu0 %v5743_v26 }
 0x310   :  { %3495 = vmatmul.bf16.vlgmr.msrb.gmra.mxu3 %v2897_v25  ;;  %3775 = vmatpush.bf16.msrb.mxu1 %v5743_v26 }
 0x311   :  { %3671 = vmatpush.bf16.msra.mxu2 %v5720_v22  ;;  %3681 = vmatpush.bf16.msra.mxu3 %v5731_v36  ;;  %v5741_v22 = vld [vmem:[#allocation9 + $0x28] sm:$0xff] }
 0x313   :  { %v3299_v2 = vpop.f32.mrf.mxu0  ;;  %3761 = vmatpush.bf16.msrb.mxu0 %v5742_v45 }
 0x314   :  { %3776 = vmatpush.bf16.msrb.mxu1 %v5742_v45 }
 0x315   :  { %v3312_v13 = vpop.f32.mrf.mxu1  ;;  %3682 = vmatpush.bf16.msra.mxu3 %v5730_v28 }
 0x317   :  { %v3323_v39 = vpop.f32.mrf.mxu2  ;;  %3762 = vmatpush.bf16.msrb.mxu0 %v5741_v22 }
 0x318   :  { %v3324_v41 = vadd.f32 %v3323_v39, %v3311_v33  ;;  %v3336_v46 = vpop.f32.mrf.mxu3  ;;  %3777 = vmatpush.bf16.msrb.mxu1 %v5741_v22 }
 0x319   :  { %3683 = vmatpush.bf16.msra.mxu3 %v5729_v4  ;;  %v5766_v4 = vld [vmem:[%s7621_s8] ss:$0 sm:$0xff] }
 0x31a   :  { %v3337_v6 = vadd.f32 %v3336_v46, %v3324_v41 }
 0x31b   :  { %3763 = vmatpush.bf16.msrb.mxu0 %v5740_v60 }
 0x31c   :  { %v3392_v55 = vmax.f32 %v3337_v6, 0.0  ;;  %3778 = vmatpush.bf16.msrb.mxu1 %v5740_v60 }
 0x31d   :  { %3684 = vmatpush.bf16.msra.mxu3 %v5728_v31 }
 0x31e   :  { %v3394_v20 = vpack.c.bf16 %v3392_v55, %v3392_v55  ;;  %v5751_v55 = vld [vmem:[#allocation10 + $0x38] sm:$0xff] }
 0x31f   :  { %v3325_v15 = vpop.f32.mrf.mxu2  ;;  %3764 = vmatpush.bf16.msrb.mxu0 %v5739_v21  ;;  %3858 = vmatpush.bf16.msrb.mxu2 %v5751_v55 }
 0x320   :  { %v3338_v11 = vpop.f32.mrf.mxu3  ;;  %3644 = vmatmul.bf16.vlgmr.msra.gmra.mxu0 %v3394_v20  ;;  %3779 = vmatpush.bf16.msrb.mxu1 %v5739_v21  ;;  %v5750_v20 = vld [vmem:[#allocation10 + $0x30] sm:$0xff]  ;;  %v5749_v15 = vld [vmem:[#allocation10 + $0x28] sm:$0xff] }
 0x321   :  { %3873 = vmatpush.bf16.msrb.mxu3 %v5751_v55  ;;  %v5748_v11 = vld [vmem:[#allocation10 + $0x20] sm:$0xff] }
 0x323   :  { %3765 = vmatpush.bf16.msrb.mxu0 %v5738_v58  ;;  %3859 = vmatpush.bf16.msrb.mxu2 %v5750_v20 }
 0x324   :  { %3780 = vmatpush.bf16.msrb.mxu1 %v5738_v58 }
 0x325   :  { %3874 = vmatpush.bf16.msrb.mxu3 %v5750_v20 }
 0x327   :  { %3766 = vmatpush.bf16.msrb.mxu0 %v5737_v38  ;;  %3860 = vmatpush.bf16.msrb.mxu2 %v5749_v15 }
 0x328   :  { %3781 = vmatpush.bf16.msrb.mxu1 %v5737_v38 }
 0x329   :  { %3875 = vmatpush.bf16.msrb.mxu3 %v5749_v15 }
 0x32b   :  { %v3349_v44 = vpop.f32.mrf.mxu0  ;;  %3767 = vmatpush.bf16.msrb.mxu0 %v5736_v40  ;;  %3861 = vmatpush.bf16.msrb.mxu2 %v5748_v11 }
 0x32c   :  { %v3350_v19 = vadd.f32 %v3349_v44, %v2965_v9  ;;  %3782 = vmatpush.bf16.msrb.mxu1 %v5736_v40 }
 0x32d   :  { %v3362_v63 = vpop.f32.mrf.mxu1  ;;  %3876 = vmatpush.bf16.msrb.mxu3 %v5748_v11 }
 0x32e   :  { %v3363_v54 = vadd.f32 %v3362_v63, %v3350_v19  ;;  %v5747_v63 = vld [vmem:[#allocation10 + $0x18] sm:$0xff] }
 0x32f   :  { %3862 = vmatpush.bf16.msrb.mxu2 %v5747_v63 }
 0x331   :  { %3877 = vmatpush.bf16.msrb.mxu3 %v5747_v63 }
 0x333   :  { %v3351_v10 = vpop.f32.mrf.mxu0 }
 0x334   :  { %v5745_v10 = vld [vmem:[#allocation10 + $0x8] sm:$0xff] }
 0x335   :  { %v3364_v32 = vpop.f32.mrf.mxu1 }
 0x337   :  { %v3375_v18 = vpop.f32.mrf.mxu2 }
 0x338   :  { %v3376_v61 = vadd.f32 %v3375_v18, %v3363_v54  ;;  %v3388_v37 = vpop.f32.mrf.mxu3 }
 0x33a   :  { %v3389_v52 = vadd.f32 %v3388_v37, %v3376_v61  ;;  %v5744_v61 = vld [vmem:[#allocation10] sm:$0xff] }
 0x33c   :  { %v3393_v56 = vmax.f32 %v3389_v52, 0.0 }
 0x33e   :  { %v3395_v30 = vpack.c.bf16 %v3393_v56, %v3393_v56 }
 0x33f   :  { %v3377_v14 = vpop.f32.mrf.mxu2 }
 0x340   :  { %v3390_v29 = vpop.f32.mrf.mxu3  ;;  %3657 = vmatmul.bf16.vlgmr.msra.gmra.mxu1 %v3395_v30  ;;  %v5767_v30 = vld [vmem:[%s7623_s10] ss:$0 sm:$0xff] }
 0x34b   :  { %v3405_v53 = vpop.f32.mrf.mxu0 }
 0x34c   :  { %v3406_v48 = vadd.f32 %v3405_v53, %v2964_v50 }
 0x34d   :  { %v3418_v49 = vpop.f32.mrf.mxu1 }
 0x34e   :  { %v3419_v24 = vadd.f32 %v3418_v49, %v3406_v48 }
 0x353   :  { %v3407_v16 = vpop.f32.mrf.mxu0 }
 0x355   :  { %v3420_v8 = vpop.f32.mrf.mxu1 }
 0x357   :  { %v3431_v35 = vpop.f32.mrf.mxu2 }
 0x358   :  { %v3432_v59 = vadd.f32 %v3431_v35, %v3419_v24 }
 0x35f   :  { %v3433_v62 = vpop.f32.mrf.mxu2 }
 0x36b   :  { %v3457_v57 = vpop.f32.mrf.mxu0 }
 0x36c   :  { %v3470_v34 = vpop.f32.mrf.mxu1  ;;  %v3458_v25 = vadd.f32 %v3457_v57, %v2965_v9  ;;  %v5746_v9 = vld [vmem:[#allocation10 + $0x10] sm:$0xff] }
 0x36d   :  { %3863 = vmatpush.bf16.msrb.mxu2 %v5746_v9  ;;  %3878 = vmatpush.bf16.msrb.mxu3 %v5746_v9 }
 0x36e   :  { %v3471_v51 = vadd.f32 %v3470_v34, %v3458_v25 }
 0x371   :  { %3864 = vmatpush.bf16.msrb.mxu2 %v5745_v10  ;;  %3879 = vmatpush.bf16.msrb.mxu3 %v5745_v10 }
 0x373   :  { %v3459_v17 = vpop.f32.mrf.mxu0 }
 0x374   :  { %v3472_v23 = vpop.f32.mrf.mxu1  ;;  %v5768_v17 = vld [vmem:[%s7625_s12] ss:$0 sm:$0xff] }
 0x375   :  { %3865 = vmatpush.bf16.msrb.mxu2 %v5744_v61  ;;  %3880 = vmatpush.bf16.msrb.mxu3 %v5744_v61 }
 0x377   :  { %v3483_v27 = vpop.f32.mrf.mxu2 }
 0x378   :  { %v3484_v0 = vadd.f32 %v3483_v27, %v3471_v51 }
 0x37f   :  { %v3485_v1 = vpop.f32.mrf.mxu2 }
 0x383   :  { %v3444_v47 = vpop.f32.mrf.mxu3 }
 0x384   :  { %v3445_v43 = vadd.f32 %v3444_v47, %v3432_v59 }
 0x386   :  { %v3500_v7 = vmax.f32 %v3445_v43, 0.0 }
 0x388   :  { %v3502_v42 = vpack.c.bf16 %v3500_v7, %v3500_v7 }
 0x38a   :  { %3672 = vmatmul.bf16.vlgmr.msra.gmra.mxu2 %v3502_v42 }
 0x38b   :  { %v3446_v3 = vpop.f32.mrf.mxu3 }
 0x393   :  { %v3496_v12 = vpop.f32.mrf.mxu3 }
 0x394   :  { %v3497_v5 = vadd.f32 %v3496_v12, %v3484_v0 }
 0x396   :  { %v3501_v36 = vmax.f32 %v3497_v5, 0.0 }
 0x398   :  { %v3503_v50 = vpack.c.bf16 %v3501_v36, %v3501_v36 }
 0x39a   :  { %3685 = vmatmul.bf16.vlgmr.msra.gmra.mxu3 %v3503_v50 }
 0x39b   :  { %v3498_v2 = vpop.f32.mrf.mxu3 }
 0x39d   :  { %v3645_v28 = vpop.f32.mrf.mxu0 }
 0x39e   :  { %v3646_v33 = vadd.f32 %v5766_v4, %v3645_v28 }
 0x3a5   :  { %v3647_v13 = vpop.f32.mrf.mxu0 }
 0x3bd   :  { %v3658_v39 = vpop.f32.mrf.mxu1 }
 0x3be   :  { %v3659_v41 = vadd.f32 %v3658_v39, %v3646_v33 }
 0x3c0   :  { %v3662_v46 = vmax.f32 %v3659_v41, 0.0 }
 0x3c2   :  { %v3663_v31 = vpack.c.bf16 %v3662_v46, %v3662_v46 }
 0x3c4   :  { %3768 = vmatmul.bf16.vlgmr.msrb.gmra.mxu0 %v3663_v31 }
 0x3c5   :  { %v3660_v6 = vpop.f32.mrf.mxu1 }
 0x40d   :  { %v3673_v44 = vpop.f32.mrf.mxu2 }
 0x40e   :  { %v3674_v32 = vadd.f32 %v5766_v4, %v3673_v44 }
 0x415   :  { %v3675_v19 = vpop.f32.mrf.mxu2 }
 0x41d   :  { %v3686_v54 = vpop.f32.mrf.mxu3 }
 0x41e   :  { %v3687_v18 = vadd.f32 %v3686_v54, %v3674_v32 }
 0x420   :  { %v3690_v37 = vmax.f32 %v3687_v18, 0.0 }
 0x422   :  { %v3691_v52 = vpack.c.bf16 %v3690_v37, %v3690_v37 }
 0x424   :  { %3783 = vmatmul.bf16.vlgmr.msrb.gmra.mxu1 %v3691_v52 }
 0x425   :  { %v3688_v56 = vpop.f32.mrf.mxu3 }
 0x441   :  { %v3769_v14 = vpop.f32.mrf.mxu0 }
 0x442   :  { %v3770_v29 = vadd.f32 %v5767_v30, %v3769_v14 }
 0x444   :  { %v3773_v53 = vmax.f32 %v3770_v29, 0.0 }
 0x446   :  { %v3774_v49 = vpack.c.bf16 %v3773_v53, %v3773_v53 }
 0x448   :  { %3866 = vmatmul.bf16.vlgmr.msrb.gmra.mxu2 %v3774_v49 }
 0x449   :  { %v3771_v16 = vpop.f32.mrf.mxu0 }
 0x4a1   :  { %v3784_v8 = vpop.f32.mrf.mxu1 }
 0x4a2   :  { %v3785_v35 = vadd.f32 %v5767_v30, %v3784_v8 }
 0x4a4   :  { %v3788_v62 = vmax.f32 %v3785_v35, 0.0 }
 0x4a6   :  { %v3789_v57 = vpack.c.bf16 %v3788_v62, %v3788_v62 }
 0x4a8   :  { %3881 = vmatmul.bf16.vlgmr.msrb.gmra.mxu3 %v3789_v57 }
 0x4a9   :  { %v3786_v34 = vpop.f32.mrf.mxu1 }
 0x4cb   :  { %v3867_v23 = vpop.f32.mrf.mxu2 }
 0x4cc   :  { %v3868_v27 = vadd.f32 %v5768_v17, %v3867_v23 }
 0x4ce   :  { %v3871_v1 = vmax.f32 %v3868_v27, 0.0 }
 0x4d0   :  { %3872 = vst [vmem:[%s7626_s13] sm:$0xff] %v3871_v1 }
 0x4d3   :  { %v3869_v26 = vpop.f32.mrf.mxu2 }
 0x52b   :  { %v3882_v48 = vpop.f32.mrf.mxu3 }
 0x52c   :  { %v3883_v24 = vadd.f32 %v5768_v17, %v3882_v48 }
 0x52e   :  { %v3886_v59 = vmax.f32 %v3883_v24, 0.0 }
 0x530   :  { %3887 = vst [vmem:[%s7626_s13 + $0x8] sm:$0xff] %v3886_v59 }
 0x533   :  { %v3884_v45 = vpop.f32.mrf.mxu3 }
 0x534   :  { %3892 = vsyncpa [#allocation3], 1 }
 0x535   :  { %3893 = vsyncpa [#allocation5], 1 }
 0x536   :  { %3894 = vsyncpa [#allocation8], 1 }
 0x537   :  { %3895 = vsyncpa [#allocation11], 1 }

</bundles_post_ra>
